<compile_context>
chip_gen: v7x
topology: tpu7x:2x2x1
jax: 0.10.0
libtpu: 0.0.40
codegen_flags: <defaults>
</compile_context>

<pallas_src>
import functools

import jax
import jax.numpy as jnp
import numpy as np
from jax import lax
from jax.experimental import pallas as pl
from jax.experimental.pallas import tpu as pltpu


# ----------------------------------------------------------------------------
# Pallas kernel: CBAM for a block of `bb` images, each seen as (C, H*W).
# ----------------------------------------------------------------------------
def _cbam_kernel(x_ref, w1_ref, w2_ref, ws_ref, o_ref, spad_ref, srow_ref,
                 *, bb, h, w):
    f32 = jnp.float32
    hw = h * w

    # Hoisted constants / weights (traced once per grid step; JAX does not CSE
    # broadcast_in_dim inside loops).
    w1 = w1_ref[...].astype(f32)                      # (Cr, C)
    w2 = w2_ref[...].astype(f32)                      # (C, Cr)
    c = w2.shape[0]
    ones_c = jnp.ones((1, c), f32)                    # MXU row for channel-sum
    col_sel = lax.broadcasted_iota(jnp.int32, (1, 2), 1) == 0   # [avg | max]
    inv_c = 1.0 / float(c)

    # Zero the padded 2-channel spatial scratch.  The interior is fully
    # rewritten per image; the 3-wide borders must stay zero (exact Conv2d
    # zero-padding).  Zeroed every grid step (not only at program_id == 0) so
    # it stays correct when the batch axis is split across TensorCores.
    spad_ref[...] = jnp.zeros(spad_ref.shape, f32)

    # Round-robin accumulators to break the 49-long VALU dependency chain
    # (4 for small maps, 2 for large maps to limit vreg pressure).
    tiles = ((h + 7) // 8) * ((w + 127) // 128)
    n_acc = 4 if tiles <= 4 else 2

    def per_image(b, carry):
        x = x_ref[b].astype(f32)                      # (C, HW)

        # ---- channel attention ------------------------------------------
        # HW mean/max stay on VPU/XLU (exact f32); both pooled vectors go
        # through one fused (C, 2) MLP pass.
        avg = jnp.mean(x, axis=-1, keepdims=True)     # (C, 1)
        mx = jnp.max(x, axis=-1, keepdims=True)       # (C, 1)
        pm = jnp.where(col_sel, avg, mx)              # (C, 2)
        hid = jnp.maximum(
            jnp.dot(w1, pm, preferred_element_type=f32), 0.0)   # (Cr, 2)
        z = jnp.dot(w2, hid, preferred_element_type=f32)        # (C, 2)
        ca = jax.nn.sigmoid(z[:, 0:1] + z[:, 1:2])               # (C, 1)
        xc = x * ca                                   # (C, HW)

        # Park the channel-scaled tensor in the output block so it does not
        # stay live in vregs across the spatial-attention phase.
        o_ref[b] = xc.astype(o_ref.dtype)

        # ---- spatial attention --------------------------------------------
        # Channel-mean on the (otherwise idle) MXU; channel-max on the VPU.
        mean_c = jnp.dot(ones_c, xc, preferred_element_type=f32) * inv_c  # (1, HW)
        max_c = jnp.max(xc, axis=0, keepdims=True)                        # (1, HW)
        srow_ref[pl.ds(0, 1), :] = mean_c
        srow_ref[pl.ds(1, 1), :] = max_c

        # Relayout the flat maps into the (H+6, W+6) zero-padded 2-D scratch
        # (row-by-row copies; tap lane shifts are then limited to +-3).
        for i in range(h):
            spad_ref[0, pl.ds(3 + i, 1), pl.ds(3, w)] = (
                srow_ref[pl.ds(0, 1), pl.ds(i * w, w)])
            spad_ref[1, pl.ds(3 + i, 1), pl.ds(3, w)] = (
                srow_ref[pl.ds(1, 1), pl.ds(i * w, w)])

        # 7x7 conv as 49 shifted (H, W) windows x scalar tap weights (SMEM).
        accs = [jnp.zeros((h, w), f32) for _ in range(n_acc)]
        t = 0
        for ki in range(7):
            for kj in range(7):
                wa = ws_ref[0, t]                                 # scalar (SMEM)
                wb = ws_ref[1, t]
                win_a = spad_ref[0, pl.ds(ki, h), pl.ds(kj, w)]   # (H, W)
                win_b = spad_ref[1, pl.ds(ki, h), pl.ds(kj, w)]   # (H, W)
                accs[t % n_acc] = accs[t % n_acc] + (wa * win_a + wb * win_b)
                t += 1
        acc = accs[0]
        for extra in accs[1:]:
            acc = acc + extra
        sa2d = jax.nn.sigmoid(acc)                                # (H, W)

        # Relayout the attention map back to a flat (1, HW) row.
        for i in range(h):
            srow_ref[pl.ds(0, 1), pl.ds(i * w, w)] = sa2d[i:i + 1, :]
        sa = srow_ref[pl.ds(0, 1), :]                             # (1, HW)

        o_ref[b] = (o_ref[b].astype(f32) * sa).astype(o_ref.dtype)
        return carry

    lax.fori_loop(0, bb, per_image, 0)


# ----------------------------------------------------------------------------
# Host-side helpers.
# ----------------------------------------------------------------------------
def _vmem_capacity_bytes():
    try:
        return int(pltpu.get_tpu_info().vmem_capacity_bytes)
    except Exception:
        return 128 << 20


def _pick_batch_block(n, c_pad, hw_pad, itemsize, budget_bytes):
    per_image = 4 * c_pad * hw_pad * itemsize      # in + out, double-buffered
    bb = int(max(1, min(n, budget_bytes // max(per_image, 1))))
    if n >= 2:
        # Keep >= 2 grid steps so a "parallel" batch axis can be sharded
        # across both TensorCores on megacore parts (v7x).
        bb = min(bb, n // 2)
    bb = max(bb, 1)
    while n % bb:
        bb -= 1
    return bb


def cbam_pallas(x_nchw, w1, w2, w_spatial):
    """One CBAM block on an NCHW feature map via a Pallas TPU kernel."""
    N, C, H, W = x_nchw.shape
    HW = H * W
    Cr = w1.shape[0]
    itemsize = jnp.dtype(x_nchw.dtype).itemsize

    x2 = x_nchw.reshape(N, C, HW)
    ws = w_spatial.reshape(2, 49).astype(jnp.float32)   # per-tap scalar weights

    # Padded tile sizes (f32 sublane tile = 8, lane tile = 128).
    c_pad = -(-C // 8) * 8
    hw_pad = -(-HW // 128) * 128

    vmem_cap = _vmem_capacity_bytes()
    budget = (8 << 20) if vmem_cap <= (64 << 20) else (20 << 20)
    bb = _pick_batch_block(N, c_pad, hw_pad, itemsize, budget)

    # Explicit VMEM accounting for the compiler limit.
    block_bytes = 4 * bb * c_pad * hw_pad * itemsize           # in+out, dbuf
    weight_bytes = 2 * 4 * ((-(-Cr // 8) * 8) * (-(-C // 128) * 128)
                            + (-(-C // 8) * 8) * (-(-Cr // 128) * 128))
    scratch_bytes = 4 * (2 * (-(-(H + 6) // 8) * 8) * (-(-(W + 6) // 128) * 128)
                         + 2 * hw_pad)
    vmem_limit = int(min(max(block_bytes + weight_bytes + scratch_bytes
                             + (8 << 20), 32 << 20), 112 << 20))

    kernel = functools.partial(_cbam_kernel, bb=bb, h=H, w=W)

    out = pl.pallas_call(
        kernel,
        out_shape=jax.ShapeDtypeStruct((N, C, HW), x_nchw.dtype),
        grid_spec=pltpu.PrefetchScalarGridSpec(
            num_scalar_prefetch=0,
            grid=(N // bb,),
            in_specs=[
                pl.BlockSpec((bb, C, HW), lambda n: (n, 0, 0)),   # bb images
                pl.BlockSpec((Cr, C), lambda n: (0, 0)),          # fc1 weight
                pl.BlockSpec((C, Cr), lambda n: (0, 0)),          # fc2 weight
                pl.BlockSpec(memory_space=pltpu.MemorySpace.SMEM),  # (2,49) taps
            ],
            out_specs=pl.BlockSpec((bb, C, HW), lambda n: (n, 0, 0)),
            scratch_shapes=[
                pltpu.VMEM((2, H + 6, W + 6), jnp.float32),   # zero-padded maps
                pltpu.VMEM((2, HW), jnp.float32),             # flat<->2D staging
            ],
        ),
        compiler_params=pltpu.CompilerParams(
            dimension_semantics=("parallel",),
            vmem_limit_bytes=vmem_limit),
    )(x2, w1, w2, ws)
    return out.reshape(N, C, H, W)


def cbam_layers_forward(x_list, params_list, startp, endp):
    """Mirror of CBAM_layers.forward: x[i] = cbam_{i-startp}(x[i])."""
    x_list = list(x_list)
    for i in range(startp, endp + 1):
        w1, w2, w_spatial = params_list[i - startp]
        x_list[i] = cbam_pallas(x_list[i], w1, w2, w_spatial)
    return x_list


# ----------------------------------------------------------------------------
# Pure-JAX reference (high-precision, for the correctness check).
# ----------------------------------------------------------------------------
def cbam_ref(x, w1, w2, w_spatial):
    hp = jax.lax.Precision.HIGHEST
    avg = x.mean(axis=(2, 3))
    mx = x.max(axis=(2, 3))

    def mlp(v):                      # (N, C)
        hid = jax.nn.relu(jnp.dot(v, w1.T, precision=hp))
        return jnp.dot(hid, w2.T, precision=hp)

    ca = jax.nn.sigmoid(mlp(avg) + mlp(mx))[:, :, None, None]
    xc = x * ca
    s = jnp.concatenate([xc.mean(axis=1, keepdims=True),
                         xc.max(axis=1, keepdims=True)], axis=1)
    conv = jax.lax.conv_general_dilated(
        s, w_spatial, window_strides=(1, 1), padding=((3, 3), (3, 3)),
        dimension_numbers=("NCHW", "OIHW", "NCHW"), precision=hp)
    return xc * jax.nn.sigmoid(conv)


# ----------------------------------------------------------------------------
if __name__ == "__main__":
    key = jax.random.PRNGKey(0)
    batch = 2
    channels = [16, 32]       # one CBAM per feature level
    spatial = [16, 8]         # PAN levels have different strides
    ratio = 4                 # channel-attention reduction ratio

    keys = jax.random.split(key, len(channels))
    x_list, params = [], []
    for lvl, (C, S) in enumerate(zip(channels, spatial)):
        kx, kw1, kw2, kws = jax.random.split(keys[lvl], 4)
        x_list.append(jax.random.normal(kx, (batch, C, S, S), jnp.float32))
        Cr = max(C // ratio, 1)
        # Deterministic synthetic parameters (shapes follow nn.Conv2d weights).
        w1 = jax.random.normal(kw1, (Cr, C), jnp.float32) * (1.0 / C ** 0.5)
        w2 = jax.random.normal(kw2, (C, Cr), jnp.float32) * (1.0 / Cr ** 0.5)
        w_spatial = jax.random.normal(kws, (1, 2, 7, 7), jnp.float32) * 0.1
        params.append((w1, w2, w_spatial))

    out = cbam_layers_forward(x_list, params, startp=0, endp=len(channels) - 1)
    out = [jax.block_until_ready(o) for o in out]

    for lvl in range(len(channels)):
        ref = cbam_ref(x_list[lvl], *params[lvl])
        np.testing.assert_allclose(np.asarray(out[lvl]), np.asarray(ref),
                                   rtol=1e-3, atol=1e-3)

    print("KERNEL_OK")
</pallas_src>

<mosaic_0001>
module attributes {stable_mosaic.version = 11 : i64} {
  func.func @_cbam_kernel(%arg0: i32, %arg1: memref<1x16x256xf32, #tpu.memory_space<vmem>>, %arg2: memref<4x16xf32, #tpu.memory_space<vmem>>, %arg3: memref<16x4xf32, #tpu.memory_space<vmem>>, %arg4: memref<2x49xf32, #tpu.memory_space<smem>>, %arg5: memref<1x16x256xf32, #tpu.memory_space<vmem>>, %arg6: memref<2x22x22xf32, #tpu.memory_space<vmem>>, %arg7: memref<2x256xf32, #tpu.memory_space<vmem>>) attributes {dimension_semantics = [#tpu.dimension_semantics<parallel>], iteration_bounds = array<i64: 2>, scalar_prefetch = 0 : i64, scratch_operands = 2 : i64, tpu.core_type = #tpu.core_type<tc>, window_params = [{transform_indices = @transform_0, window_bounds = array<i64: 1, 16, 256>}, {pipeline_mode = #tpu.pipeline_mode<synchronous>, transform_indices = @transform_1, window_bounds = array<i64: 4, 16>}, {pipeline_mode = #tpu.pipeline_mode<synchronous>, transform_indices = @transform_2, window_bounds = array<i64: 16, 4>}, {transform_indices = @transform_3, window_bounds = array<i64: 2, 49>}, {transform_indices = @transform_4, window_bounds = array<i64: 1, 16, 256>}]} {
    %c0 = arith.constant 0 : index
    %c0_0 = arith.constant 0 : index
    %0 = vector.load %arg2[%c0, %c0_0] : memref<4x16xf32, #tpu.memory_space<vmem>>, vector<4x16xf32>
    %c0_1 = arith.constant 0 : index
    %c0_2 = arith.constant 0 : index
    %1 = vector.load %arg3[%c0_1, %c0_2] : memref<16x4xf32, #tpu.memory_space<vmem>>, vector<16x4xf32>
    %cst = arith.constant 1.000000e+00 : f32
    %2 = vector.broadcast %cst : f32 to vector<1x16xf32>
    %3 = tpu.iota {dimensions = array<i32: 1>} : vector<1x2xi32>
    %c0_i32 = arith.constant 0 : i32
    %4 = vector.broadcast %c0_i32 : i32 to vector<1x2xi32>
    %5 = arith.cmpi eq, %3, %4 : vector<1x2xi32>
    %cst_3 = arith.constant 0.000000e+00 : f32
    %6 = vector.broadcast %cst_3 : f32 to vector<2x22x22xf32>
    %c0_4 = arith.constant 0 : index
    %c0_5 = arith.constant 0 : index
    %c0_6 = arith.constant 0 : index
    %7 = vector.load %arg6[%c0_4, %c0_5, %c0_6] : memref<2x22x22xf32, #tpu.memory_space<vmem>>, vector<2x22x22xf32>
    tpu.vector_store %arg6[%c0_4, %c0_5, %c0_6], %6 {strides = array<i32>} : memref<2x22x22xf32, #tpu.memory_space<vmem>>, vector<2x22x22xf32>,
    %c0_i32_7 = arith.constant 0 : i32
    %8 = arith.index_cast %c0_i32_7 : i32 to index
    %c0_8 = arith.constant 0 : index
    %c0_9 = arith.constant 0 : index
    %9 = vector.load %arg1[%8, %c0_8, %c0_9] : memref<1x16x256xf32, #tpu.memory_space<vmem>>, vector<1x16x256xf32>
    %10 = vector.shape_cast %9 : vector<1x16x256xf32> to vector<16x256xf32>
    %cst_10 = arith.constant dense<0.000000e+00> : vector<16xf32>
    %11 = vector.multi_reduction <add>, %10, %cst_10 [1] : vector<16x256xf32> to vector<16xf32>
    %12 = vector.shape_cast %11 : vector<16xf32> to vector<16x1xf32>
    %cst_11 = arith.constant 2.560000e+02 : f32
    %13 = vector.broadcast %cst_11 : f32 to vector<16x1xf32>
    %14 = arith.divf %12, %13 : vector<16x1xf32>
    %cst_12 = arith.constant dense<0xFF800000> : vector<16xf32>
    %15 = vector.multi_reduction <maximumf>, %10, %cst_12 [1] : vector<16x256xf32> to vector<16xf32>
    %16 = vector.shape_cast %15 : vector<16xf32> to vector<16x1xf32>
    %17 = vector.shape_cast %5 : vector<1x2xi1> to vector<1x2xi1>
    %18 = vector.broadcast %17 : vector<1x2xi1> to vector<16x2xi1>
    %19 = vector.shape_cast %14 : vector<16x1xf32> to vector<16x1xf32>
    %20 = vector.broadcast %19 : vector<16x1xf32> to vector<16x2xf32>
    %21 = vector.shape_cast %16 : vector<16x1xf32> to vector<16x1xf32>
    %22 = vector.broadcast %21 : vector<16x1xf32> to vector<16x2xf32>
    %23 = arith.select %18, %20, %22 : vector<16x2xi1>, vector<16x2xf32>
    %cst_13 = arith.constant dense<0.000000e+00> : vector<4x2xf32>
    %24 = tpu.matmul %0, %23, %cst_13 {dimension_numbers = #tpu.dot_dimension_numbers<[1], [0], [0], [1], [0, 0, 1, 1], [], []>} : vector<4x16xf32>, vector<16x2xf32>, vector<4x2xf32> -> vector<4x2xf32>
    %cst_14 = arith.constant 0.000000e+00 : f32
    %25 = vector.broadcast %cst_14 : f32 to vector<4x2xf32>
    %26 = arith.maximumf %24, %25 : vector<4x2xf32>
    %cst_15 = arith.constant dense<0.000000e+00> : vector<16x2xf32>
    %27 = tpu.matmul %1, %26, %cst_15 {dimension_numbers = #tpu.dot_dimension_numbers<[1], [0], [0], [1], [0, 0, 1, 1], [], []>} : vector<16x4xf32>, vector<4x2xf32>, vector<16x2xf32> -> vector<16x2xf32>
    %28 = vector.extract_strided_slice %27 {offsets = [0, 0], sizes = [16, 1], strides = [1, 1]} : vector<16x2xf32> to vector<16x1xf32>
    %29 = vector.extract_strided_slice %27 {offsets = [0, 1], sizes = [16, 1], strides = [1, 1]} : vector<16x2xf32> to vector<16x1xf32>
    %30 = arith.addf %28, %29 : vector<16x1xf32>
    %31 = arith.negf %30 : vector<16x1xf32>
    %32 = math.exp %31 : vector<16x1xf32>
    %cst_16 = arith.constant 1.000000e+00 : f32
    %33 = vector.broadcast %cst_16 : f32 to vector<16x1xf32>
    %34 = arith.addf %33, %32 : vector<16x1xf32>
    %35 = arith.divf %33, %34 : vector<16x1xf32>
    %36 = vector.broadcast %35 : vector<16x1xf32> to vector<16x256xf32>
    %37 = arith.mulf %10, %36 : vector<16x256xf32>
    %38 = arith.index_cast %c0_i32_7 : i32 to index
    %c0_17 = arith.constant 0 : index
    %c0_18 = arith.constant 0 : index
    %39 = vector.load %arg5[%38, %c0_17, %c0_18] : memref<1x16x256xf32, #tpu.memory_space<vmem>>, vector<1x16x256xf32>
    %40 = vector.shape_cast %39 : vector<1x16x256xf32> to vector<16x256xf32>
    %41 = vector.shape_cast %37 : vector<16x256xf32> to vector<1x16x256xf32>
    tpu.vector_store %arg5[%38, %c0_17, %c0_18], %41 {strides = array<i32>} : memref<1x16x256xf32, #tpu.memory_space<vmem>>, vector<1x16x256xf32>,
    %cst_19 = arith.constant dense<0.000000e+00> : vector<1x256xf32>
    %42 = tpu.matmul %2, %37, %cst_19 {dimension_numbers = #tpu.dot_dimension_numbers<[1], [0], [0], [1], [0, 0, 1, 1], [], []>} : vector<1x16xf32>, vector<16x256xf32>, vector<1x256xf32> -> vector<1x256xf32>
    %cst_20 = arith.constant 6.250000e-02 : f32
    %43 = vector.broadcast %cst_20 : f32 to vector<1x256xf32>
    %44 = arith.mulf %42, %43 : vector<1x256xf32>
    %cst_21 = arith.constant dense<0xFF800000> : vector<256xf32>
    %45 = vector.multi_reduction <maximumf>, %37, %cst_21 [0] : vector<16x256xf32> to vector<256xf32>
    %46 = vector.shape_cast %45 : vector<256xf32> to vector<1x256xf32>
    %c0_22 = arith.constant 0 : index
    %c0_23 = arith.constant 0 : index
    %47 = vector.load %arg7[%c0_22, %c0_23] : memref<2x256xf32, #tpu.memory_space<vmem>>, vector<1x256xf32>
    tpu.vector_store %arg7[%c0_22, %c0_23], %44 {strides = array<i32>} : memref<2x256xf32, #tpu.memory_space<vmem>>, vector<1x256xf32>,
    %c1 = arith.constant 1 : index
    %c0_24 = arith.constant 0 : index
    %48 = vector.load %arg7[%c1, %c0_24] : memref<2x256xf32, #tpu.memory_space<vmem>>, vector<1x256xf32>
    tpu.vector_store %arg7[%c1, %c0_24], %46 {strides = array<i32>} : memref<2x256xf32, #tpu.memory_space<vmem>>, vector<1x256xf32>,
    %c0_25 = arith.constant 0 : index
    %c0_26 = arith.constant 0 : index
    %49 = vector.load %arg7[%c0_25, %c0_26] : memref<2x256xf32, #tpu.memory_space<vmem>>, vector<1x16xf32>
    %c0_27 = arith.constant 0 : index
    %c3 = arith.constant 3 : index
    %c3_28 = arith.constant 3 : index
    %50 = vector.load %arg6[%c0_27, %c3, %c3_28] : memref<2x22x22xf32, #tpu.memory_space<vmem>>, vector<1x1x16xf32>
    %51 = vector.shape_cast %50 : vector<1x1x16xf32> to vector<1x16xf32>
    %52 = vector.shape_cast %49 : vector<1x16xf32> to vector<1x1x16xf32>
    tpu.vector_store %arg6[%c0_27, %c3, %c3_28], %52 {strides = array<i32>} : memref<2x22x22xf32, #tpu.memory_space<vmem>>, vector<1x1x16xf32>,
    %c1_29 = arith.constant 1 : index
    %c0_30 = arith.constant 0 : index
    %53 = vector.load %arg7[%c1_29, %c0_30] : memref<2x256xf32, #tpu.memory_space<vmem>>, vector<1x16xf32>
    %c1_31 = arith.constant 1 : index
    %c3_32 = arith.constant 3 : index
    %c3_33 = arith.constant 3 : index
    %54 = vector.load %arg6[%c1_31, %c3_32, %c3_33] : memref<2x22x22xf32, #tpu.memory_space<vmem>>, vector<1x1x16xf32>
    %55 = vector.shape_cast %54 : vector<1x1x16xf32> to vector<1x16xf32>
    %56 = vector.shape_cast %53 : vector<1x16xf32> to vector<1x1x16xf32>
    tpu.vector_store %arg6[%c1_31, %c3_32, %c3_33], %56 {strides = array<i32>} : memref<2x22x22xf32, #tpu.memory_space<vmem>>, vector<1x1x16xf32>,
    %c0_34 = arith.constant 0 : index
    %c16 = arith.constant 16 : index
    %57 = vector.load %arg7[%c0_34, %c16] : memref<2x256xf32, #tpu.memory_space<vmem>>, vector<1x16xf32>
    %c0_35 = arith.constant 0 : index
    %c4 = arith.constant 4 : index
    %c3_36 = arith.constant 3 : index
    %58 = vector.load %arg6[%c0_35, %c4, %c3_36] : memref<2x22x22xf32, #tpu.memory_space<vmem>>, vector<1x1x16xf32>
    %59 = vector.shape_cast %58 : vector<1x1x16xf32> to vector<1x16xf32>
    %60 = vector.shape_cast %57 : vector<1x16xf32> to vector<1x1x16xf32>
    tpu.vector_store %arg6[%c0_35, %c4, %c3_36], %60 {strides = array<i32>} : memref<2x22x22xf32, #tpu.memory_space<vmem>>, vector<1x1x16xf32>,
    %c1_37 = arith.constant 1 : index
    %c16_38 = arith.constant 16 : index
    %61 = vector.load %arg7[%c1_37, %c16_38] : memref<2x256xf32, #tpu.memory_space<vmem>>, vector<1x16xf32>
    %c1_39 = arith.constant 1 : index
    %c4_40 = arith.constant 4 : index
    %c3_41 = arith.constant 3 : index
    %62 = vector.load %arg6[%c1_39, %c4_40, %c3_41] : memref<2x22x22xf32, #tpu.memory_space<vmem>>, vector<1x1x16xf32>
    %63 = vector.shape_cast %62 : vector<1x1x16xf32> to vector<1x16xf32>
    %64 = vector.shape_cast %61 : vector<1x16xf32> to vector<1x1x16xf32>
    tpu.vector_store %arg6[%c1_39, %c4_40, %c3_41], %64 {strides = array<i32>} : memref<2x22x22xf32, #tpu.memory_space<vmem>>, vector<1x1x16xf32>,
    %c0_42 = arith.constant 0 : index
    %c32 = arith.constant 32 : index
    %65 = vector.load %arg7[%c0_42, %c32] : memref<2x256xf32, #tpu.memory_space<vmem>>, vector<1x16xf32>
    %c0_43 = arith.constant 0 : index
    %c5 = arith.constant 5 : index
    %c3_44 = arith.constant 3 : index
    %66 = vector.load %arg6[%c0_43, %c5, %c3_44] : memref<2x22x22xf32, #tpu.memory_space<vmem>>, vector<1x1x16xf32>
    %67 = vector.shape_cast %66 : vector<1x1x16xf32> to vector<1x16xf32>
    %68 = vector.shape_cast %65 : vector<1x16xf32> to vector<1x1x16xf32>
    tpu.vector_store %arg6[%c0_43, %c5, %c3_44], %68 {strides = array<i32>} : memref<2x22x22xf32, #tpu.memory_space<vmem>>, vector<1x1x16xf32>,
    %c1_45 = arith.constant 1 : index
    %c32_46 = arith.constant 32 : index
    %69 = vector.load %arg7[%c1_45, %c32_46] : memref<2x256xf32, #tpu.memory_space<vmem>>, vector<1x16xf32>
    %c1_47 = arith.constant 1 : index
    %c5_48 = arith.constant 5 : index
    %c3_49 = arith.constant 3 : index
    %70 = vector.load %arg6[%c1_47, %c5_48, %c3_49] : memref<2x22x22xf32, #tpu.memory_space<vmem>>, vector<1x1x16xf32>
    %71 = vector.shape_cast %70 : vector<1x1x16xf32> to vector<1x16xf32>
    %72 = vector.shape_cast %69 : vector<1x16xf32> to vector<1x1x16xf32>
    tpu.vector_store %arg6[%c1_47, %c5_48, %c3_49], %72 {strides = array<i32>} : memref<2x22x22xf32, #tpu.memory_space<vmem>>, vector<1x1x16xf32>,
    %c0_50 = arith.constant 0 : index
    %c48 = arith.constant 48 : index
    %73 = vector.load %arg7[%c0_50, %c48] : memref<2x256xf32, #tpu.memory_space<vmem>>, vector<1x16xf32>
    %c0_51 = arith.constant 0 : index
    %c6 = arith.constant 6 : index
    %c3_52 = arith.constant 3 : index
    %74 = vector.load %arg6[%c0_51, %c6, %c3_52] : memref<2x22x22xf32, #tpu.memory_space<vmem>>, vector<1x1x16xf32>
    %75 = vector.shape_cast %74 : vector<1x1x16xf32> to vector<1x16xf32>
    %76 = vector.shape_cast %73 : vector<1x16xf32> to vector<1x1x16xf32>
    tpu.vector_store %arg6[%c0_51, %c6, %c3_52], %76 {strides = array<i32>} : memref<2x22x22xf32, #tpu.memory_space<vmem>>, vector<1x1x16xf32>,
    %c1_53 = arith.constant 1 : index
    %c48_54 = arith.constant 48 : index
    %77 = vector.load %arg7[%c1_53, %c48_54] : memref<2x256xf32, #tpu.memory_space<vmem>>, vector<1x16xf32>
    %c1_55 = arith.constant 1 : index
    %c6_56 = arith.constant 6 : index
    %c3_57 = arith.constant 3 : index
    %78 = vector.load %arg6[%c1_55, %c6_56, %c3_57] : memref<2x22x22xf32, #tpu.memory_space<vmem>>, vector<1x1x16xf32>
    %79 = vector.shape_cast %78 : vector<1x1x16xf32> to vector<1x16xf32>
    %80 = vector.shape_cast %77 : vector<1x16xf32> to vector<1x1x16xf32>
    tpu.vector_store %arg6[%c1_55, %c6_56, %c3_57], %80 {strides = array<i32>} : memref<2x22x22xf32, #tpu.memory_space<vmem>>, vector<1x1x16xf32>,
    %c0_58 = arith.constant 0 : index
    %c64 = arith.constant 64 : index
    %81 = vector.load %arg7[%c0_58, %c64] : memref<2x256xf32, #tpu.memory_space<vmem>>, vector<1x16xf32>
    %c0_59 = arith.constant 0 : index
    %c7 = arith.constant 7 : index
    %c3_60 = arith.constant 3 : index
    %82 = vector.load %arg6[%c0_59, %c7, %c3_60] : memref<2x22x22xf32, #tpu.memory_space<vmem>>, vector<1x1x16xf32>
    %83 = vector.shape_cast %82 : vector<1x1x16xf32> to vector<1x16xf32>
    %84 = vector.shape_cast %81 : vector<1x16xf32> to vector<1x1x16xf32>
    tpu.vector_store %arg6[%c0_59, %c7, %c3_60], %84 {strides = array<i32>} : memref<2x22x22xf32, #tpu.memory_space<vmem>>, vector<1x1x16xf32>,
    %c1_61 = arith.constant 1 : index
    %c64_62 = arith.constant 64 : index
    %85 = vector.load %arg7[%c1_61, %c64_62] : memref<2x256xf32, #tpu.memory_space<vmem>>, vector<1x16xf32>
    %c1_63 = arith.constant 1 : index
    %c7_64 = arith.constant 7 : index
    %c3_65 = arith.constant 3 : index
    %86 = vector.load %arg6[%c1_63, %c7_64, %c3_65] : memref<2x22x22xf32, #tpu.memory_space<vmem>>, vector<1x1x16xf32>
    %87 = vector.shape_cast %86 : vector<1x1x16xf32> to vector<1x16xf32>
    %88 = vector.shape_cast %85 : vector<1x16xf32> to vector<1x1x16xf32>
    tpu.vector_store %arg6[%c1_63, %c7_64, %c3_65], %88 {strides = array<i32>} : memref<2x22x22xf32, #tpu.memory_space<vmem>>, vector<1x1x16xf32>,
    %c0_66 = arith.constant 0 : index
    %c80 = arith.constant 80 : index
    %89 = vector.load %arg7[%c0_66, %c80] : memref<2x256xf32, #tpu.memory_space<vmem>>, vector<1x16xf32>
    %c0_67 = arith.constant 0 : index
    %c8 = arith.constant 8 : index
    %c3_68 = arith.constant 3 : index
    %90 = vector.load %arg6[%c0_67, %c8, %c3_68] : memref<2x22x22xf32, #tpu.memory_space<vmem>>, vector<1x1x16xf32>
    %91 = vector.shape_cast %90 : vector<1x1x16xf32> to vector<1x16xf32>
    %92 = vector.shape_cast %89 : vector<1x16xf32> to vector<1x1x16xf32>
    tpu.vector_store %arg6[%c0_67, %c8, %c3_68], %92 {strides = array<i32>} : memref<2x22x22xf32, #tpu.memory_space<vmem>>, vector<1x1x16xf32>,
    %c1_69 = arith.constant 1 : index
    %c80_70 = arith.constant 80 : index
    %93 = vector.load %arg7[%c1_69, %c80_70] : memref<2x256xf32, #tpu.memory_space<vmem>>, vector<1x16xf32>
    %c1_71 = arith.constant 1 : index
    %c8_72 = arith.constant 8 : index
    %c3_73 = arith.constant 3 : index
    %94 = vector.load %arg6[%c1_71, %c8_72, %c3_73] : memref<2x22x22xf32, #tpu.memory_space<vmem>>, vector<1x1x16xf32>
    %95 = vector.shape_cast %94 : vector<1x1x16xf32> to vector<1x16xf32>
    %96 = vector.shape_cast %93 : vector<1x16xf32> to vector<1x1x16xf32>
    tpu.vector_store %arg6[%c1_71, %c8_72, %c3_73], %96 {strides = array<i32>} : memref<2x22x22xf32, #tpu.memory_space<vmem>>, vector<1x1x16xf32>,
    %c0_74 = arith.constant 0 : index
    %c96 = arith.constant 96 : index
    %97 = vector.load %arg7[%c0_74, %c96] : memref<2x256xf32, #tpu.memory_space<vmem>>, vector<1x16xf32>
    %c0_75 = arith.constant 0 : index
    %c9 = arith.constant 9 : index
    %c3_76 = arith.constant 3 : index
    %98 = vector.load %arg6[%c0_75, %c9, %c3_76] : memref<2x22x22xf32, #tpu.memory_space<vmem>>, vector<1x1x16xf32>
    %99 = vector.shape_cast %98 : vector<1x1x16xf32> to vector<1x16xf32>
    %100 = vector.shape_cast %97 : vector<1x16xf32> to vector<1x1x16xf32>
    tpu.vector_store %arg6[%c0_75, %c9, %c3_76], %100 {strides = array<i32>} : memref<2x22x22xf32, #tpu.memory_space<vmem>>, vector<1x1x16xf32>,
    %c1_77 = arith.constant 1 : index
    %c96_78 = arith.constant 96 : index
    %101 = vector.load %arg7[%c1_77, %c96_78] : memref<2x256xf32, #tpu.memory_space<vmem>>, vector<1x16xf32>
    %c1_79 = arith.constant 1 : index
    %c9_80 = arith.constant 9 : index
    %c3_81 = arith.constant 3 : index
    %102 = vector.load %arg6[%c1_79, %c9_80, %c3_81] : memref<2x22x22xf32, #tpu.memory_space<vmem>>, vector<1x1x16xf32>
    %103 = vector.shape_cast %102 : vector<1x1x16xf32> to vector<1x16xf32>
    %104 = vector.shape_cast %101 : vector<1x16xf32> to vector<1x1x16xf32>
    tpu.vector_store %arg6[%c1_79, %c9_80, %c3_81], %104 {strides = array<i32>} : memref<2x22x22xf32, #tpu.memory_space<vmem>>, vector<1x1x16xf32>,
    %c0_82 = arith.constant 0 : index
    %c112 = arith.constant 112 : index
    %105 = vector.load %arg7[%c0_82, %c112] : memref<2x256xf32, #tpu.memory_space<vmem>>, vector<1x16xf32>
    %c0_83 = arith.constant 0 : index
    %c10 = arith.constant 10 : index
    %c3_84 = arith.constant 3 : index
    %106 = vector.load %arg6[%c0_83, %c10, %c3_84] : memref<2x22x22xf32, #tpu.memory_space<vmem>>, vector<1x1x16xf32>
    %107 = vector.shape_cast %106 : vector<1x1x16xf32> to vector<1x16xf32>
    %108 = vector.shape_cast %105 : vector<1x16xf32> to vector<1x1x16xf32>
    tpu.vector_store %arg6[%c0_83, %c10, %c3_84], %108 {strides = array<i32>} : memref<2x22x22xf32, #tpu.memory_space<vmem>>, vector<1x1x16xf32>,
    %c1_85 = arith.constant 1 : index
    %c112_86 = arith.constant 112 : index
    %109 = vector.load %arg7[%c1_85, %c112_86] : memref<2x256xf32, #tpu.memory_space<vmem>>, vector<1x16xf32>
    %c1_87 = arith.constant 1 : index
    %c10_88 = arith.constant 10 : index
    %c3_89 = arith.constant 3 : index
    %110 = vector.load %arg6[%c1_87, %c10_88, %c3_89] : memref<2x22x22xf32, #tpu.memory_space<vmem>>, vector<1x1x16xf32>
    %111 = vector.shape_cast %110 : vector<1x1x16xf32> to vector<1x16xf32>
    %112 = vector.shape_cast %109 : vector<1x16xf32> to vector<1x1x16xf32>
    tpu.vector_store %arg6[%c1_87, %c10_88, %c3_89], %112 {strides = array<i32>} : memref<2x22x22xf32, #tpu.memory_space<vmem>>, vector<1x1x16xf32>,
    %c0_90 = arith.constant 0 : index
    %c128 = arith.constant 128 : index
    %113 = vector.load %arg7[%c0_90, %c128] : memref<2x256xf32, #tpu.memory_space<vmem>>, vector<1x16xf32>
    %c0_91 = arith.constant 0 : index
    %c11 = arith.constant 11 : index
    %c3_92 = arith.constant 3 : index
    %114 = vector.load %arg6[%c0_91, %c11, %c3_92] : memref<2x22x22xf32, #tpu.memory_space<vmem>>, vector<1x1x16xf32>
    %115 = vector.shape_cast %114 : vector<1x1x16xf32> to vector<1x16xf32>
    %116 = vector.shape_cast %113 : vector<1x16xf32> to vector<1x1x16xf32>
    tpu.vector_store %arg6[%c0_91, %c11, %c3_92], %116 {strides = array<i32>} : memref<2x22x22xf32, #tpu.memory_space<vmem>>, vector<1x1x16xf32>,
    %c1_93 = arith.constant 1 : index
    %c128_94 = arith.constant 128 : index
    %117 = vector.load %arg7[%c1_93, %c128_94] : memref<2x256xf32, #tpu.memory_space<vmem>>, vector<1x16xf32>
    %c1_95 = arith.constant 1 : index
    %c11_96 = arith.constant 11 : index
    %c3_97 = arith.constant 3 : index
    %118 = vector.load %arg6[%c1_95, %c11_96, %c3_97] : memref<2x22x22xf32, #tpu.memory_space<vmem>>, vector<1x1x16xf32>
    %119 = vector.shape_cast %118 : vector<1x1x16xf32> to vector<1x16xf32>
    %120 = vector.shape_cast %117 : vector<1x16xf32> to vector<1x1x16xf32>
    tpu.vector_store %arg6[%c1_95, %c11_96, %c3_97], %120 {strides = array<i32>} : memref<2x22x22xf32, #tpu.memory_space<vmem>>, vector<1x1x16xf32>,
    %c0_98 = arith.constant 0 : index
    %c144 = arith.constant 144 : index
    %121 = vector.load %arg7[%c0_98, %c144] : memref<2x256xf32, #tpu.memory_space<vmem>>, vector<1x16xf32>
    %c0_99 = arith.constant 0 : index
    %c12 = arith.constant 12 : index
    %c3_100 = arith.constant 3 : index
    %122 = vector.load %arg6[%c0_99, %c12, %c3_100] : memref<2x22x22xf32, #tpu.memory_space<vmem>>, vector<1x1x16xf32>
    %123 = vector.shape_cast %122 : vector<1x1x16xf32> to vector<1x16xf32>
    %124 = vector.shape_cast %121 : vector<1x16xf32> to vector<1x1x16xf32>
    tpu.vector_store %arg6[%c0_99, %c12, %c3_100], %124 {strides = array<i32>} : memref<2x22x22xf32, #tpu.memory_space<vmem>>, vector<1x1x16xf32>,
    %c1_101 = arith.constant 1 : index
    %c144_102 = arith.constant 144 : index
    %125 = vector.load %arg7[%c1_101, %c144_102] : memref<2x256xf32, #tpu.memory_space<vmem>>, vector<1x16xf32>
    %c1_103 = arith.constant 1 : index
    %c12_104 = arith.constant 12 : index
    %c3_105 = arith.constant 3 : index
    %126 = vector.load %arg6[%c1_103, %c12_104, %c3_105] : memref<2x22x22xf32, #tpu.memory_space<vmem>>, vector<1x1x16xf32>
    %127 = vector.shape_cast %126 : vector<1x1x16xf32> to vector<1x16xf32>
    %128 = vector.shape_cast %125 : vector<1x16xf32> to vector<1x1x16xf32>
    tpu.vector_store %arg6[%c1_103, %c12_104, %c3_105], %128 {strides = array<i32>} : memref<2x22x22xf32, #tpu.memory_space<vmem>>, vector<1x1x16xf32>,
    %c0_106 = arith.constant 0 : index
    %c160 = arith.constant 160 : index
    %129 = vector.load %arg7[%c0_106, %c160] : memref<2x256xf32, #tpu.memory_space<vmem>>, vector<1x16xf32>
    %c0_107 = arith.constant 0 : index
    %c13 = arith.constant 13 : index
    %c3_108 = arith.constant 3 : index
    %130 = vector.load %arg6[%c0_107, %c13, %c3_108] : memref<2x22x22xf32, #tpu.memory_space<vmem>>, vector<1x1x16xf32>
    %131 = vector.shape_cast %130 : vector<1x1x16xf32> to vector<1x16xf32>
    %132 = vector.shape_cast %129 : vector<1x16xf32> to vector<1x1x16xf32>
    tpu.vector_store %arg6[%c0_107, %c13, %c3_108], %132 {strides = array<i32>} : memref<2x22x22xf32, #tpu.memory_space<vmem>>, vector<1x1x16xf32>,
    %c1_109 = arith.constant 1 : index
    %c160_110 = arith.constant 160 : index
    %133 = vector.load %arg7[%c1_109, %c160_110] : memref<2x256xf32, #tpu.memory_space<vmem>>, vector<1x16xf32>
    %c1_111 = arith.constant 1 : index
    %c13_112 = arith.constant 13 : index
    %c3_113 = arith.constant 3 : index
    %134 = vector.load %arg6[%c1_111, %c13_112, %c3_113] : memref<2x22x22xf32, #tpu.memory_space<vmem>>, vector<1x1x16xf32>
    %135 = vector.shape_cast %134 : vector<1x1x16xf32> to vector<1x16xf32>
    %136 = vector.shape_cast %133 : vector<1x16xf32> to vector<1x1x16xf32>
    tpu.vector_store %arg6[%c1_111, %c13_112, %c3_113], %136 {strides = array<i32>} : memref<2x22x22xf32, #tpu.memory_space<vmem>>, vector<1x1x16xf32>,
    %c0_114 = arith.constant 0 : index
    %c176 = arith.constant 176 : index
    %137 = vector.load %arg7[%c0_114, %c176] : memref<2x256xf32, #tpu.memory_space<vmem>>, vector<1x16xf32>
    %c0_115 = arith.constant 0 : index
    %c14 = arith.constant 14 : index
    %c3_116 = arith.constant 3 : index
    %138 = vector.load %arg6[%c0_115, %c14, %c3_116] : memref<2x22x22xf32, #tpu.memory_space<vmem>>, vector<1x1x16xf32>
    %139 = vector.shape_cast %138 : vector<1x1x16xf32> to vector<1x16xf32>
    %140 = vector.shape_cast %137 : vector<1x16xf32> to vector<1x1x16xf32>
    tpu.vector_store %arg6[%c0_115, %c14, %c3_116], %140 {strides = array<i32>} : memref<2x22x22xf32, #tpu.memory_space<vmem>>, vector<1x1x16xf32>,
    %c1_117 = arith.constant 1 : index
    %c176_118 = arith.constant 176 : index
    %141 = vector.load %arg7[%c1_117, %c176_118] : memref<2x256xf32, #tpu.memory_space<vmem>>, vector<1x16xf32>
    %c1_119 = arith.constant 1 : index
    %c14_120 = arith.constant 14 : index
    %c3_121 = arith.constant 3 : index
    %142 = vector.load %arg6[%c1_119, %c14_120, %c3_121] : memref<2x22x22xf32, #tpu.memory_space<vmem>>, vector<1x1x16xf32>
    %143 = vector.shape_cast %142 : vector<1x1x16xf32> to vector<1x16xf32>
    %144 = vector.shape_cast %141 : vector<1x16xf32> to vector<1x1x16xf32>
    tpu.vector_store %arg6[%c1_119, %c14_120, %c3_121], %144 {strides = array<i32>} : memref<2x22x22xf32, #tpu.memory_space<vmem>>, vector<1x1x16xf32>,
    %c0_122 = arith.constant 0 : index
    %c192 = arith.constant 192 : index
    %145 = vector.load %arg7[%c0_122, %c192] : memref<2x256xf32, #tpu.memory_space<vmem>>, vector<1x16xf32>
    %c0_123 = arith.constant 0 : index
    %c15 = arith.constant 15 : index
    %c3_124 = arith.constant 3 : index
    %146 = vector.load %arg6[%c0_123, %c15, %c3_124] : memref<2x22x22xf32, #tpu.memory_space<vmem>>, vector<1x1x16xf32>
    %147 = vector.shape_cast %146 : vector<1x1x16xf32> to vector<1x16xf32>
    %148 = vector.shape_cast %145 : vector<1x16xf32> to vector<1x1x16xf32>
    tpu.vector_store %arg6[%c0_123, %c15, %c3_124], %148 {strides = array<i32>} : memref<2x22x22xf32, #tpu.memory_space<vmem>>, vector<1x1x16xf32>,
    %c1_125 = arith.constant 1 : index
    %c192_126 = arith.constant 192 : index
    %149 = vector.load %arg7[%c1_125, %c192_126] : memref<2x256xf32, #tpu.memory_space<vmem>>, vector<1x16xf32>
    %c1_127 = arith.constant 1 : index
    %c15_128 = arith.constant 15 : index
    %c3_129 = arith.constant 3 : index
    %150 = vector.load %arg6[%c1_127, %c15_128, %c3_129] : memref<2x22x22xf32, #tpu.memory_space<vmem>>, vector<1x1x16xf32>
    %151 = vector.shape_cast %150 : vector<1x1x16xf32> to vector<1x16xf32>
    %152 = vector.shape_cast %149 : vector<1x16xf32> to vector<1x1x16xf32>
    tpu.vector_store %arg6[%c1_127, %c15_128, %c3_129], %152 {strides = array<i32>} : memref<2x22x22xf32, #tpu.memory_space<vmem>>, vector<1x1x16xf32>,
    %c0_130 = arith.constant 0 : index
    %c208 = arith.constant 208 : index
    %153 = vector.load %arg7[%c0_130, %c208] : memref<2x256xf32, #tpu.memory_space<vmem>>, vector<1x16xf32>
    %c0_131 = arith.constant 0 : index
    %c16_132 = arith.constant 16 : index
    %c3_133 = arith.constant 3 : index
    %154 = vector.load %arg6[%c0_131, %c16_132, %c3_133] : memref<2x22x22xf32, #tpu.memory_space<vmem>>, vector<1x1x16xf32>
    %155 = vector.shape_cast %154 : vector<1x1x16xf32> to vector<1x16xf32>
    %156 = vector.shape_cast %153 : vector<1x16xf32> to vector<1x1x16xf32>
    tpu.vector_store %arg6[%c0_131, %c16_132, %c3_133], %156 {strides = array<i32>} : memref<2x22x22xf32, #tpu.memory_space<vmem>>, vector<1x1x16xf32>,
    %c1_134 = arith.constant 1 : index
    %c208_135 = arith.constant 208 : index
    %157 = vector.load %arg7[%c1_134, %c208_135] : memref<2x256xf32, #tpu.memory_space<vmem>>, vector<1x16xf32>
    %c1_136 = arith.constant 1 : index
    %c16_137 = arith.constant 16 : index
    %c3_138 = arith.constant 3 : index
    %158 = vector.load %arg6[%c1_136, %c16_137, %c3_138] : memref<2x22x22xf32, #tpu.memory_space<vmem>>, vector<1x1x16xf32>
    %159 = vector.shape_cast %158 : vector<1x1x16xf32> to vector<1x16xf32>
    %160 = vector.shape_cast %157 : vector<1x16xf32> to vector<1x1x16xf32>
    tpu.vector_store %arg6[%c1_136, %c16_137, %c3_138], %160 {strides = array<i32>} : memref<2x22x22xf32, #tpu.memory_space<vmem>>, vector<1x1x16xf32>,
    %c0_139 = arith.constant 0 : index
    %c224 = arith.constant 224 : index
    %161 = vector.load %arg7[%c0_139, %c224] : memref<2x256xf32, #tpu.memory_space<vmem>>, vector<1x16xf32>
    %c0_140 = arith.constant 0 : index
    %c17 = arith.constant 17 : index
    %c3_141 = arith.constant 3 : index
    %162 = vector.load %arg6[%c0_140, %c17, %c3_141] : memref<2x22x22xf32, #tpu.memory_space<vmem>>, vector<1x1x16xf32>
    %163 = vector.shape_cast %162 : vector<1x1x16xf32> to vector<1x16xf32>
    %164 = vector.shape_cast %161 : vector<1x16xf32> to vector<1x1x16xf32>
    tpu.vector_store %arg6[%c0_140, %c17, %c3_141], %164 {strides = array<i32>} : memref<2x22x22xf32, #tpu.memory_space<vmem>>, vector<1x1x16xf32>,
    %c1_142 = arith.constant 1 : index
    %c224_143 = arith.constant 224 : index
    %165 = vector.load %arg7[%c1_142, %c224_143] : memref<2x256xf32, #tpu.memory_space<vmem>>, vector<1x16xf32>
    %c1_144 = arith.constant 1 : index
    %c17_145 = arith.constant 17 : index
    %c3_146 = arith.constant 3 : index
    %166 = vector.load %arg6[%c1_144, %c17_145, %c3_146] : memref<2x22x22xf32, #tpu.memory_space<vmem>>, vector<1x1x16xf32>
    %167 = vector.shape_cast %166 : vector<1x1x16xf32> to vector<1x16xf32>
    %168 = vector.shape_cast %165 : vector<1x16xf32> to vector<1x1x16xf32>
    tpu.vector_store %arg6[%c1_144, %c17_145, %c3_146], %168 {strides = array<i32>} : memref<2x22x22xf32, #tpu.memory_space<vmem>>, vector<1x1x16xf32>,
    %c0_147 = arith.constant 0 : index
    %c240 = arith.constant 240 : index
    %169 = vector.load %arg7[%c0_147, %c240] : memref<2x256xf32, #tpu.memory_space<vmem>>, vector<1x16xf32>
    %c0_148 = arith.constant 0 : index
    %c18 = arith.constant 18 : index
    %c3_149 = arith.constant 3 : index
    %170 = vector.load %arg6[%c0_148, %c18, %c3_149] : memref<2x22x22xf32, #tpu.memory_space<vmem>>, vector<1x1x16xf32>
    %171 = vector.shape_cast %170 : vector<1x1x16xf32> to vector<1x16xf32>
    %172 = vector.shape_cast %169 : vector<1x16xf32> to vector<1x1x16xf32>
    tpu.vector_store %arg6[%c0_148, %c18, %c3_149], %172 {strides = array<i32>} : memref<2x22x22xf32, #tpu.memory_space<vmem>>, vector<1x1x16xf32>,
    %c1_150 = arith.constant 1 : index
    %c240_151 = arith.constant 240 : index
    %173 = vector.load %arg7[%c1_150, %c240_151] : memref<2x256xf32, #tpu.memory_space<vmem>>, vector<1x16xf32>
    %c1_152 = arith.constant 1 : index
    %c18_153 = arith.constant 18 : index
    %c3_154 = arith.constant 3 : index
    %174 = vector.load %arg6[%c1_152, %c18_153, %c3_154] : memref<2x22x22xf32, #tpu.memory_space<vmem>>, vector<1x1x16xf32>
    %175 = vector.shape_cast %174 : vector<1x1x16xf32> to vector<1x16xf32>
    %176 = vector.shape_cast %173 : vector<1x16xf32> to vector<1x1x16xf32>
    tpu.vector_store %arg6[%c1_152, %c18_153, %c3_154], %176 {strides = array<i32>} : memref<2x22x22xf32, #tpu.memory_space<vmem>>, vector<1x1x16xf32>,
    %cst_155 = arith.constant 0.000000e+00 : f32
    %177 = vector.broadcast %cst_155 : f32 to vector<16x16xf32>
    %cst_156 = arith.constant 0.000000e+00 : f32
    %178 = vector.broadcast %cst_156 : f32 to vector<16x16xf32>
    %cst_157 = arith.constant 0.000000e+00 : f32
    %179 = vector.broadcast %cst_157 : f32 to vector<16x16xf32>
    %cst_158 = arith.constant 0.000000e+00 : f32
    %180 = vector.broadcast %cst_158 : f32 to vector<16x16xf32>
    %c0_159 = arith.constant 0 : index
    %c0_160 = arith.constant 0 : index
    %181 = memref.load %arg4[%c0_159, %c0_160] : memref<2x49xf32, #tpu.memory_space<smem>>
    %c1_161 = arith.constant 1 : index
    %c0_162 = arith.constant 0 : index
    %182 = memref.load %arg4[%c1_161, %c0_162] : memref<2x49xf32, #tpu.memory_space<smem>>
    %c0_163 = arith.constant 0 : index
    %c0_164 = arith.constant 0 : index
    %c0_165 = arith.constant 0 : index
    %183 = vector.load %arg6[%c0_163, %c0_164, %c0_165] : memref<2x22x22xf32, #tpu.memory_space<vmem>>, vector<1x16x16xf32>
    %184 = vector.shape_cast %183 : vector<1x16x16xf32> to vector<16x16xf32>
    %c1_166 = arith.constant 1 : index
    %c0_167 = arith.constant 0 : index
    %c0_168 = arith.constant 0 : index
    %185 = vector.load %arg6[%c1_166, %c0_167, %c0_168] : memref<2x22x22xf32, #tpu.memory_space<vmem>>, vector<1x16x16xf32>
    %186 = vector.shape_cast %185 : vector<1x16x16xf32> to vector<16x16xf32>
    %187 = vector.broadcast %181 : f32 to vector<16x16xf32>
    %188 = arith.mulf %187, %184 : vector<16x16xf32>
    %189 = vector.broadcast %182 : f32 to vector<16x16xf32>
    %190 = arith.mulf %189, %186 : vector<16x16xf32>
    %191 = arith.addf %188, %190 : vector<16x16xf32>
    %192 = arith.addf %177, %191 : vector<16x16xf32>
    %c0_169 = arith.constant 0 : index
    %c1_170 = arith.constant 1 : index
    %193 = memref.load %arg4[%c0_169, %c1_170] : memref<2x49xf32, #tpu.memory_space<smem>>
    %c1_171 = arith.constant 1 : index
    %c1_172 = arith.constant 1 : index
    %194 = memref.load %arg4[%c1_171, %c1_172] : memref<2x49xf32, #tpu.memory_space<smem>>
    %c0_173 = arith.constant 0 : index
    %c0_174 = arith.constant 0 : index
    %c1_175 = arith.constant 1 : index
    %195 = vector.load %arg6[%c0_173, %c0_174, %c1_175] : memref<2x22x22xf32, #tpu.memory_space<vmem>>, vector<1x16x16xf32>
    %196 = vector.shape_cast %195 : vector<1x16x16xf32> to vector<16x16xf32>
    %c1_176 = arith.constant 1 : index
    %c0_177 = arith.constant 0 : index
    %c1_178 = arith.constant 1 : index
    %197 = vector.load %arg6[%c1_176, %c0_177, %c1_178] : memref<2x22x22xf32, #tpu.memory_space<vmem>>, vector<1x16x16xf32>
    %198 = vector.shape_cast %197 : vector<1x16x16xf32> to vector<16x16xf32>
    %199 = vector.broadcast %193 : f32 to vector<16x16xf32>
    %200 = arith.mulf %199, %196 : vector<16x16xf32>
    %201 = vector.broadcast %194 : f32 to vector<16x16xf32>
    %202 = arith.mulf %201, %198 : vector<16x16xf32>
    %203 = arith.addf %200, %202 : vector<16x16xf32>
    %204 = arith.addf %178, %203 : vector<16x16xf32>
    %c0_179 = arith.constant 0 : index
    %c2 = arith.constant 2 : index
    %205 = memref.load %arg4[%c0_179, %c2] : memref<2x49xf32, #tpu.memory_space<smem>>
    %c1_180 = arith.constant 1 : index
    %c2_181 = arith.constant 2 : index
    %206 = memref.load %arg4[%c1_180, %c2_181] : memref<2x49xf32, #tpu.memory_space<smem>>
    %c0_182 = arith.constant 0 : index
    %c0_183 = arith.constant 0 : index
    %c2_184 = arith.constant 2 : index
    %207 = vector.load %arg6[%c0_182, %c0_183, %c2_184] : memref<2x22x22xf32, #tpu.memory_space<vmem>>, vector<1x16x16xf32>
    %208 = vector.shape_cast %207 : vector<1x16x16xf32> to vector<16x16xf32>
    %c1_185 = arith.constant 1 : index
    %c0_186 = arith.constant 0 : index
    %c2_187 = arith.constant 2 : index
    %209 = vector.load %arg6[%c1_185, %c0_186, %c2_187] : memref<2x22x22xf32, #tpu.memory_space<vmem>>, vector<1x16x16xf32>
    %210 = vector.shape_cast %209 : vector<1x16x16xf32> to vector<16x16xf32>
    %211 = vector.broadcast %205 : f32 to vector<16x16xf32>
    %212 = arith.mulf %211, %208 : vector<16x16xf32>
    %213 = vector.broadcast %206 : f32 to vector<16x16xf32>
    %214 = arith.mulf %213, %210 : vector<16x16xf32>
    %215 = arith.addf %212, %214 : vector<16x16xf32>
    %216 = arith.addf %179, %215 : vector<16x16xf32>
    %c0_188 = arith.constant 0 : index
    %c3_189 = arith.constant 3 : index
    %217 = memref.load %arg4[%c0_188, %c3_189] : memref<2x49xf32, #tpu.memory_space<smem>>
    %c1_190 = arith.constant 1 : index
    %c3_191 = arith.constant 3 : index
    %218 = memref.load %arg4[%c1_190, %c3_191] : memref<2x49xf32, #tpu.memory_space<smem>>
    %c0_192 = arith.constant 0 : index
    %c0_193 = arith.constant 0 : index
    %c3_194 = arith.constant 3 : index
    %219 = vector.load %arg6[%c0_192, %c0_193, %c3_194] : memref<2x22x22xf32, #tpu.memory_space<vmem>>, vector<1x16x16xf32>
    %220 = vector.shape_cast %219 : vector<1x16x16xf32> to vector<16x16xf32>
    %c1_195 = arith.constant 1 : index
    %c0_196 = arith.constant 0 : index
    %c3_197 = arith.constant 3 : index
    %221 = vector.load %arg6[%c1_195, %c0_196, %c3_197] : memref<2x22x22xf32, #tpu.memory_space<vmem>>, vector<1x16x16xf32>
    %222 = vector.shape_cast %221 : vector<1x16x16xf32> to vector<16x16xf32>
    %223 = vector.broadcast %217 : f32 to vector<16x16xf32>
    %224 = arith.mulf %223, %220 : vector<16x16xf32>
    %225 = vector.broadcast %218 : f32 to vector<16x16xf32>
    %226 = arith.mulf %225, %222 : vector<16x16xf32>
    %227 = arith.addf %224, %226 : vector<16x16xf32>
    %228 = arith.addf %180, %227 : vector<16x16xf32>
    %c0_198 = arith.constant 0 : index
    %c4_199 = arith.constant 4 : index
    %229 = memref.load %arg4[%c0_198, %c4_199] : memref<2x49xf32, #tpu.memory_space<smem>>
    %c1_200 = arith.constant 1 : index
    %c4_201 = arith.constant 4 : index
    %230 = memref.load %arg4[%c1_200, %c4_201] : memref<2x49xf32, #tpu.memory_space<smem>>
    %c0_202 = arith.constant 0 : index
    %c0_203 = arith.constant 0 : index
    %c4_204 = arith.constant 4 : index
    %231 = vector.load %arg6[%c0_202, %c0_203, %c4_204] : memref<2x22x22xf32, #tpu.memory_space<vmem>>, vector<1x16x16xf32>
    %232 = vector.shape_cast %231 : vector<1x16x16xf32> to vector<16x16xf32>
    %c1_205 = arith.constant 1 : index
    %c0_206 = arith.constant 0 : index
    %c4_207 = arith.constant 4 : index
    %233 = vector.load %arg6[%c1_205, %c0_206, %c4_207] : memref<2x22x22xf32, #tpu.memory_space<vmem>>, vector<1x16x16xf32>
    %234 = vector.shape_cast %233 : vector<1x16x16xf32> to vector<16x16xf32>
    %235 = vector.broadcast %229 : f32 to vector<16x16xf32>
    %236 = arith.mulf %235, %232 : vector<16x16xf32>
    %237 = vector.broadcast %230 : f32 to vector<16x16xf32>
    %238 = arith.mulf %237, %234 : vector<16x16xf32>
    %239 = arith.addf %236, %238 : vector<16x16xf32>
    %240 = arith.addf %192, %239 : vector<16x16xf32>
    %c0_208 = arith.constant 0 : index
    %c5_209 = arith.constant 5 : index
    %241 = memref.load %arg4[%c0_208, %c5_209] : memref<2x49xf32, #tpu.memory_space<smem>>
    %c1_210 = arith.constant 1 : index
    %c5_211 = arith.constant 5 : index
    %242 = memref.load %arg4[%c1_210, %c5_211] : memref<2x49xf32, #tpu.memory_space<smem>>
    %c0_212 = arith.constant 0 : index
    %c0_213 = arith.constant 0 : index
    %c5_214 = arith.constant 5 : index
    %243 = vector.load %arg6[%c0_212, %c0_213, %c5_214] : memref<2x22x22xf32, #tpu.memory_space<vmem>>, vector<1x16x16xf32>
    %244 = vector.shape_cast %243 : vector<1x16x16xf32> to vector<16x16xf32>
    %c1_215 = arith.constant 1 : index
    %c0_216 = arith.constant 0 : index
    %c5_217 = arith.constant 5 : index
    %245 = vector.load %arg6[%c1_215, %c0_216, %c5_217] : memref<2x22x22xf32, #tpu.memory_space<vmem>>, vector<1x16x16xf32>
    %246 = vector.shape_cast %245 : vector<1x16x16xf32> to vector<16x16xf32>
    %247 = vector.broadcast %241 : f32 to vector<16x16xf32>
    %248 = arith.mulf %247, %244 : vector<16x16xf32>
    %249 = vector.broadcast %242 : f32 to vector<16x16xf32>
    %250 = arith.mulf %249, %246 : vector<16x16xf32>
    %251 = arith.addf %248, %250 : vector<16x16xf32>
    %252 = arith.addf %204, %251 : vector<16x16xf32>
    %c0_218 = arith.constant 0 : index
    %c6_219 = arith.constant 6 : index
    %253 = memref.load %arg4[%c0_218, %c6_219] : memref<2x49xf32, #tpu.memory_space<smem>>
    %c1_220 = arith.constant 1 : index
    %c6_221 = arith.constant 6 : index
    %254 = memref.load %arg4[%c1_220, %c6_221] : memref<2x49xf32, #tpu.memory_space<smem>>
    %c0_222 = arith.constant 0 : index
    %c0_223 = arith.constant 0 : index
    %c6_224 = arith.constant 6 : index
    %255 = vector.load %arg6[%c0_222, %c0_223, %c6_224] : memref<2x22x22xf32, #tpu.memory_space<vmem>>, vector<1x16x16xf32>
    %256 = vector.shape_cast %255 : vector<1x16x16xf32> to vector<16x16xf32>
    %c1_225 = arith.constant 1 : index
    %c0_226 = arith.constant 0 : index
    %c6_227 = arith.constant 6 : index
    %257 = vector.load %arg6[%c1_225, %c0_226, %c6_227] : memref<2x22x22xf32, #tpu.memory_space<vmem>>, vector<1x16x16xf32>
    %258 = vector.shape_cast %257 : vector<1x16x16xf32> to vector<16x16xf32>
    %259 = vector.broadcast %253 : f32 to vector<16x16xf32>
    %260 = arith.mulf %259, %256 : vector<16x16xf32>
    %261 = vector.broadcast %254 : f32 to vector<16x16xf32>
    %262 = arith.mulf %261, %258 : vector<16x16xf32>
    %263 = arith.addf %260, %262 : vector<16x16xf32>
    %264 = arith.addf %216, %263 : vector<16x16xf32>
    %c0_228 = arith.constant 0 : index
    %c7_229 = arith.constant 7 : index
    %265 = memref.load %arg4[%c0_228, %c7_229] : memref<2x49xf32, #tpu.memory_space<smem>>
    %c1_230 = arith.constant 1 : index
    %c7_231 = arith.constant 7 : index
    %266 = memref.load %arg4[%c1_230, %c7_231] : memref<2x49xf32, #tpu.memory_space<smem>>
    %c0_232 = arith.constant 0 : index
    %c1_233 = arith.constant 1 : index
    %c0_234 = arith.constant 0 : index
    %267 = vector.load %arg6[%c0_232, %c1_233, %c0_234] : memref<2x22x22xf32, #tpu.memory_space<vmem>>, vector<1x16x16xf32>
    %268 = vector.shape_cast %267 : vector<1x16x16xf32> to vector<16x16xf32>
    %c1_235 = arith.constant 1 : index
    %c1_236 = arith.constant 1 : index
    %c0_237 = arith.constant 0 : index
    %269 = vector.load %arg6[%c1_235, %c1_236, %c0_237] : memref<2x22x22xf32, #tpu.memory_space<vmem>>, vector<1x16x16xf32>
    %270 = vector.shape_cast %269 : vector<1x16x16xf32> to vector<16x16xf32>
    %271 = vector.broadcast %265 : f32 to vector<16x16xf32>
    %272 = arith.mulf %271, %268 : vector<16x16xf32>
    %273 = vector.broadcast %266 : f32 to vector<16x16xf32>
    %274 = arith.mulf %273, %270 : vector<16x16xf32>
    %275 = arith.addf %272, %274 : vector<16x16xf32>
    %276 = arith.addf %228, %275 : vector<16x16xf32>
    %c0_238 = arith.constant 0 : index
    %c8_239 = arith.constant 8 : index
    %277 = memref.load %arg4[%c0_238, %c8_239] : memref<2x49xf32, #tpu.memory_space<smem>>
    %c1_240 = arith.constant 1 : index
    %c8_241 = arith.constant 8 : index
    %278 = memref.load %arg4[%c1_240, %c8_241] : memref<2x49xf32, #tpu.memory_space<smem>>
    %c0_242 = arith.constant 0 : index
    %c1_243 = arith.constant 1 : index
    %c1_244 = arith.constant 1 : index
    %279 = vector.load %arg6[%c0_242, %c1_243, %c1_244] : memref<2x22x22xf32, #tpu.memory_space<vmem>>, vector<1x16x16xf32>
    %280 = vector.shape_cast %279 : vector<1x16x16xf32> to vector<16x16xf32>
    %c1_245 = arith.constant 1 : index
    %c1_246 = arith.constant 1 : index
    %c1_247 = arith.constant 1 : index
    %281 = vector.load %arg6[%c1_245, %c1_246, %c1_247] : memref<2x22x22xf32, #tpu.memory_space<vmem>>, vector<1x16x16xf32>
    %282 = vector.shape_cast %281 : vector<1x16x16xf32> to vector<16x16xf32>
    %283 = vector.broadcast %277 : f32 to vector<16x16xf32>
    %284 = arith.mulf %283, %280 : vector<16x16xf32>
    %285 = vector.broadcast %278 : f32 to vector<16x16xf32>
    %286 = arith.mulf %285, %282 : vector<16x16xf32>
    %287 = arith.addf %284, %286 : vector<16x16xf32>
    %288 = arith.addf %240, %287 : vector<16x16xf32>
    %c0_248 = arith.constant 0 : index
    %c9_249 = arith.constant 9 : index
    %289 = memref.load %arg4[%c0_248, %c9_249] : memref<2x49xf32, #tpu.memory_space<smem>>
    %c1_250 = arith.constant 1 : index
    %c9_251 = arith.constant 9 : index
    %290 = memref.load %arg4[%c1_250, %c9_251] : memref<2x49xf32, #tpu.memory_space<smem>>
    %c0_252 = arith.constant 0 : index
    %c1_253 = arith.constant 1 : index
    %c2_254 = arith.constant 2 : index
    %291 = vector.load %arg6[%c0_252, %c1_253, %c2_254] : memref<2x22x22xf32, #tpu.memory_space<vmem>>, vector<1x16x16xf32>
    %292 = vector.shape_cast %291 : vector<1x16x16xf32> to vector<16x16xf32>
    %c1_255 = arith.constant 1 : index
    %c1_256 = arith.constant 1 : index
    %c2_257 = arith.constant 2 : index
    %293 = vector.load %arg6[%c1_255, %c1_256, %c2_257] : memref<2x22x22xf32, #tpu.memory_space<vmem>>, vector<1x16x16xf32>
    %294 = vector.shape_cast %293 : vector<1x16x16xf32> to vector<16x16xf32>
    %295 = vector.broadcast %289 : f32 to vector<16x16xf32>
    %296 = arith.mulf %295, %292 : vector<16x16xf32>
    %297 = vector.broadcast %290 : f32 to vector<16x16xf32>
    %298 = arith.mulf %297, %294 : vector<16x16xf32>
    %299 = arith.addf %296, %298 : vector<16x16xf32>
    %300 = arith.addf %252, %299 : vector<16x16xf32>
    %c0_258 = arith.constant 0 : index
    %c10_259 = arith.constant 10 : index
    %301 = memref.load %arg4[%c0_258, %c10_259] : memref<2x49xf32, #tpu.memory_space<smem>>
    %c1_260 = arith.constant 1 : index
    %c10_261 = arith.constant 10 : index
    %302 = memref.load %arg4[%c1_260, %c10_261] : memref<2x49xf32, #tpu.memory_space<smem>>
    %c0_262 = arith.constant 0 : index
    %c1_263 = arith.constant 1 : index
    %c3_264 = arith.constant 3 : index
    %303 = vector.load %arg6[%c0_262, %c1_263, %c3_264] : memref<2x22x22xf32, #tpu.memory_space<vmem>>, vector<1x16x16xf32>
    %304 = vector.shape_cast %303 : vector<1x16x16xf32> to vector<16x16xf32>
    %c1_265 = arith.constant 1 : index
    %c1_266 = arith.constant 1 : index
    %c3_267 = arith.constant 3 : index
    %305 = vector.load %arg6[%c1_265, %c1_266, %c3_267] : memref<2x22x22xf32, #tpu.memory_space<vmem>>, vector<1x16x16xf32>
    %306 = vector.shape_cast %305 : vector<1x16x16xf32> to vector<16x16xf32>
    %307 = vector.broadcast %301 : f32 to vector<16x16xf32>
    %308 = arith.mulf %307, %304 : vector<16x16xf32>
    %309 = vector.broadcast %302 : f32 to vector<16x16xf32>
    %310 = arith.mulf %309, %306 : vector<16x16xf32>
    %311 = arith.addf %308, %310 : vector<16x16xf32>
    %312 = arith.addf %264, %311 : vector<16x16xf32>
    %c0_268 = arith.constant 0 : index
    %c11_269 = arith.constant 11 : index
    %313 = memref.load %arg4[%c0_268, %c11_269] : memref<2x49xf32, #tpu.memory_space<smem>>
    %c1_270 = arith.constant 1 : index
    %c11_271 = arith.constant 11 : index
    %314 = memref.load %arg4[%c1_270, %c11_271] : memref<2x49xf32, #tpu.memory_space<smem>>
    %c0_272 = arith.constant 0 : index
    %c1_273 = arith.constant 1 : index
    %c4_274 = arith.constant 4 : index
    %315 = vector.load %arg6[%c0_272, %c1_273, %c4_274] : memref<2x22x22xf32, #tpu.memory_space<vmem>>, vector<1x16x16xf32>
    %316 = vector.shape_cast %315 : vector<1x16x16xf32> to vector<16x16xf32>
    %c1_275 = arith.constant 1 : index
    %c1_276 = arith.constant 1 : index
    %c4_277 = arith.constant 4 : index
    %317 = vector.load %arg6[%c1_275, %c1_276, %c4_277] : memref<2x22x22xf32, #tpu.memory_space<vmem>>, vector<1x16x16xf32>
    %318 = vector.shape_cast %317 : vector<1x16x16xf32> to vector<16x16xf32>
    %319 = vector.broadcast %313 : f32 to vector<16x16xf32>
    %320 = arith.mulf %319, %316 : vector<16x16xf32>
    %321 = vector.broadcast %314 : f32 to vector<16x16xf32>
    %322 = arith.mulf %321, %318 : vector<16x16xf32>
    %323 = arith.addf %320, %322 : vector<16x16xf32>
    %324 = arith.addf %276, %323 : vector<16x16xf32>
    %c0_278 = arith.constant 0 : index
    %c12_279 = arith.constant 12 : index
    %325 = memref.load %arg4[%c0_278, %c12_279] : memref<2x49xf32, #tpu.memory_space<smem>>
    %c1_280 = arith.constant 1 : index
    %c12_281 = arith.constant 12 : index
    %326 = memref.load %arg4[%c1_280, %c12_281] : memref<2x49xf32, #tpu.memory_space<smem>>
    %c0_282 = arith.constant 0 : index
    %c1_283 = arith.constant 1 : index
    %c5_284 = arith.constant 5 : index
    %327 = vector.load %arg6[%c0_282, %c1_283, %c5_284] : memref<2x22x22xf32, #tpu.memory_space<vmem>>, vector<1x16x16xf32>
    %328 = vector.shape_cast %327 : vector<1x16x16xf32> to vector<16x16xf32>
    %c1_285 = arith.constant 1 : index
    %c1_286 = arith.constant 1 : index
    %c5_287 = arith.constant 5 : index
    %329 = vector.load %arg6[%c1_285, %c1_286, %c5_287] : memref<2x22x22xf32, #tpu.memory_space<vmem>>, vector<1x16x16xf32>
    %330 = vector.shape_cast %329 : vector<1x16x16xf32> to vector<16x16xf32>
    %331 = vector.broadcast %325 : f32 to vector<16x16xf32>
    %332 = arith.mulf %331, %328 : vector<16x16xf32>
    %333 = vector.broadcast %326 : f32 to vector<16x16xf32>
    %334 = arith.mulf %333, %330 : vector<16x16xf32>
    %335 = arith.addf %332, %334 : vector<16x16xf32>
    %336 = arith.addf %288, %335 : vector<16x16xf32>
    %c0_288 = arith.constant 0 : index
    %c13_289 = arith.constant 13 : index
    %337 = memref.load %arg4[%c0_288, %c13_289] : memref<2x49xf32, #tpu.memory_space<smem>>
    %c1_290 = arith.constant 1 : index
    %c13_291 = arith.constant 13 : index
    %338 = memref.load %arg4[%c1_290, %c13_291] : memref<2x49xf32, #tpu.memory_space<smem>>
    %c0_292 = arith.constant 0 : index
    %c1_293 = arith.constant 1 : index
    %c6_294 = arith.constant 6 : index
    %339 = vector.load %arg6[%c0_292, %c1_293, %c6_294] : memref<2x22x22xf32, #tpu.memory_space<vmem>>, vector<1x16x16xf32>
    %340 = vector.shape_cast %339 : vector<1x16x16xf32> to vector<16x16xf32>
    %c1_295 = arith.constant 1 : index
    %c1_296 = arith.constant 1 : index
    %c6_297 = arith.constant 6 : index
    %341 = vector.load %arg6[%c1_295, %c1_296, %c6_297] : memref<2x22x22xf32, #tpu.memory_space<vmem>>, vector<1x16x16xf32>
    %342 = vector.shape_cast %341 : vector<1x16x16xf32> to vector<16x16xf32>
    %343 = vector.broadcast %337 : f32 to vector<16x16xf32>
    %344 = arith.mulf %343, %340 : vector<16x16xf32>
    %345 = vector.broadcast %338 : f32 to vector<16x16xf32>
    %346 = arith.mulf %345, %342 : vector<16x16xf32>
    %347 = arith.addf %344, %346 : vector<16x16xf32>
    %348 = arith.addf %300, %347 : vector<16x16xf32>
    %c0_298 = arith.constant 0 : index
    %c14_299 = arith.constant 14 : index
    %349 = memref.load %arg4[%c0_298, %c14_299] : memref<2x49xf32, #tpu.memory_space<smem>>
    %c1_300 = arith.constant 1 : index
    %c14_301 = arith.constant 14 : index
    %350 = memref.load %arg4[%c1_300, %c14_301] : memref<2x49xf32, #tpu.memory_space<smem>>
    %c0_302 = arith.constant 0 : index
    %c2_303 = arith.constant 2 : index
    %c0_304 = arith.constant 0 : index
    %351 = vector.load %arg6[%c0_302, %c2_303, %c0_304] : memref<2x22x22xf32, #tpu.memory_space<vmem>>, vector<1x16x16xf32>
    %352 = vector.shape_cast %351 : vector<1x16x16xf32> to vector<16x16xf32>
    %c1_305 = arith.constant 1 : index
    %c2_306 = arith.constant 2 : index
    %c0_307 = arith.constant 0 : index
    %353 = vector.load %arg6[%c1_305, %c2_306, %c0_307] : memref<2x22x22xf32, #tpu.memory_space<vmem>>, vector<1x16x16xf32>
    %354 = vector.shape_cast %353 : vector<1x16x16xf32> to vector<16x16xf32>
    %355 = vector.broadcast %349 : f32 to vector<16x16xf32>
    %356 = arith.mulf %355, %352 : vector<16x16xf32>
    %357 = vector.broadcast %350 : f32 to vector<16x16xf32>
    %358 = arith.mulf %357, %354 : vector<16x16xf32>
    %359 = arith.addf %356, %358 : vector<16x16xf32>
    %360 = arith.addf %312, %359 : vector<16x16xf32>
    %c0_308 = arith.constant 0 : index
    %c15_309 = arith.constant 15 : index
    %361 = memref.load %arg4[%c0_308, %c15_309] : memref<2x49xf32, #tpu.memory_space<smem>>
    %c1_310 = arith.constant 1 : index
    %c15_311 = arith.constant 15 : index
    %362 = memref.load %arg4[%c1_310, %c15_311] : memref<2x49xf32, #tpu.memory_space<smem>>
    %c0_312 = arith.constant 0 : index
    %c2_313 = arith.constant 2 : index
    %c1_314 = arith.constant 1 : index
    %363 = vector.load %arg6[%c0_312, %c2_313, %c1_314] : memref<2x22x22xf32, #tpu.memory_space<vmem>>, vector<1x16x16xf32>
    %364 = vector.shape_cast %363 : vector<1x16x16xf32> to vector<16x16xf32>
    %c1_315 = arith.constant 1 : index
    %c2_316 = arith.constant 2 : index
    %c1_317 = arith.constant 1 : index
    %365 = vector.load %arg6[%c1_315, %c2_316, %c1_317] : memref<2x22x22xf32, #tpu.memory_space<vmem>>, vector<1x16x16xf32>
    %366 = vector.shape_cast %365 : vector<1x16x16xf32> to vector<16x16xf32>
    %367 = vector.broadcast %361 : f32 to vector<16x16xf32>
    %368 = arith.mulf %367, %364 : vector<16x16xf32>
    %369 = vector.broadcast %362 : f32 to vector<16x16xf32>
    %370 = arith.mulf %369, %366 : vector<16x16xf32>
    %371 = arith.addf %368, %370 : vector<16x16xf32>
    %372 = arith.addf %324, %371 : vector<16x16xf32>
    %c0_318 = arith.constant 0 : index
    %c16_319 = arith.constant 16 : index
    %373 = memref.load %arg4[%c0_318, %c16_319] : memref<2x49xf32, #tpu.memory_space<smem>>
    %c1_320 = arith.constant 1 : index
    %c16_321 = arith.constant 16 : index
    %374 = memref.load %arg4[%c1_320, %c16_321] : memref<2x49xf32, #tpu.memory_space<smem>>
    %c0_322 = arith.constant 0 : index
    %c2_323 = arith.constant 2 : index
    %c2_324 = arith.constant 2 : index
    %375 = vector.load %arg6[%c0_322, %c2_323, %c2_324] : memref<2x22x22xf32, #tpu.memory_space<vmem>>, vector<1x16x16xf32>
    %376 = vector.shape_cast %375 : vector<1x16x16xf32> to vector<16x16xf32>
    %c1_325 = arith.constant 1 : index
    %c2_326 = arith.constant 2 : index
    %c2_327 = arith.constant 2 : index
    %377 = vector.load %arg6[%c1_325, %c2_326, %c2_327] : memref<2x22x22xf32, #tpu.memory_space<vmem>>, vector<1x16x16xf32>
    %378 = vector.shape_cast %377 : vector<1x16x16xf32> to vector<16x16xf32>
    %379 = vector.broadcast %373 : f32 to vector<16x16xf32>
    %380 = arith.mulf %379, %376 : vector<16x16xf32>
    %381 = vector.broadcast %374 : f32 to vector<16x16xf32>
    %382 = arith.mulf %381, %378 : vector<16x16xf32>
    %383 = arith.addf %380, %382 : vector<16x16xf32>
    %384 = arith.addf %336, %383 : vector<16x16xf32>
    %c0_328 = arith.constant 0 : index
    %c17_329 = arith.constant 17 : index
    %385 = memref.load %arg4[%c0_328, %c17_329] : memref<2x49xf32, #tpu.memory_space<smem>>
    %c1_330 = arith.constant 1 : index
    %c17_331 = arith.constant 17 : index
    %386 = memref.load %arg4[%c1_330, %c17_331] : memref<2x49xf32, #tpu.memory_space<smem>>
    %c0_332 = arith.constant 0 : index
    %c2_333 = arith.constant 2 : index
    %c3_334 = arith.constant 3 : index
    %387 = vector.load %arg6[%c0_332, %c2_333, %c3_334] : memref<2x22x22xf32, #tpu.memory_space<vmem>>, vector<1x16x16xf32>
    %388 = vector.shape_cast %387 : vector<1x16x16xf32> to vector<16x16xf32>
    %c1_335 = arith.constant 1 : index
    %c2_336 = arith.constant 2 : index
    %c3_337 = arith.constant 3 : index
    %389 = vector.load %arg6[%c1_335, %c2_336, %c3_337] : memref<2x22x22xf32, #tpu.memory_space<vmem>>, vector<1x16x16xf32>
    %390 = vector.shape_cast %389 : vector<1x16x16xf32> to vector<16x16xf32>
    %391 = vector.broadcast %385 : f32 to vector<16x16xf32>
    %392 = arith.mulf %391, %388 : vector<16x16xf32>
    %393 = vector.broadcast %386 : f32 to vector<16x16xf32>
    %394 = arith.mulf %393, %390 : vector<16x16xf32>
    %395 = arith.addf %392, %394 : vector<16x16xf32>
    %396 = arith.addf %348, %395 : vector<16x16xf32>
    %c0_338 = arith.constant 0 : index
    %c18_339 = arith.constant 18 : index
    %397 = memref.load %arg4[%c0_338, %c18_339] : memref<2x49xf32, #tpu.memory_space<smem>>
    %c1_340 = arith.constant 1 : index
    %c18_341 = arith.constant 18 : index
    %398 = memref.load %arg4[%c1_340, %c18_341] : memref<2x49xf32, #tpu.memory_space<smem>>
    %c0_342 = arith.constant 0 : index
    %c2_343 = arith.constant 2 : index
    %c4_344 = arith.constant 4 : index
    %399 = vector.load %arg6[%c0_342, %c2_343, %c4_344] : memref<2x22x22xf32, #tpu.memory_space<vmem>>, vector<1x16x16xf32>
    %400 = vector.shape_cast %399 : vector<1x16x16xf32> to vector<16x16xf32>
    %c1_345 = arith.constant 1 : index
    %c2_346 = arith.constant 2 : index
    %c4_347 = arith.constant 4 : index
    %401 = vector.load %arg6[%c1_345, %c2_346, %c4_347] : memref<2x22x22xf32, #tpu.memory_space<vmem>>, vector<1x16x16xf32>
    %402 = vector.shape_cast %401 : vector<1x16x16xf32> to vector<16x16xf32>
    %403 = vector.broadcast %397 : f32 to vector<16x16xf32>
    %404 = arith.mulf %403, %400 : vector<16x16xf32>
    %405 = vector.broadcast %398 : f32 to vector<16x16xf32>
    %406 = arith.mulf %405, %402 : vector<16x16xf32>
    %407 = arith.addf %404, %406 : vector<16x16xf32>
    %408 = arith.addf %360, %407 : vector<16x16xf32>
    %c0_348 = arith.constant 0 : index
    %c19 = arith.constant 19 : index
    %409 = memref.load %arg4[%c0_348, %c19] : memref<2x49xf32, #tpu.memory_space<smem>>
    %c1_349 = arith.constant 1 : index
    %c19_350 = arith.constant 19 : index
    %410 = memref.load %arg4[%c1_349, %c19_350] : memref<2x49xf32, #tpu.memory_space<smem>>
    %c0_351 = arith.constant 0 : index
    %c2_352 = arith.constant 2 : index
    %c5_353 = arith.constant 5 : index
    %411 = vector.load %arg6[%c0_351, %c2_352, %c5_353] : memref<2x22x22xf32, #tpu.memory_space<vmem>>, vector<1x16x16xf32>
    %412 = vector.shape_cast %411 : vector<1x16x16xf32> to vector<16x16xf32>
    %c1_354 = arith.constant 1 : index
    %c2_355 = arith.constant 2 : index
    %c5_356 = arith.constant 5 : index
    %413 = vector.load %arg6[%c1_354, %c2_355, %c5_356] : memref<2x22x22xf32, #tpu.memory_space<vmem>>, vector<1x16x16xf32>
    %414 = vector.shape_cast %413 : vector<1x16x16xf32> to vector<16x16xf32>
    %415 = vector.broadcast %409 : f32 to vector<16x16xf32>
    %416 = arith.mulf %415, %412 : vector<16x16xf32>
    %417 = vector.broadcast %410 : f32 to vector<16x16xf32>
    %418 = arith.mulf %417, %414 : vector<16x16xf32>
    %419 = arith.addf %416, %418 : vector<16x16xf32>
    %420 = arith.addf %372, %419 : vector<16x16xf32>
    %c0_357 = arith.constant 0 : index
    %c20 = arith.constant 20 : index
    %421 = memref.load %arg4[%c0_357, %c20] : memref<2x49xf32, #tpu.memory_space<smem>>
    %c1_358 = arith.constant 1 : index
    %c20_359 = arith.constant 20 : index
    %422 = memref.load %arg4[%c1_358, %c20_359] : memref<2x49xf32, #tpu.memory_space<smem>>
    %c0_360 = arith.constant 0 : index
    %c2_361 = arith.constant 2 : index
    %c6_362 = arith.constant 6 : index
    %423 = vector.load %arg6[%c0_360, %c2_361, %c6_362] : memref<2x22x22xf32, #tpu.memory_space<vmem>>, vector<1x16x16xf32>
    %424 = vector.shape_cast %423 : vector<1x16x16xf32> to vector<16x16xf32>
    %c1_363 = arith.constant 1 : index
    %c2_364 = arith.constant 2 : index
    %c6_365 = arith.constant 6 : index
    %425 = vector.load %arg6[%c1_363, %c2_364, %c6_365] : memref<2x22x22xf32, #tpu.memory_space<vmem>>, vector<1x16x16xf32>
    %426 = vector.shape_cast %425 : vector<1x16x16xf32> to vector<16x16xf32>
    %427 = vector.broadcast %421 : f32 to vector<16x16xf32>
    %428 = arith.mulf %427, %424 : vector<16x16xf32>
    %429 = vector.broadcast %422 : f32 to vector<16x16xf32>
    %430 = arith.mulf %429, %426 : vector<16x16xf32>
    %431 = arith.addf %428, %430 : vector<16x16xf32>
    %432 = arith.addf %384, %431 : vector<16x16xf32>
    %c0_366 = arith.constant 0 : index
    %c21 = arith.constant 21 : index
    %433 = memref.load %arg4[%c0_366, %c21] : memref<2x49xf32, #tpu.memory_space<smem>>
    %c1_367 = arith.constant 1 : index
    %c21_368 = arith.constant 21 : index
    %434 = memref.load %arg4[%c1_367, %c21_368] : memref<2x49xf32, #tpu.memory_space<smem>>
    %c0_369 = arith.constant 0 : index
    %c3_370 = arith.constant 3 : index
    %c0_371 = arith.constant 0 : index
    %435 = vector.load %arg6[%c0_369, %c3_370, %c0_371] : memref<2x22x22xf32, #tpu.memory_space<vmem>>, vector<1x16x16xf32>
    %436 = vector.shape_cast %435 : vector<1x16x16xf32> to vector<16x16xf32>
    %c1_372 = arith.constant 1 : index
    %c3_373 = arith.constant 3 : index
    %c0_374 = arith.constant 0 : index
    %437 = vector.load %arg6[%c1_372, %c3_373, %c0_374] : memref<2x22x22xf32, #tpu.memory_space<vmem>>, vector<1x16x16xf32>
    %438 = vector.shape_cast %437 : vector<1x16x16xf32> to vector<16x16xf32>
    %439 = vector.broadcast %433 : f32 to vector<16x16xf32>
    %440 = arith.mulf %439, %436 : vector<16x16xf32>
    %441 = vector.broadcast %434 : f32 to vector<16x16xf32>
    %442 = arith.mulf %441, %438 : vector<16x16xf32>
    %443 = arith.addf %440, %442 : vector<16x16xf32>
    %444 = arith.addf %396, %443 : vector<16x16xf32>
    %c0_375 = arith.constant 0 : index
    %c22 = arith.constant 22 : index
    %445 = memref.load %arg4[%c0_375, %c22] : memref<2x49xf32, #tpu.memory_space<smem>>
    %c1_376 = arith.constant 1 : index
    %c22_377 = arith.constant 22 : index
    %446 = memref.load %arg4[%c1_376, %c22_377] : memref<2x49xf32, #tpu.memory_space<smem>>
    %c0_378 = arith.constant 0 : index
    %c3_379 = arith.constant 3 : index
    %c1_380 = arith.constant 1 : index
    %447 = vector.load %arg6[%c0_378, %c3_379, %c1_380] : memref<2x22x22xf32, #tpu.memory_space<vmem>>, vector<1x16x16xf32>
    %448 = vector.shape_cast %447 : vector<1x16x16xf32> to vector<16x16xf32>
    %c1_381 = arith.constant 1 : index
    %c3_382 = arith.constant 3 : index
    %c1_383 = arith.constant 1 : index
    %449 = vector.load %arg6[%c1_381, %c3_382, %c1_383] : memref<2x22x22xf32, #tpu.memory_space<vmem>>, vector<1x16x16xf32>
    %450 = vector.shape_cast %449 : vector<1x16x16xf32> to vector<16x16xf32>
    %451 = vector.broadcast %445 : f32 to vector<16x16xf32>
    %452 = arith.mulf %451, %448 : vector<16x16xf32>
    %453 = vector.broadcast %446 : f32 to vector<16x16xf32>
    %454 = arith.mulf %453, %450 : vector<16x16xf32>
    %455 = arith.addf %452, %454 : vector<16x16xf32>
    %456 = arith.addf %408, %455 : vector<16x16xf32>
    %c0_384 = arith.constant 0 : index
    %c23 = arith.constant 23 : index
    %457 = memref.load %arg4[%c0_384, %c23] : memref<2x49xf32, #tpu.memory_space<smem>>
    %c1_385 = arith.constant 1 : index
    %c23_386 = arith.constant 23 : index
    %458 = memref.load %arg4[%c1_385, %c23_386] : memref<2x49xf32, #tpu.memory_space<smem>>
    %c0_387 = arith.constant 0 : index
    %c3_388 = arith.constant 3 : index
    %c2_389 = arith.constant 2 : index
    %459 = vector.load %arg6[%c0_387, %c3_388, %c2_389] : memref<2x22x22xf32, #tpu.memory_space<vmem>>, vector<1x16x16xf32>
    %460 = vector.shape_cast %459 : vector<1x16x16xf32> to vector<16x16xf32>
    %c1_390 = arith.constant 1 : index
    %c3_391 = arith.constant 3 : index
    %c2_392 = arith.constant 2 : index
    %461 = vector.load %arg6[%c1_390, %c3_391, %c2_392] : memref<2x22x22xf32, #tpu.memory_space<vmem>>, vector<1x16x16xf32>
    %462 = vector.shape_cast %461 : vector<1x16x16xf32> to vector<16x16xf32>
    %463 = vector.broadcast %457 : f32 to vector<16x16xf32>
    %464 = arith.mulf %463, %460 : vector<16x16xf32>
    %465 = vector.broadcast %458 : f32 to vector<16x16xf32>
    %466 = arith.mulf %465, %462 : vector<16x16xf32>
    %467 = arith.addf %464, %466 : vector<16x16xf32>
    %468 = arith.addf %420, %467 : vector<16x16xf32>
    %c0_393 = arith.constant 0 : index
    %c24 = arith.constant 24 : index
    %469 = memref.load %arg4[%c0_393, %c24] : memref<2x49xf32, #tpu.memory_space<smem>>
    %c1_394 = arith.constant 1 : index
    %c24_395 = arith.constant 24 : index
    %470 = memref.load %arg4[%c1_394, %c24_395] : memref<2x49xf32, #tpu.memory_space<smem>>
    %c0_396 = arith.constant 0 : index
    %c3_397 = arith.constant 3 : index
    %c3_398 = arith.constant 3 : index
    %471 = vector.load %arg6[%c0_396, %c3_397, %c3_398] : memref<2x22x22xf32, #tpu.memory_space<vmem>>, vector<1x16x16xf32>
    %472 = vector.shape_cast %471 : vector<1x16x16xf32> to vector<16x16xf32>
    %c1_399 = arith.constant 1 : index
    %c3_400 = arith.constant 3 : index
    %c3_401 = arith.constant 3 : index
    %473 = vector.load %arg6[%c1_399, %c3_400, %c3_401] : memref<2x22x22xf32, #tpu.memory_space<vmem>>, vector<1x16x16xf32>
    %474 = vector.shape_cast %473 : vector<1x16x16xf32> to vector<16x16xf32>
    %475 = vector.broadcast %469 : f32 to vector<16x16xf32>
    %476 = arith.mulf %475, %472 : vector<16x16xf32>
    %477 = vector.broadcast %470 : f32 to vector<16x16xf32>
    %478 = arith.mulf %477, %474 : vector<16x16xf32>
    %479 = arith.addf %476, %478 : vector<16x16xf32>
    %480 = arith.addf %432, %479 : vector<16x16xf32>
    %c0_402 = arith.constant 0 : index
    %c25 = arith.constant 25 : index
    %481 = memref.load %arg4[%c0_402, %c25] : memref<2x49xf32, #tpu.memory_space<smem>>
    %c1_403 = arith.constant 1 : index
    %c25_404 = arith.constant 25 : index
    %482 = memref.load %arg4[%c1_403, %c25_404] : memref<2x49xf32, #tpu.memory_space<smem>>
    %c0_405 = arith.constant 0 : index
    %c3_406 = arith.constant 3 : index
    %c4_407 = arith.constant 4 : index
    %483 = vector.load %arg6[%c0_405, %c3_406, %c4_407] : memref<2x22x22xf32, #tpu.memory_space<vmem>>, vector<1x16x16xf32>
    %484 = vector.shape_cast %483 : vector<1x16x16xf32> to vector<16x16xf32>
    %c1_408 = arith.constant 1 : index
    %c3_409 = arith.constant 3 : index
    %c4_410 = arith.constant 4 : index
    %485 = vector.load %arg6[%c1_408, %c3_409, %c4_410] : memref<2x22x22xf32, #tpu.memory_space<vmem>>, vector<1x16x16xf32>
    %486 = vector.shape_cast %485 : vector<1x16x16xf32> to vector<16x16xf32>
    %487 = vector.broadcast %481 : f32 to vector<16x16xf32>
    %488 = arith.mulf %487, %484 : vector<16x16xf32>
    %489 = vector.broadcast %482 : f32 to vector<16x16xf32>
    %490 = arith.mulf %489, %486 : vector<16x16xf32>
    %491 = arith.addf %488, %490 : vector<16x16xf32>
    %492 = arith.addf %444, %491 : vector<16x16xf32>
    %c0_411 = arith.constant 0 : index
    %c26 = arith.constant 26 : index
    %493 = memref.load %arg4[%c0_411, %c26] : memref<2x49xf32, #tpu.memory_space<smem>>
    %c1_412 = arith.constant 1 : index
    %c26_413 = arith.constant 26 : index
    %494 = memref.load %arg4[%c1_412, %c26_413] : memref<2x49xf32, #tpu.memory_space<smem>>
    %c0_414 = arith.constant 0 : index
    %c3_415 = arith.constant 3 : index
    %c5_416 = arith.constant 5 : index
    %495 = vector.load %arg6[%c0_414, %c3_415, %c5_416] : memref<2x22x22xf32, #tpu.memory_space<vmem>>, vector<1x16x16xf32>
    %496 = vector.shape_cast %495 : vector<1x16x16xf32> to vector<16x16xf32>
    %c1_417 = arith.constant 1 : index
    %c3_418 = arith.constant 3 : index
    %c5_419 = arith.constant 5 : index
    %497 = vector.load %arg6[%c1_417, %c3_418, %c5_419] : memref<2x22x22xf32, #tpu.memory_space<vmem>>, vector<1x16x16xf32>
    %498 = vector.shape_cast %497 : vector<1x16x16xf32> to vector<16x16xf32>
    %499 = vector.broadcast %493 : f32 to vector<16x16xf32>
    %500 = arith.mulf %499, %496 : vector<16x16xf32>
    %501 = vector.broadcast %494 : f32 to vector<16x16xf32>
    %502 = arith.mulf %501, %498 : vector<16x16xf32>
    %503 = arith.addf %500, %502 : vector<16x16xf32>
    %504 = arith.addf %456, %503 : vector<16x16xf32>
    %c0_420 = arith.constant 0 : index
    %c27 = arith.constant 27 : index
    %505 = memref.load %arg4[%c0_420, %c27] : memref<2x49xf32, #tpu.memory_space<smem>>
    %c1_421 = arith.constant 1 : index
    %c27_422 = arith.constant 27 : index
    %506 = memref.load %arg4[%c1_421, %c27_422] : memref<2x49xf32, #tpu.memory_space<smem>>
    %c0_423 = arith.constant 0 : index
    %c3_424 = arith.constant 3 : index
    %c6_425 = arith.constant 6 : index
    %507 = vector.load %arg6[%c0_423, %c3_424, %c6_425] : memref<2x22x22xf32, #tpu.memory_space<vmem>>, vector<1x16x16xf32>
    %508 = vector.shape_cast %507 : vector<1x16x16xf32> to vector<16x16xf32>
    %c1_426 = arith.constant 1 : index
    %c3_427 = arith.constant 3 : index
    %c6_428 = arith.constant 6 : index
    %509 = vector.load %arg6[%c1_426, %c3_427, %c6_428] : memref<2x22x22xf32, #tpu.memory_space<vmem>>, vector<1x16x16xf32>
    %510 = vector.shape_cast %509 : vector<1x16x16xf32> to vector<16x16xf32>
    %511 = vector.broadcast %505 : f32 to vector<16x16xf32>
    %512 = arith.mulf %511, %508 : vector<16x16xf32>
    %513 = vector.broadcast %506 : f32 to vector<16x16xf32>
    %514 = arith.mulf %513, %510 : vector<16x16xf32>
    %515 = arith.addf %512, %514 : vector<16x16xf32>
    %516 = arith.addf %468, %515 : vector<16x16xf32>
    %c0_429 = arith.constant 0 : index
    %c28 = arith.constant 28 : index
    %517 = memref.load %arg4[%c0_429, %c28] : memref<2x49xf32, #tpu.memory_space<smem>>
    %c1_430 = arith.constant 1 : index
    %c28_431 = arith.constant 28 : index
    %518 = memref.load %arg4[%c1_430, %c28_431] : memref<2x49xf32, #tpu.memory_space<smem>>
    %c0_432 = arith.constant 0 : index
    %c4_433 = arith.constant 4 : index
    %c0_434 = arith.constant 0 : index
    %519 = vector.load %arg6[%c0_432, %c4_433, %c0_434] : memref<2x22x22xf32, #tpu.memory_space<vmem>>, vector<1x16x16xf32>
    %520 = vector.shape_cast %519 : vector<1x16x16xf32> to vector<16x16xf32>
    %c1_435 = arith.constant 1 : index
    %c4_436 = arith.constant 4 : index
    %c0_437 = arith.constant 0 : index
    %521 = vector.load %arg6[%c1_435, %c4_436, %c0_437] : memref<2x22x22xf32, #tpu.memory_space<vmem>>, vector<1x16x16xf32>
    %522 = vector.shape_cast %521 : vector<1x16x16xf32> to vector<16x16xf32>
    %523 = vector.broadcast %517 : f32 to vector<16x16xf32>
    %524 = arith.mulf %523, %520 : vector<16x16xf32>
    %525 = vector.broadcast %518 : f32 to vector<16x16xf32>
    %526 = arith.mulf %525, %522 : vector<16x16xf32>
    %527 = arith.addf %524, %526 : vector<16x16xf32>
    %528 = arith.addf %480, %527 : vector<16x16xf32>
    %c0_438 = arith.constant 0 : index
    %c29 = arith.constant 29 : index
    %529 = memref.load %arg4[%c0_438, %c29] : memref<2x49xf32, #tpu.memory_space<smem>>
    %c1_439 = arith.constant 1 : index
    %c29_440 = arith.constant 29 : index
    %530 = memref.load %arg4[%c1_439, %c29_440] : memref<2x49xf32, #tpu.memory_space<smem>>
    %c0_441 = arith.constant 0 : index
    %c4_442 = arith.constant 4 : index
    %c1_443 = arith.constant 1 : index
    %531 = vector.load %arg6[%c0_441, %c4_442, %c1_443] : memref<2x22x22xf32, #tpu.memory_space<vmem>>, vector<1x16x16xf32>
    %532 = vector.shape_cast %531 : vector<1x16x16xf32> to vector<16x16xf32>
    %c1_444 = arith.constant 1 : index
    %c4_445 = arith.constant 4 : index
    %c1_446 = arith.constant 1 : index
    %533 = vector.load %arg6[%c1_444, %c4_445, %c1_446] : memref<2x22x22xf32, #tpu.memory_space<vmem>>, vector<1x16x16xf32>
    %534 = vector.shape_cast %533 : vector<1x16x16xf32> to vector<16x16xf32>
    %535 = vector.broadcast %529 : f32 to vector<16x16xf32>
    %536 = arith.mulf %535, %532 : vector<16x16xf32>
    %537 = vector.broadcast %530 : f32 to vector<16x16xf32>
    %538 = arith.mulf %537, %534 : vector<16x16xf32>
    %539 = arith.addf %536, %538 : vector<16x16xf32>
    %540 = arith.addf %492, %539 : vector<16x16xf32>
    %c0_447 = arith.constant 0 : index
    %c30 = arith.constant 30 : index
    %541 = memref.load %arg4[%c0_447, %c30] : memref<2x49xf32, #tpu.memory_space<smem>>
    %c1_448 = arith.constant 1 : index
    %c30_449 = arith.constant 30 : index
    %542 = memref.load %arg4[%c1_448, %c30_449] : memref<2x49xf32, #tpu.memory_space<smem>>
    %c0_450 = arith.constant 0 : index
    %c4_451 = arith.constant 4 : index
    %c2_452 = arith.constant 2 : index
    %543 = vector.load %arg6[%c0_450, %c4_451, %c2_452] : memref<2x22x22xf32, #tpu.memory_space<vmem>>, vector<1x16x16xf32>
    %544 = vector.shape_cast %543 : vector<1x16x16xf32> to vector<16x16xf32>
    %c1_453 = arith.constant 1 : index
    %c4_454 = arith.constant 4 : index
    %c2_455 = arith.constant 2 : index
    %545 = vector.load %arg6[%c1_453, %c4_454, %c2_455] : memref<2x22x22xf32, #tpu.memory_space<vmem>>, vector<1x16x16xf32>
    %546 = vector.shape_cast %545 : vector<1x16x16xf32> to vector<16x16xf32>
    %547 = vector.broadcast %541 : f32 to vector<16x16xf32>
    %548 = arith.mulf %547, %544 : vector<16x16xf32>
    %549 = vector.broadcast %542 : f32 to vector<16x16xf32>
    %550 = arith.mulf %549, %546 : vector<16x16xf32>
    %551 = arith.addf %548, %550 : vector<16x16xf32>
    %552 = arith.addf %504, %551 : vector<16x16xf32>
    %c0_456 = arith.constant 0 : index
    %c31 = arith.constant 31 : index
    %553 = memref.load %arg4[%c0_456, %c31] : memref<2x49xf32, #tpu.memory_space<smem>>
    %c1_457 = arith.constant 1 : index
    %c31_458 = arith.constant 31 : index
    %554 = memref.load %arg4[%c1_457, %c31_458] : memref<2x49xf32, #tpu.memory_space<smem>>
    %c0_459 = arith.constant 0 : index
    %c4_460 = arith.constant 4 : index
    %c3_461 = arith.constant 3 : index
    %555 = vector.load %arg6[%c0_459, %c4_460, %c3_461] : memref<2x22x22xf32, #tpu.memory_space<vmem>>, vector<1x16x16xf32>
    %556 = vector.shape_cast %555 : vector<1x16x16xf32> to vector<16x16xf32>
    %c1_462 = arith.constant 1 : index
    %c4_463 = arith.constant 4 : index
    %c3_464 = arith.constant 3 : index
    %557 = vector.load %arg6[%c1_462, %c4_463, %c3_464] : memref<2x22x22xf32, #tpu.memory_space<vmem>>, vector<1x16x16xf32>
    %558 = vector.shape_cast %557 : vector<1x16x16xf32> to vector<16x16xf32>
    %559 = vector.broadcast %553 : f32 to vector<16x16xf32>
    %560 = arith.mulf %559, %556 : vector<16x16xf32>
    %561 = vector.broadcast %554 : f32 to vector<16x16xf32>
    %562 = arith.mulf %561, %558 : vector<16x16xf32>
    %563 = arith.addf %560, %562 : vector<16x16xf32>
    %564 = arith.addf %516, %563 : vector<16x16xf32>
    %c0_465 = arith.constant 0 : index
    %c32_466 = arith.constant 32 : index
    %565 = memref.load %arg4[%c0_465, %c32_466] : memref<2x49xf32, #tpu.memory_space<smem>>
    %c1_467 = arith.constant 1 : index
    %c32_468 = arith.constant 32 : index
    %566 = memref.load %arg4[%c1_467, %c32_468] : memref<2x49xf32, #tpu.memory_space<smem>>
    %c0_469 = arith.constant 0 : index
    %c4_470 = arith.constant 4 : index
    %c4_471 = arith.constant 4 : index
    %567 = vector.load %arg6[%c0_469, %c4_470, %c4_471] : memref<2x22x22xf32, #tpu.memory_space<vmem>>, vector<1x16x16xf32>
    %568 = vector.shape_cast %567 : vector<1x16x16xf32> to vector<16x16xf32>
    %c1_472 = arith.constant 1 : index
    %c4_473 = arith.constant 4 : index
    %c4_474 = arith.constant 4 : index
    %569 = vector.load %arg6[%c1_472, %c4_473, %c4_474] : memref<2x22x22xf32, #tpu.memory_space<vmem>>, vector<1x16x16xf32>
    %570 = vector.shape_cast %569 : vector<1x16x16xf32> to vector<16x16xf32>
    %571 = vector.broadcast %565 : f32 to vector<16x16xf32>
    %572 = arith.mulf %571, %568 : vector<16x16xf32>
    %573 = vector.broadcast %566 : f32 to vector<16x16xf32>
    %574 = arith.mulf %573, %570 : vector<16x16xf32>
    %575 = arith.addf %572, %574 : vector<16x16xf32>
    %576 = arith.addf %528, %575 : vector<16x16xf32>
    %c0_475 = arith.constant 0 : index
    %c33 = arith.constant 33 : index
    %577 = memref.load %arg4[%c0_475, %c33] : memref<2x49xf32, #tpu.memory_space<smem>>
    %c1_476 = arith.constant 1 : index
    %c33_477 = arith.constant 33 : index
    %578 = memref.load %arg4[%c1_476, %c33_477] : memref<2x49xf32, #tpu.memory_space<smem>>
    %c0_478 = arith.constant 0 : index
    %c4_479 = arith.constant 4 : index
    %c5_480 = arith.constant 5 : index
    %579 = vector.load %arg6[%c0_478, %c4_479, %c5_480] : memref<2x22x22xf32, #tpu.memory_space<vmem>>, vector<1x16x16xf32>
    %580 = vector.shape_cast %579 : vector<1x16x16xf32> to vector<16x16xf32>
    %c1_481 = arith.constant 1 : index
    %c4_482 = arith.constant 4 : index
    %c5_483 = arith.constant 5 : index
    %581 = vector.load %arg6[%c1_481, %c4_482, %c5_483] : memref<2x22x22xf32, #tpu.memory_space<vmem>>, vector<1x16x16xf32>
    %582 = vector.shape_cast %581 : vector<1x16x16xf32> to vector<16x16xf32>
    %583 = vector.broadcast %577 : f32 to vector<16x16xf32>
    %584 = arith.mulf %583, %580 : vector<16x16xf32>
    %585 = vector.broadcast %578 : f32 to vector<16x16xf32>
    %586 = arith.mulf %585, %582 : vector<16x16xf32>
    %587 = arith.addf %584, %586 : vector<16x16xf32>
    %588 = arith.addf %540, %587 : vector<16x16xf32>
    %c0_484 = arith.constant 0 : index
    %c34 = arith.constant 34 : index
    %589 = memref.load %arg4[%c0_484, %c34] : memref<2x49xf32, #tpu.memory_space<smem>>
    %c1_485 = arith.constant 1 : index
    %c34_486 = arith.constant 34 : index
    %590 = memref.load %arg4[%c1_485, %c34_486] : memref<2x49xf32, #tpu.memory_space<smem>>
    %c0_487 = arith.constant 0 : index
    %c4_488 = arith.constant 4 : index
    %c6_489 = arith.constant 6 : index
    %591 = vector.load %arg6[%c0_487, %c4_488, %c6_489] : memref<2x22x22xf32, #tpu.memory_space<vmem>>, vector<1x16x16xf32>
    %592 = vector.shape_cast %591 : vector<1x16x16xf32> to vector<16x16xf32>
    %c1_490 = arith.constant 1 : index
    %c4_491 = arith.constant 4 : index
    %c6_492 = arith.constant 6 : index
    %593 = vector.load %arg6[%c1_490, %c4_491, %c6_492] : memref<2x22x22xf32, #tpu.memory_space<vmem>>, vector<1x16x16xf32>
    %594 = vector.shape_cast %593 : vector<1x16x16xf32> to vector<16x16xf32>
    %595 = vector.broadcast %589 : f32 to vector<16x16xf32>
    %596 = arith.mulf %595, %592 : vector<16x16xf32>
    %597 = vector.broadcast %590 : f32 to vector<16x16xf32>
    %598 = arith.mulf %597, %594 : vector<16x16xf32>
    %599 = arith.addf %596, %598 : vector<16x16xf32>
    %600 = arith.addf %552, %599 : vector<16x16xf32>
    %c0_493 = arith.constant 0 : index
    %c35 = arith.constant 35 : index
    %601 = memref.load %arg4[%c0_493, %c35] : memref<2x49xf32, #tpu.memory_space<smem>>
    %c1_494 = arith.constant 1 : index
    %c35_495 = arith.constant 35 : index
    %602 = memref.load %arg4[%c1_494, %c35_495] : memref<2x49xf32, #tpu.memory_space<smem>>
    %c0_496 = arith.constant 0 : index
    %c5_497 = arith.constant 5 : index
    %c0_498 = arith.constant 0 : index
    %603 = vector.load %arg6[%c0_496, %c5_497, %c0_498] : memref<2x22x22xf32, #tpu.memory_space<vmem>>, vector<1x16x16xf32>
    %604 = vector.shape_cast %603 : vector<1x16x16xf32> to vector<16x16xf32>
    %c1_499 = arith.constant 1 : index
    %c5_500 = arith.constant 5 : index
    %c0_501 = arith.constant 0 : index
    %605 = vector.load %arg6[%c1_499, %c5_500, %c0_501] : memref<2x22x22xf32, #tpu.memory_space<vmem>>, vector<1x16x16xf32>
    %606 = vector.shape_cast %605 : vector<1x16x16xf32> to vector<16x16xf32>
    %607 = vector.broadcast %601 : f32 to vector<16x16xf32>
    %608 = arith.mulf %607, %604 : vector<16x16xf32>
    %609 = vector.broadcast %602 : f32 to vector<16x16xf32>
    %610 = arith.mulf %609, %606 : vector<16x16xf32>
    %611 = arith.addf %608, %610 : vector<16x16xf32>
    %612 = arith.addf %564, %611 : vector<16x16xf32>
    %c0_502 = arith.constant 0 : index
    %c36 = arith.constant 36 : index
    %613 = memref.load %arg4[%c0_502, %c36] : memref<2x49xf32, #tpu.memory_space<smem>>
    %c1_503 = arith.constant 1 : index
    %c36_504 = arith.constant 36 : index
    %614 = memref.load %arg4[%c1_503, %c36_504] : memref<2x49xf32, #tpu.memory_space<smem>>
    %c0_505 = arith.constant 0 : index
    %c5_506 = arith.constant 5 : index
    %c1_507 = arith.constant 1 : index
    %615 = vector.load %arg6[%c0_505, %c5_506, %c1_507] : memref<2x22x22xf32, #tpu.memory_space<vmem>>, vector<1x16x16xf32>
    %616 = vector.shape_cast %615 : vector<1x16x16xf32> to vector<16x16xf32>
    %c1_508 = arith.constant 1 : index
    %c5_509 = arith.constant 5 : index
    %c1_510 = arith.constant 1 : index
    %617 = vector.load %arg6[%c1_508, %c5_509, %c1_510] : memref<2x22x22xf32, #tpu.memory_space<vmem>>, vector<1x16x16xf32>
    %618 = vector.shape_cast %617 : vector<1x16x16xf32> to vector<16x16xf32>
    %619 = vector.broadcast %613 : f32 to vector<16x16xf32>
    %620 = arith.mulf %619, %616 : vector<16x16xf32>
    %621 = vector.broadcast %614 : f32 to vector<16x16xf32>
    %622 = arith.mulf %621, %618 : vector<16x16xf32>
    %623 = arith.addf %620, %622 : vector<16x16xf32>
    %624 = arith.addf %576, %623 : vector<16x16xf32>
    %c0_511 = arith.constant 0 : index
    %c37 = arith.constant 37 : index
    %625 = memref.load %arg4[%c0_511, %c37] : memref<2x49xf32, #tpu.memory_space<smem>>
    %c1_512 = arith.constant 1 : index
    %c37_513 = arith.constant 37 : index
    %626 = memref.load %arg4[%c1_512, %c37_513] : memref<2x49xf32, #tpu.memory_space<smem>>
    %c0_514 = arith.constant 0 : index
    %c5_515 = arith.constant 5 : index
    %c2_516 = arith.constant 2 : index
    %627 = vector.load %arg6[%c0_514, %c5_515, %c2_516] : memref<2x22x22xf32, #tpu.memory_space<vmem>>, vector<1x16x16xf32>
    %628 = vector.shape_cast %627 : vector<1x16x16xf32> to vector<16x16xf32>
    %c1_517 = arith.constant 1 : index
    %c5_518 = arith.constant 5 : index
    %c2_519 = arith.constant 2 : index
    %629 = vector.load %arg6[%c1_517, %c5_518, %c2_519] : memref<2x22x22xf32, #tpu.memory_space<vmem>>, vector<1x16x16xf32>
    %630 = vector.shape_cast %629 : vector<1x16x16xf32> to vector<16x16xf32>
    %631 = vector.broadcast %625 : f32 to vector<16x16xf32>
    %632 = arith.mulf %631, %628 : vector<16x16xf32>
    %633 = vector.broadcast %626 : f32 to vector<16x16xf32>
    %634 = arith.mulf %633, %630 : vector<16x16xf32>
    %635 = arith.addf %632, %634 : vector<16x16xf32>
    %636 = arith.addf %588, %635 : vector<16x16xf32>
    %c0_520 = arith.constant 0 : index
    %c38 = arith.constant 38 : index
    %637 = memref.load %arg4[%c0_520, %c38] : memref<2x49xf32, #tpu.memory_space<smem>>
    %c1_521 = arith.constant 1 : index
    %c38_522 = arith.constant 38 : index
    %638 = memref.load %arg4[%c1_521, %c38_522] : memref<2x49xf32, #tpu.memory_space<smem>>
    %c0_523 = arith.constant 0 : index
    %c5_524 = arith.constant 5 : index
    %c3_525 = arith.constant 3 : index
    %639 = vector.load %arg6[%c0_523, %c5_524, %c3_525] : memref<2x22x22xf32, #tpu.memory_space<vmem>>, vector<1x16x16xf32>
    %640 = vector.shape_cast %639 : vector<1x16x16xf32> to vector<16x16xf32>
    %c1_526 = arith.constant 1 : index
    %c5_527 = arith.constant 5 : index
    %c3_528 = arith.constant 3 : index
    %641 = vector.load %arg6[%c1_526, %c5_527, %c3_528] : memref<2x22x22xf32, #tpu.memory_space<vmem>>, vector<1x16x16xf32>
    %642 = vector.shape_cast %641 : vector<1x16x16xf32> to vector<16x16xf32>
    %643 = vector.broadcast %637 : f32 to vector<16x16xf32>
    %644 = arith.mulf %643, %640 : vector<16x16xf32>
    %645 = vector.broadcast %638 : f32 to vector<16x16xf32>
    %646 = arith.mulf %645, %642 : vector<16x16xf32>
    %647 = arith.addf %644, %646 : vector<16x16xf32>
    %648 = arith.addf %600, %647 : vector<16x16xf32>
    %c0_529 = arith.constant 0 : index
    %c39 = arith.constant 39 : index
    %649 = memref.load %arg4[%c0_529, %c39] : memref<2x49xf32, #tpu.memory_space<smem>>
    %c1_530 = arith.constant 1 : index
    %c39_531 = arith.constant 39 : index
    %650 = memref.load %arg4[%c1_530, %c39_531] : memref<2x49xf32, #tpu.memory_space<smem>>
    %c0_532 = arith.constant 0 : index
    %c5_533 = arith.constant 5 : index
    %c4_534 = arith.constant 4 : index
    %651 = vector.load %arg6[%c0_532, %c5_533, %c4_534] : memref<2x22x22xf32, #tpu.memory_space<vmem>>, vector<1x16x16xf32>
    %652 = vector.shape_cast %651 : vector<1x16x16xf32> to vector<16x16xf32>
    %c1_535 = arith.constant 1 : index
    %c5_536 = arith.constant 5 : index
    %c4_537 = arith.constant 4 : index
    %653 = vector.load %arg6[%c1_535, %c5_536, %c4_537] : memref<2x22x22xf32, #tpu.memory_space<vmem>>, vector<1x16x16xf32>
    %654 = vector.shape_cast %653 : vector<1x16x16xf32> to vector<16x16xf32>
    %655 = vector.broadcast %649 : f32 to vector<16x16xf32>
    %656 = arith.mulf %655, %652 : vector<16x16xf32>
    %657 = vector.broadcast %650 : f32 to vector<16x16xf32>
    %658 = arith.mulf %657, %654 : vector<16x16xf32>
    %659 = arith.addf %656, %658 : vector<16x16xf32>
    %660 = arith.addf %612, %659 : vector<16x16xf32>
    %c0_538 = arith.constant 0 : index
    %c40 = arith.constant 40 : index
    %661 = memref.load %arg4[%c0_538, %c40] : memref<2x49xf32, #tpu.memory_space<smem>>
    %c1_539 = arith.constant 1 : index
    %c40_540 = arith.constant 40 : index
    %662 = memref.load %arg4[%c1_539, %c40_540] : memref<2x49xf32, #tpu.memory_space<smem>>
    %c0_541 = arith.constant 0 : index
    %c5_542 = arith.constant 5 : index
    %c5_543 = arith.constant 5 : index
    %663 = vector.load %arg6[%c0_541, %c5_542, %c5_543] : memref<2x22x22xf32, #tpu.memory_space<vmem>>, vector<1x16x16xf32>
    %664 = vector.shape_cast %663 : vector<1x16x16xf32> to vector<16x16xf32>
    %c1_544 = arith.constant 1 : index
    %c5_545 = arith.constant 5 : index
    %c5_546 = arith.constant 5 : index
    %665 = vector.load %arg6[%c1_544, %c5_545, %c5_546] : memref<2x22x22xf32, #tpu.memory_space<vmem>>, vector<1x16x16xf32>
    %666 = vector.shape_cast %665 : vector<1x16x16xf32> to vector<16x16xf32>
    %667 = vector.broadcast %661 : f32 to vector<16x16xf32>
    %668 = arith.mulf %667, %664 : vector<16x16xf32>
    %669 = vector.broadcast %662 : f32 to vector<16x16xf32>
    %670 = arith.mulf %669, %666 : vector<16x16xf32>
    %671 = arith.addf %668, %670 : vector<16x16xf32>
    %672 = arith.addf %624, %671 : vector<16x16xf32>
    %c0_547 = arith.constant 0 : index
    %c41 = arith.constant 41 : index
    %673 = memref.load %arg4[%c0_547, %c41] : memref<2x49xf32, #tpu.memory_space<smem>>
    %c1_548 = arith.constant 1 : index
    %c41_549 = arith.constant 41 : index
    %674 = memref.load %arg4[%c1_548, %c41_549] : memref<2x49xf32, #tpu.memory_space<smem>>
    %c0_550 = arith.constant 0 : index
    %c5_551 = arith.constant 5 : index
    %c6_552 = arith.constant 6 : index
    %675 = vector.load %arg6[%c0_550, %c5_551, %c6_552] : memref<2x22x22xf32, #tpu.memory_space<vmem>>, vector<1x16x16xf32>
    %676 = vector.shape_cast %675 : vector<1x16x16xf32> to vector<16x16xf32>
    %c1_553 = arith.constant 1 : index
    %c5_554 = arith.constant 5 : index
    %c6_555 = arith.constant 6 : index
    %677 = vector.load %arg6[%c1_553, %c5_554, %c6_555] : memref<2x22x22xf32, #tpu.memory_space<vmem>>, vector<1x16x16xf32>
    %678 = vector.shape_cast %677 : vector<1x16x16xf32> to vector<16x16xf32>
    %679 = vector.broadcast %673 : f32 to vector<16x16xf32>
    %680 = arith.mulf %679, %676 : vector<16x16xf32>
    %681 = vector.broadcast %674 : f32 to vector<16x16xf32>
    %682 = arith.mulf %681, %678 : vector<16x16xf32>
    %683 = arith.addf %680, %682 : vector<16x16xf32>
    %684 = arith.addf %636, %683 : vector<16x16xf32>
    %c0_556 = arith.constant 0 : index
    %c42 = arith.constant 42 : index
    %685 = memref.load %arg4[%c0_556, %c42] : memref<2x49xf32, #tpu.memory_space<smem>>
    %c1_557 = arith.constant 1 : index
    %c42_558 = arith.constant 42 : index
    %686 = memref.load %arg4[%c1_557, %c42_558] : memref<2x49xf32, #tpu.memory_space<smem>>
    %c0_559 = arith.constant 0 : index
    %c6_560 = arith.constant 6 : index
    %c0_561 = arith.constant 0 : index
    %687 = vector.load %arg6[%c0_559, %c6_560, %c0_561] : memref<2x22x22xf32, #tpu.memory_space<vmem>>, vector<1x16x16xf32>
    %688 = vector.shape_cast %687 : vector<1x16x16xf32> to vector<16x16xf32>
    %c1_562 = arith.constant 1 : index
    %c6_563 = arith.constant 6 : index
    %c0_564 = arith.constant 0 : index
    %689 = vector.load %arg6[%c1_562, %c6_563, %c0_564] : memref<2x22x22xf32, #tpu.memory_space<vmem>>, vector<1x16x16xf32>
    %690 = vector.shape_cast %689 : vector<1x16x16xf32> to vector<16x16xf32>
    %691 = vector.broadcast %685 : f32 to vector<16x16xf32>
    %692 = arith.mulf %691, %688 : vector<16x16xf32>
    %693 = vector.broadcast %686 : f32 to vector<16x16xf32>
    %694 = arith.mulf %693, %690 : vector<16x16xf32>
    %695 = arith.addf %692, %694 : vector<16x16xf32>
    %696 = arith.addf %648, %695 : vector<16x16xf32>
    %c0_565 = arith.constant 0 : index
    %c43 = arith.constant 43 : index
    %697 = memref.load %arg4[%c0_565, %c43] : memref<2x49xf32, #tpu.memory_space<smem>>
    %c1_566 = arith.constant 1 : index
    %c43_567 = arith.constant 43 : index
    %698 = memref.load %arg4[%c1_566, %c43_567] : memref<2x49xf32, #tpu.memory_space<smem>>
    %c0_568 = arith.constant 0 : index
    %c6_569 = arith.constant 6 : index
    %c1_570 = arith.constant 1 : index
    %699 = vector.load %arg6[%c0_568, %c6_569, %c1_570] : memref<2x22x22xf32, #tpu.memory_space<vmem>>, vector<1x16x16xf32>
    %700 = vector.shape_cast %699 : vector<1x16x16xf32> to vector<16x16xf32>
    %c1_571 = arith.constant 1 : index
    %c6_572 = arith.constant 6 : index
    %c1_573 = arith.constant 1 : index
    %701 = vector.load %arg6[%c1_571, %c6_572, %c1_573] : memref<2x22x22xf32, #tpu.memory_space<vmem>>, vector<1x16x16xf32>
    %702 = vector.shape_cast %701 : vector<1x16x16xf32> to vector<16x16xf32>
    %703 = vector.broadcast %697 : f32 to vector<16x16xf32>
    %704 = arith.mulf %703, %700 : vector<16x16xf32>
    %705 = vector.broadcast %698 : f32 to vector<16x16xf32>
    %706 = arith.mulf %705, %702 : vector<16x16xf32>
    %707 = arith.addf %704, %706 : vector<16x16xf32>
    %708 = arith.addf %660, %707 : vector<16x16xf32>
    %c0_574 = arith.constant 0 : index
    %c44 = arith.constant 44 : index
    %709 = memref.load %arg4[%c0_574, %c44] : memref<2x49xf32, #tpu.memory_space<smem>>
    %c1_575 = arith.constant 1 : index
    %c44_576 = arith.constant 44 : index
    %710 = memref.load %arg4[%c1_575, %c44_576] : memref<2x49xf32, #tpu.memory_space<smem>>
    %c0_577 = arith.constant 0 : index
    %c6_578 = arith.constant 6 : index
    %c2_579 = arith.constant 2 : index
    %711 = vector.load %arg6[%c0_577, %c6_578, %c2_579] : memref<2x22x22xf32, #tpu.memory_space<vmem>>, vector<1x16x16xf32>
    %712 = vector.shape_cast %711 : vector<1x16x16xf32> to vector<16x16xf32>
    %c1_580 = arith.constant 1 : index
    %c6_581 = arith.constant 6 : index
    %c2_582 = arith.constant 2 : index
    %713 = vector.load %arg6[%c1_580, %c6_581, %c2_582] : memref<2x22x22xf32, #tpu.memory_space<vmem>>, vector<1x16x16xf32>
    %714 = vector.shape_cast %713 : vector<1x16x16xf32> to vector<16x16xf32>
    %715 = vector.broadcast %709 : f32 to vector<16x16xf32>
    %716 = arith.mulf %715, %712 : vector<16x16xf32>
    %717 = vector.broadcast %710 : f32 to vector<16x16xf32>
    %718 = arith.mulf %717, %714 : vector<16x16xf32>
    %719 = arith.addf %716, %718 : vector<16x16xf32>
    %720 = arith.addf %672, %719 : vector<16x16xf32>
    %c0_583 = arith.constant 0 : index
    %c45 = arith.constant 45 : index
    %721 = memref.load %arg4[%c0_583, %c45] : memref<2x49xf32, #tpu.memory_space<smem>>
    %c1_584 = arith.constant 1 : index
    %c45_585 = arith.constant 45 : index
    %722 = memref.load %arg4[%c1_584, %c45_585] : memref<2x49xf32, #tpu.memory_space<smem>>
    %c0_586 = arith.constant 0 : index
    %c6_587 = arith.constant 6 : index
    %c3_588 = arith.constant 3 : index
    %723 = vector.load %arg6[%c0_586, %c6_587, %c3_588] : memref<2x22x22xf32, #tpu.memory_space<vmem>>, vector<1x16x16xf32>
    %724 = vector.shape_cast %723 : vector<1x16x16xf32> to vector<16x16xf32>
    %c1_589 = arith.constant 1 : index
    %c6_590 = arith.constant 6 : index
    %c3_591 = arith.constant 3 : index
    %725 = vector.load %arg6[%c1_589, %c6_590, %c3_591] : memref<2x22x22xf32, #tpu.memory_space<vmem>>, vector<1x16x16xf32>
    %726 = vector.shape_cast %725 : vector<1x16x16xf32> to vector<16x16xf32>
    %727 = vector.broadcast %721 : f32 to vector<16x16xf32>
    %728 = arith.mulf %727, %724 : vector<16x16xf32>
    %729 = vector.broadcast %722 : f32 to vector<16x16xf32>
    %730 = arith.mulf %729, %726 : vector<16x16xf32>
    %731 = arith.addf %728, %730 : vector<16x16xf32>
    %732 = arith.addf %684, %731 : vector<16x16xf32>
    %c0_592 = arith.constant 0 : index
    %c46 = arith.constant 46 : index
    %733 = memref.load %arg4[%c0_592, %c46] : memref<2x49xf32, #tpu.memory_space<smem>>
    %c1_593 = arith.constant 1 : index
    %c46_594 = arith.constant 46 : index
    %734 = memref.load %arg4[%c1_593, %c46_594] : memref<2x49xf32, #tpu.memory_space<smem>>
    %c0_595 = arith.constant 0 : index
    %c6_596 = arith.constant 6 : index
    %c4_597 = arith.constant 4 : index
    %735 = vector.load %arg6[%c0_595, %c6_596, %c4_597] : memref<2x22x22xf32, #tpu.memory_space<vmem>>, vector<1x16x16xf32>
    %736 = vector.shape_cast %735 : vector<1x16x16xf32> to vector<16x16xf32>
    %c1_598 = arith.constant 1 : index
    %c6_599 = arith.constant 6 : index
    %c4_600 = arith.constant 4 : index
    %737 = vector.load %arg6[%c1_598, %c6_599, %c4_600] : memref<2x22x22xf32, #tpu.memory_space<vmem>>, vector<1x16x16xf32>
    %738 = vector.shape_cast %737 : vector<1x16x16xf32> to vector<16x16xf32>
    %739 = vector.broadcast %733 : f32 to vector<16x16xf32>
    %740 = arith.mulf %739, %736 : vector<16x16xf32>
    %741 = vector.broadcast %734 : f32 to vector<16x16xf32>
    %742 = arith.mulf %741, %738 : vector<16x16xf32>
    %743 = arith.addf %740, %742 : vector<16x16xf32>
    %744 = arith.addf %696, %743 : vector<16x16xf32>
    %c0_601 = arith.constant 0 : index
    %c47 = arith.constant 47 : index
    %745 = memref.load %arg4[%c0_601, %c47] : memref<2x49xf32, #tpu.memory_space<smem>>
    %c1_602 = arith.constant 1 : index
    %c47_603 = arith.constant 47 : index
    %746 = memref.load %arg4[%c1_602, %c47_603] : memref<2x49xf32, #tpu.memory_space<smem>>
    %c0_604 = arith.constant 0 : index
    %c6_605 = arith.constant 6 : index
    %c5_606 = arith.constant 5 : index
    %747 = vector.load %arg6[%c0_604, %c6_605, %c5_606] : memref<2x22x22xf32, #tpu.memory_space<vmem>>, vector<1x16x16xf32>
    %748 = vector.shape_cast %747 : vector<1x16x16xf32> to vector<16x16xf32>
    %c1_607 = arith.constant 1 : index
    %c6_608 = arith.constant 6 : index
    %c5_609 = arith.constant 5 : index
    %749 = vector.load %arg6[%c1_607, %c6_608, %c5_609] : memref<2x22x22xf32, #tpu.memory_space<vmem>>, vector<1x16x16xf32>
    %750 = vector.shape_cast %749 : vector<1x16x16xf32> to vector<16x16xf32>
    %751 = vector.broadcast %745 : f32 to vector<16x16xf32>
    %752 = arith.mulf %751, %748 : vector<16x16xf32>
    %753 = vector.broadcast %746 : f32 to vector<16x16xf32>
    %754 = arith.mulf %753, %750 : vector<16x16xf32>
    %755 = arith.addf %752, %754 : vector<16x16xf32>
    %756 = arith.addf %708, %755 : vector<16x16xf32>
    %c0_610 = arith.constant 0 : index
    %c48_611 = arith.constant 48 : index
    %757 = memref.load %arg4[%c0_610, %c48_611] : memref<2x49xf32, #tpu.memory_space<smem>>
    %c1_612 = arith.constant 1 : index
    %c48_613 = arith.constant 48 : index
    %758 = memref.load %arg4[%c1_612, %c48_613] : memref<2x49xf32, #tpu.memory_space<smem>>
    %c0_614 = arith.constant 0 : index
    %c6_615 = arith.constant 6 : index
    %c6_616 = arith.constant 6 : index
    %759 = vector.load %arg6[%c0_614, %c6_615, %c6_616] : memref<2x22x22xf32, #tpu.memory_space<vmem>>, vector<1x16x16xf32>
    %760 = vector.shape_cast %759 : vector<1x16x16xf32> to vector<16x16xf32>
    %c1_617 = arith.constant 1 : index
    %c6_618 = arith.constant 6 : index
    %c6_619 = arith.constant 6 : index
    %761 = vector.load %arg6[%c1_617, %c6_618, %c6_619] : memref<2x22x22xf32, #tpu.memory_space<vmem>>, vector<1x16x16xf32>
    %762 = vector.shape_cast %761 : vector<1x16x16xf32> to vector<16x16xf32>
    %763 = vector.broadcast %757 : f32 to vector<16x16xf32>
    %764 = arith.mulf %763, %760 : vector<16x16xf32>
    %765 = vector.broadcast %758 : f32 to vector<16x16xf32>
    %766 = arith.mulf %765, %762 : vector<16x16xf32>
    %767 = arith.addf %764, %766 : vector<16x16xf32>
    %768 = arith.addf %720, %767 : vector<16x16xf32>
    %769 = arith.addf %768, %732 : vector<16x16xf32>
    %770 = arith.addf %769, %744 : vector<16x16xf32>
    %771 = arith.addf %770, %756 : vector<16x16xf32>
    %772 = arith.negf %771 : vector<16x16xf32>
    %773 = math.exp %772 : vector<16x16xf32>
    %cst_620 = arith.constant 1.000000e+00 : f32
    %774 = vector.broadcast %cst_620 : f32 to vector<16x16xf32>
    %775 = arith.addf %774, %773 : vector<16x16xf32>
    %776 = arith.divf %774, %775 : vector<16x16xf32>
    %777 = vector.extract_strided_slice %776 {offsets = [0, 0], sizes = [1, 16], strides = [1, 1]} : vector<16x16xf32> to vector<1x16xf32>
    %c0_621 = arith.constant 0 : index
    %c0_622 = arith.constant 0 : index
    %778 = vector.load %arg7[%c0_621, %c0_622] : memref<2x256xf32, #tpu.memory_space<vmem>>, vector<1x16xf32>
    tpu.vector_store %arg7[%c0_621, %c0_622], %777 {strides = array<i32>} : memref<2x256xf32, #tpu.memory_space<vmem>>, vector<1x16xf32>,
    %779 = vector.extract_strided_slice %776 {offsets = [1, 0], sizes = [1, 16], strides = [1, 1]} : vector<16x16xf32> to vector<1x16xf32>
    %c0_623 = arith.constant 0 : index
    %c16_624 = arith.constant 16 : index
    %780 = vector.load %arg7[%c0_623, %c16_624] : memref<2x256xf32, #tpu.memory_space<vmem>>, vector<1x16xf32>
    tpu.vector_store %arg7[%c0_623, %c16_624], %779 {strides = array<i32>} : memref<2x256xf32, #tpu.memory_space<vmem>>, vector<1x16xf32>,
    %781 = vector.extract_strided_slice %776 {offsets = [2, 0], sizes = [1, 16], strides = [1, 1]} : vector<16x16xf32> to vector<1x16xf32>
    %c0_625 = arith.constant 0 : index
    %c32_626 = arith.constant 32 : index
    %782 = vector.load %arg7[%c0_625, %c32_626] : memref<2x256xf32, #tpu.memory_space<vmem>>, vector<1x16xf32>
    tpu.vector_store %arg7[%c0_625, %c32_626], %781 {strides = array<i32>} : memref<2x256xf32, #tpu.memory_space<vmem>>, vector<1x16xf32>,
    %783 = vector.extract_strided_slice %776 {offsets = [3, 0], sizes = [1, 16], strides = [1, 1]} : vector<16x16xf32> to vector<1x16xf32>
    %c0_627 = arith.constant 0 : index
    %c48_628 = arith.constant 48 : index
    %784 = vector.load %arg7[%c0_627, %c48_628] : memref<2x256xf32, #tpu.memory_space<vmem>>, vector<1x16xf32>
    tpu.vector_store %arg7[%c0_627, %c48_628], %783 {strides = array<i32>} : memref<2x256xf32, #tpu.memory_space<vmem>>, vector<1x16xf32>,
    %785 = vector.extract_strided_slice %776 {offsets = [4, 0], sizes = [1, 16], strides = [1, 1]} : vector<16x16xf32> to vector<1x16xf32>
    %c0_629 = arith.constant 0 : index
    %c64_630 = arith.constant 64 : index
    %786 = vector.load %arg7[%c0_629, %c64_630] : memref<2x256xf32, #tpu.memory_space<vmem>>, vector<1x16xf32>
    tpu.vector_store %arg7[%c0_629, %c64_630], %785 {strides = array<i32>} : memref<2x256xf32, #tpu.memory_space<vmem>>, vector<1x16xf32>,
    %787 = vector.extract_strided_slice %776 {offsets = [5, 0], sizes = [1, 16], strides = [1, 1]} : vector<16x16xf32> to vector<1x16xf32>
    %c0_631 = arith.constant 0 : index
    %c80_632 = arith.constant 80 : index
    %788 = vector.load %arg7[%c0_631, %c80_632] : memref<2x256xf32, #tpu.memory_space<vmem>>, vector<1x16xf32>
    tpu.vector_store %arg7[%c0_631, %c80_632], %787 {strides = array<i32>} : memref<2x256xf32, #tpu.memory_space<vmem>>, vector<1x16xf32>,
    %789 = vector.extract_strided_slice %776 {offsets = [6, 0], sizes = [1, 16], strides = [1, 1]} : vector<16x16xf32> to vector<1x16xf32>
    %c0_633 = arith.constant 0 : index
    %c96_634 = arith.constant 96 : index
    %790 = vector.load %arg7[%c0_633, %c96_634] : memref<2x256xf32, #tpu.memory_space<vmem>>, vector<1x16xf32>
    tpu.vector_store %arg7[%c0_633, %c96_634], %789 {strides = array<i32>} : memref<2x256xf32, #tpu.memory_space<vmem>>, vector<1x16xf32>,
    %791 = vector.extract_strided_slice %776 {offsets = [7, 0], sizes = [1, 16], strides = [1, 1]} : vector<16x16xf32> to vector<1x16xf32>
    %c0_635 = arith.constant 0 : index
    %c112_636 = arith.constant 112 : index
    %792 = vector.load %arg7[%c0_635, %c112_636] : memref<2x256xf32, #tpu.memory_space<vmem>>, vector<1x16xf32>
    tpu.vector_store %arg7[%c0_635, %c112_636], %791 {strides = array<i32>} : memref<2x256xf32, #tpu.memory_space<vmem>>, vector<1x16xf32>,
    %793 = vector.extract_strided_slice %776 {offsets = [8, 0], sizes = [1, 16], strides = [1, 1]} : vector<16x16xf32> to vector<1x16xf32>
    %c0_637 = arith.constant 0 : index
    %c128_638 = arith.constant 128 : index
    %794 = vector.load %arg7[%c0_637, %c128_638] : memref<2x256xf32, #tpu.memory_space<vmem>>, vector<1x16xf32>
    tpu.vector_store %arg7[%c0_637, %c128_638], %793 {strides = array<i32>} : memref<2x256xf32, #tpu.memory_space<vmem>>, vector<1x16xf32>,
    %795 = vector.extract_strided_slice %776 {offsets = [9, 0], sizes = [1, 16], strides = [1, 1]} : vector<16x16xf32> to vector<1x16xf32>
    %c0_639 = arith.constant 0 : index
    %c144_640 = arith.constant 144 : index
    %796 = vector.load %arg7[%c0_639, %c144_640] : memref<2x256xf32, #tpu.memory_space<vmem>>, vector<1x16xf32>
    tpu.vector_store %arg7[%c0_639, %c144_640], %795 {strides = array<i32>} : memref<2x256xf32, #tpu.memory_space<vmem>>, vector<1x16xf32>,
    %797 = vector.extract_strided_slice %776 {offsets = [10, 0], sizes = [1, 16], strides = [1, 1]} : vector<16x16xf32> to vector<1x16xf32>
    %c0_641 = arith.constant 0 : index
    %c160_642 = arith.constant 160 : index
    %798 = vector.load %arg7[%c0_641, %c160_642] : memref<2x256xf32, #tpu.memory_space<vmem>>, vector<1x16xf32>
    tpu.vector_store %arg7[%c0_641, %c160_642], %797 {strides = array<i32>} : memref<2x256xf32, #tpu.memory_space<vmem>>, vector<1x16xf32>,
    %799 = vector.extract_strided_slice %776 {offsets = [11, 0], sizes = [1, 16], strides = [1, 1]} : vector<16x16xf32> to vector<1x16xf32>
    %c0_643 = arith.constant 0 : index
    %c176_644 = arith.constant 176 : index
    %800 = vector.load %arg7[%c0_643, %c176_644] : memref<2x256xf32, #tpu.memory_space<vmem>>, vector<1x16xf32>
    tpu.vector_store %arg7[%c0_643, %c176_644], %799 {strides = array<i32>} : memref<2x256xf32, #tpu.memory_space<vmem>>, vector<1x16xf32>,
    %801 = vector.extract_strided_slice %776 {offsets = [12, 0], sizes = [1, 16], strides = [1, 1]} : vector<16x16xf32> to vector<1x16xf32>
    %c0_645 = arith.constant 0 : index
    %c192_646 = arith.constant 192 : index
    %802 = vector.load %arg7[%c0_645, %c192_646] : memref<2x256xf32, #tpu.memory_space<vmem>>, vector<1x16xf32>
    tpu.vector_store %arg7[%c0_645, %c192_646], %801 {strides = array<i32>} : memref<2x256xf32, #tpu.memory_space<vmem>>, vector<1x16xf32>,
    %803 = vector.extract_strided_slice %776 {offsets = [13, 0], sizes = [1, 16], strides = [1, 1]} : vector<16x16xf32> to vector<1x16xf32>
    %c0_647 = arith.constant 0 : index
    %c208_648 = arith.constant 208 : index
    %804 = vector.load %arg7[%c0_647, %c208_648] : memref<2x256xf32, #tpu.memory_space<vmem>>, vector<1x16xf32>
    tpu.vector_store %arg7[%c0_647, %c208_648], %803 {strides = array<i32>} : memref<2x256xf32, #tpu.memory_space<vmem>>, vector<1x16xf32>,
    %805 = vector.extract_strided_slice %776 {offsets = [14, 0], sizes = [1, 16], strides = [1, 1]} : vector<16x16xf32> to vector<1x16xf32>
    %c0_649 = arith.constant 0 : index
    %c224_650 = arith.constant 224 : index
    %806 = vector.load %arg7[%c0_649, %c224_650] : memref<2x256xf32, #tpu.memory_space<vmem>>, vector<1x16xf32>
    tpu.vector_store %arg7[%c0_649, %c224_650], %805 {strides = array<i32>} : memref<2x256xf32, #tpu.memory_space<vmem>>, vector<1x16xf32>,
    %807 = vector.extract_strided_slice %776 {offsets = [15, 0], sizes = [1, 16], strides = [1, 1]} : vector<16x16xf32> to vector<1x16xf32>
    %c0_651 = arith.constant 0 : index
    %c240_652 = arith.constant 240 : index
    %808 = vector.load %arg7[%c0_651, %c240_652] : memref<2x256xf32, #tpu.memory_space<vmem>>, vector<1x16xf32>
    tpu.vector_store %arg7[%c0_651, %c240_652], %807 {strides = array<i32>} : memref<2x256xf32, #tpu.memory_space<vmem>>, vector<1x16xf32>,
    %c0_653 = arith.constant 0 : index
    %c0_654 = arith.constant 0 : index
    %809 = vector.load %arg7[%c0_653, %c0_654] : memref<2x256xf32, #tpu.memory_space<vmem>>, vector<1x256xf32>
    %810 = arith.index_cast %c0_i32_7 : i32 to index
    %c0_655 = arith.constant 0 : index
    %c0_656 = arith.constant 0 : index
    %811 = vector.load %arg5[%810, %c0_655, %c0_656] : memref<1x16x256xf32, #tpu.memory_space<vmem>>, vector<1x16x256xf32>
    %812 = vector.shape_cast %811 : vector<1x16x256xf32> to vector<16x256xf32>
    %813 = vector.broadcast %809 : vector<1x256xf32> to vector<16x256xf32>
    %814 = arith.mulf %812, %813 : vector<16x256xf32>
    %815 = arith.index_cast %c0_i32_7 : i32 to index
    %c0_657 = arith.constant 0 : index
    %c0_658 = arith.constant 0 : index
    %816 = vector.load %arg5[%815, %c0_657, %c0_658] : memref<1x16x256xf32, #tpu.memory_space<vmem>>, vector<1x16x256xf32>
    %817 = vector.shape_cast %816 : vector<1x16x256xf32> to vector<16x256xf32>
    %818 = vector.shape_cast %814 : vector<16x256xf32> to vector<1x16x256xf32>
    tpu.vector_store %arg5[%815, %c0_657, %c0_658], %818 {strides = array<i32>} : memref<1x16x256xf32, #tpu.memory_space<vmem>>, vector<1x16x256xf32>,
    %c1_i32 = arith.constant 1 : i32
    return
  }
  func.func @transform_0(%arg0: i32) -> (i32, i32, i32) {
    %c0_i32 = arith.constant 0 : i32
    %c0_i32_0 = arith.constant 0 : i32
    %c0_i32_1 = arith.constant 0 : i32
    return %arg0, %c0_i32, %c0_i32_0 : i32, i32, i32
  }
  func.func @transform_1(%arg0: i32) -> (i32, i32) {
    %c0_i32 = arith.constant 0 : i32
    %c0_i32_0 = arith.constant 0 : i32
    %c0_i32_1 = arith.constant 0 : i32
    return %c0_i32, %c0_i32_0 : i32, i32
  }
  func.func @transform_2(%arg0: i32) -> (i32, i32) {
    %c0_i32 = arith.constant 0 : i32
    %c0_i32_0 = arith.constant 0 : i32
    %c0_i32_1 = arith.constant 0 : i32
    return %c0_i32, %c0_i32_0 : i32, i32
  }
  func.func @transform_3(%arg0: i32) -> (i32, i32) {
    %c0_i32 = arith.constant 0 : i32
    %c0_i32_0 = arith.constant 0 : i32
    %c0_i32_1 = arith.constant 0 : i32
    return %c0_i32, %c0_i32_0 : i32, i32
  }
  func.func @transform_4(%arg0: i32) -> (i32, i32, i32) {
    %c0_i32 = arith.constant 0 : i32
    %c0_i32_0 = arith.constant 0 : i32
    %c0_i32_1 = arith.constant 0 : i32
    return %arg0, %c0_i32, %c0_i32_0 : i32, i32, i32
  }
}

</mosaic_0001>

<bundles_post_ra>
// kernel: tpu_custom_call.1
= control target key start
LH: loop header
LB: loop body
LE: loop exit
PB: predicated region body
PF: predicated region fallthrough
CT: control target
= control target key end

     0   :  { %s4065_s0 = inlined_call_operand.hbm [shape: f32[2,16,256], index: 0, kind: input, shape index: {}]   ;;  %s4066_s1 = inlined_call_operand.vmem [shape: f32[4,16], index: 1, kind: input, shape index: {}]   ;;  %s4067_s2 = inlined_call_operand.vmem [shape: f32[16,4], index: 2, kind: input, shape index: {}]   ;;  %s4068_s3 = inlined_call_operand.vmem [shape: f32[2,49], index: 3, kind: input, shape index: {}]   ;;  %s4069_s4 = inlined_call_operand.hbm [shape: f32[2,16,256], index: 4, kind: output, shape index: {}]  }
   0x1   :  { %4192 = sst [smem:[#allocation66_spill]] %s4065_s0 }
   0x2   :  { %4193 = sst [smem:[#allocation67_spill]] %s4066_s1 }
   0x3   :  { %4194 = sst [smem:[#allocation68_spill]] %s4067_s2 }
   0x4   :  { %4195 = sst [smem:[#allocation69_spill]] %s4068_s3 }
   0x5   :  { %4196 = sst [smem:[#allocation70_spill]] %s4069_s4 }
   0x6   :  { %9 = vsyncpa [#allocation5], 0 }
   0x7   :  { %11 = vsyncpa [#allocation5 + $0x1], 0 }
   0x8   :  { %12 = vsyncpa [#allocation7], 0 }
   0x9   :  { %13 = vsyncpa [#allocation6], 0 }
   0xa   :  { %15 = vsyncpa [#allocation6 + $0x1], 0  ;;  %s2625_s15 = smov 0   ;;  %s2627_s16 = smov 0  }
   0xb   :  { %s2629_s17 = smov 0   ;;  %s2631_s18 = smov 0  }
   0xc LB: > { %4197 = sst [smem:[#allocation13_spill]] %s2550_s15  ;;  %s2646_s19 = sadd.s32 4294967295, %s2562_s18   ;;  %s2562_s18 = sphi %s2631_s18, %s4379_s18   ;;  %s2558_s17 = sphi %s2629_s17, %s4382_s17   ;;  %s2554_s16 = sphi %s2627_s16, %s4381_s16   ;;  %s2550_s15 = sphi %s2625_s15, %s4380_s15  }
   0xd   : > { %4198 = sst [smem:[#allocation14_spill]] %s2554_s16  ;;  %s2150_s20 = sadd.s32 4294967294, %s2562_s18  }
   0xe   : > { %4199 = sst [smem:[#allocation15_spill]] %s2558_s17  ;;  %s2650_s21 = sadd.s32 1, %s2562_s18  }
   0xf   : > { %4200 = sst [smem:[#allocation16_spill]] %s2562_s18  ;;  %s28_s22 = sadd.s32 1, %s2558_s17 }
  0x10   : > { %4201 = sst [smem:[#allocation17_spill]] %s2646_s19  ;;  %s25_s23 = ssub.s32 %s2562_s18, %s2650_s21 }
  0x11   : > { %4202 = sst [smem:[#allocation18_spill]] %s2650_s21  ;;  %p35_p0 = scmp.ne.s32.totalorder %s2558_s17, %s2554_s16 }
  0x12   : > { %p26_p1 = scmp.eq.s32.totalorder %s25_s23, 0  ;;  %p36_p2 = scmp.eq.s32.totalorder %s2562_s18, 0 }
  0x13   : > { %p41_p3 = scmp.ne.s32.totalorder %s2554_s16, %s2550_s15  ;;  %p4071_p4 = scmp.eq.s32.totalorder %s2646_s19, 0 }
  0x14   : > { %s2662_s24 = scalar_select %p26_p1, %s2558_s17, %s28_s22  }
  0x15   : > { %p2664_p5 = por %p36_p2, %p35_p0  ;;  %p2670_p6 = por %p4071_p4, %p41_p3 }
  0x16   : > { %4203 = sst [smem:[#allocation19_spill]] %s2662_s24  ;;  %p128_p7 = scmp.eq.s32.totalorder %s2646_s19, 1 }
  0x17   : > { %s4205_s26 = scalar_select %p2670_p6, 1, 0 }
  0x18   : > { %p134_p8 = scmp.eq.s32.totalorder %s2150_s20, 1  ;;  %p2151_p9 = scmp.ge.s32.totalorder %s2562_s18, 1 }
  0x19   : > { %p141_p10 = scmp.lt.s32.totalorder %s2562_s18, 3  ;;  %p2677_p11 = por %p128_p7, %p35_p0 }
  0x1a   : > { %p2681_p12 = por %p134_p8, %p41_p3  ;;  %s4211_s3 = sld [smem:[#allocation69_spill]] }
  0x1b   : > { %s4206_s27 = scalar_select %p2677_p11, 1, 0 }
  0x1c   : > { %s4208_s28 = scalar_select %p2681_p12, 1, 0 }
  0x1d   : > { %4207 = sst [smem:[#allocation20_spill]] %s4206_s27  ;;  %p2685_p13 = pnand %p2151_p9, %p141_p10 }
  0x1e   : > { %4209 = sst [smem:[#allocation21_spill]] %s4208_s28  ;;  %p2360_p2 = scmp.lt.s32.totalorder %s2562_s18, 2 }
  0x1f   : > { %p2347_p1 = pneg %p2685_p13  ;;  %s171_s8 = sand.u32 1, %s2558_s17  }
  0x20   : > { %s160_s6 = sshll.u32 %s4211_s3, 4  ;;  %p2705_p3 = pnand %p2360_p2, %p2664_p5  ;;  %s161_s6 = int_to_ptr.vmem [resolvable:$true] %s160_s6 }
  0x21   : > { %p2698_p7 = pnand %p2347_p1, %p4071_p4  ;;  %s2154_s10 = sshll.u32 %s171_s8, 5 }
  0x22   : > { %s2447_s11 = scalar_lea.vmem %s161_s6, 32  ;;  %p2455_p12 = scmp.lt.s32.totalorder %s161_s6, %s161_s6 }
  0x23   : > { %p2448_p8 = scmp.ne.s32.totalorder %s161_s6, %s2447_s11  ;;  %p2449_p9 = pneg %p2698_p7 }
  0x24   : > { %p2456_p11 = scmp.lt.s32.totalorder %s2447_s11, %s2447_s11 }
  0x25   : > { %p2450_p10 = pnand %p2449_p9, %p2448_p8 }
  0x26   : > { %p2457_p1 = por %p2456_p11, %p2455_p12 }
  0x27   : > { %p2451_p0 = pneg %p2450_p10 }
  0x29   : > { %p2458_p4 = pnand %p2457_p1, %p2451_p0 }
  0x2b   : > { %2461 = shalt.err (!%p2458_p4)
}
  0x2c   : > { %s2564_s12 = smov [#allocation8]   ;;  %s2312_s13 = sshll.u32 %s2562_s18, 9 }
  0x2d   : > { %2350 = dma.vmem_to_smem (!%p2698_p7), %s161_s6, 32, %s2564_s12, [#allocation7]  }
  0x2e   : > { %s175_s14 = scalar_lea.vmem [#allocation4], %s2154_s10  ;;  %s4214_s0 = sld [smem:[#allocation66_spill]] }
  0x2f   : > { %s182_s20 = sshll.u32 %s175_s14, 4  ;;  %s2721_s30 = scalar_lea.sflag [#allocation5], %s171_s8  ;;  %s2719_s20 = int_to_ptr.vmem [resolvable:$true] %s182_s20 }
  0x30   : > { %p2464_p5 = pneg %p2705_p3 }
  0x34   : > { %s2717_s25 = scalar_lea.hbm %s4214_s0, %s2312_s13  ;;  %s2467_s10 = scalar_lea.hbm %s4214_s0, 1024 }
  0x35   : > { %s2462_s5 = scalar_lea.hbm %s2717_s25, 512  ;;  %p2468_p0 = scmp.lt.u32.totalorder %s2717_s25, %s4214_s0 }
  0x36   : > { %p2463_p4 = scmp.ne.s32.totalorder %s2717_s25, %s2462_s5  ;;  %p2469_p2 = scmp.lt.u32.totalorder %s2467_s10, %s2462_s5 }
  0x37   : > { %p2471_p8 = scmp.lt.u32.totalorder %s2462_s5, %s2717_s25 }
  0x38   : > { %p2465_p11 = pnand %p2464_p5, %p2463_p4  ;;  %p2470_p7 = por %p2469_p2, %p2468_p0 }
  0x3a   : > { %p2466_p12 = pneg %p2465_p11  ;;  %p2472_p9 = por %p2471_p8, %p2470_p7 }
  0x3c   : > { %p2473_p10 = pnand %p2472_p9, %p2466_p12 }
  0x3e   : > { %2476 = shalt.err (!%p2473_p10)
}
  0x3f   : > { %s2477_s8 = scalar_lea.vmem %s2719_s20, 512  ;;  %s2565_s13 = smov [#allocation4]  }
  0x40   : > { %p2478_p1 = scmp.ne.s32.totalorder %s2719_s20, %s2477_s8  ;;  %s2482_s14 = sshll.u32 %s2565_s13, 4  ;;  %s2483_s14 = int_to_ptr.vmem [resolvable:$false] %s2482_s14 }
  0x41   : > { %s2484_s22 = scalar_lea.vmem %s2483_s14, 1024  ;;  %p2485_p6 = scmp.lt.s32.totalorder %s2719_s20, %s2483_s14 }
  0x42   : > { %p2480_p4 = pnand %p2478_p1, %p2464_p5  ;;  %p2486_p0 = scmp.lt.s32.totalorder %s2484_s22, %s2477_s8 }
  0x44   : > { %p2481_p11 = pneg %p2480_p4  ;;  %p2487_p2 = por %p2486_p0, %p2485_p6 }
  0x46   : > { %p2488_p7 = pnand %p2487_p2, %p2481_p11 }
  0x48   : > { %2491 = shalt.err (!%p2488_p7)
}
  0x49   : > { %s2566_s23 = smov 256   ;;  %s2567_s5 = smov 16  }
  0x4a   : > { %2354 = dma.hbm_to_vmem [thread:$0]  (!%p2705_p3), %s2717_s25, 512, %s2719_s20, %s2721_s30, %s2566_s23, %s2566_s23, %s2567_s5  }
  0x4b   : > { %194 = sbr.rel (%p2685_p13) target bundleno = 1916 (0x77c), region = 36 }
  0x52   : > { %s2752_s6 = sand.u32 1, %s2554_s16   ;;  %p4216_p6 = scmp.ne.s32.totalorder %s4205_s26, 0 }
  0x53   : > { %4215 = sst [smem:[#allocation22_spill]] %s2752_s6  ;;  %s2158_s7 = sshll.u32 %s2752_s6, 5 }
  0x54   : > { %s197_s10 = scalar_lea.sflag [#allocation5], %s2752_s6  ;;  %s200_s11 = scalar_lea.vmem [#allocation4], %s2158_s7 }
  0x55   : > { %2537 = dma.done.wait (%p4216_p6), %s197_s10, 512  }
  0x56   : > { %2539 = vsyncadd (%p4216_p6), %s197_s10, 4294966784  ;;  %p4217_p3 = scmp.eq.s32.totalorder %s2646_s19, 0 }
  0x58   : > { %2541 = dma.done.wait (%p4217_p3), [#allocation7], 32   ;;  %p4218_p13 = pmov %p4217_p3 }
  0x5a   : > { %2543 = vsyncadd (%p4218_p13), [#allocation7], 4294967264 }
  0x5b   : > { %209 = sfence }
  0x5c   : > { %v2766_v0 = vld [vmem:[%s200_s11] sm:$0xff]  ;;  %v2768_v1 = vld [vmem:[%s200_s11 + $0x8] sm:$0xff]  ;;  %v2770_v2 = vld [vmem:[%s200_s11 + $0x10] sm:$0xff]  ;;  %v2568_v8 = vmov 0.0|0.0   ;;  %vm2569_vm0 = vmmov 0   ;;  %v2570_v9 = vmov 0.0   ;;  %v233_v10 = vlaneseq }
  0x5d   : > { %v248_v3 = vadd.f32 %v2768_v1, %v2766_v0  ;;  %v257_v4 = vmax.f32 %v2766_v0, %v2768_v1  ;;  %v2776_v5 = vld [vmem:[%s200_s11 + $0x18] sm:$0xff]  ;;  %2332 = vmatprep.subr.bf16.mxu0 %v2568_v8  ;;  %2324 = vmatprep.mubr.msk.f32.mxu0 %vm2569_vm0, %v2570_v9  ;;  %s4219_s1 = sld [smem:[#allocation67_spill]]  ;;  %vm267_vm2 = vcmask 130048   ;;  %s4220_s2 = sld [smem:[#allocation68_spill]]  ;;  %vm342_vm3 = vcmask 31744  }
  0x5e   : > { %v251_v6 = vadd.f32 %v2776_v5, %v2770_v2  ;;  %v260_v7 = vmax.f32 %v2770_v2, %v2776_v5  ;;  %v234_v13 = vand.u32 127, %v233_v10  ;;  %vm349_vm4 = vcmask 1043456   ;;  %s4075_s12 = smov 127   ;;  %s2805_s8 = scalar_lea.vmem [#allocation9], %s2158_s7 }
  0x5f   : > { %249 = vadd.xlane.f32.xlu0 %v248_v3  ;;  %258 = vmax.xlane.f32.xlu1 %v257_v4  ;;  %v2572_v29 = vmov 0   ;;  %vm236_vm5 = vcmask 179200   ;;  %4221 = sst [smem:[#allocation23_spill]] %s2805_s8  ;;  %v2573_v54 = vmov 1966171168   ;;  %v2574_v60 = vmov 1.0  }
  0x60   : > { %vm235_vm1 = vcmp.eq.s32.totalorder %v234_v13, 0  ;;  %2429 = vset.pattern.permute.xlu1 %v2572_v29  ;;  %2430 = vset.pattern.permute.xlu0 %v2572_v29  ;;  %241 = vst.msk [vmem:[#allocation2 + $0x18] sm:$0xff] %vm236_vm5, %v2570_v9  ;;  %237 = vst.msk [vmem:[#allocation2] sm:$0xff] %vm236_vm5, %v2570_v9  ;;  %v562_v55 = vunpack.c.l.s4 %v2573_v54  ;;  %v2815_v62 = vshrl.u32 %v233_v10, 7  ;;  %vm2822_vm6 = vcmp.lt.s32.totalorder %v233_v10, 256  ;;  %s4073_s13 = smov 3  }
  0x61   : > { %238 = vst.msk [vmem:[#allocation2 + $0x8] sm:$0xff] %vm236_vm5, %v2570_v9  ;;  %242 = vst.msk [vmem:[#allocation2 + $0x20] sm:$0xff] %vm236_vm5, %v2570_v9  ;;  %s2576_s14 = smov 115   ;;  %s2577_s22 = smov 99   ;;  %vm239_vm7 = vcmask 177152   ;;  %vm610_vm8 = vcmask 147480  }
  0x62   : > { %v563_v61 = vunpack.c.0.s8 %v562_v55  ;;  %4222 = vst [vmem:[#allocation24_spill] sm:$0xff] %v2815_v62  ;;  %s2578_s23 = smov 83   ;;  %s2579_s5 = smov 67   ;;  %243 = vst.msk [vmem:[#allocation2 + $0x28] sm:$0x3f] %vm239_vm7, %v2570_v9  ;;  %vm1909_vm9 = vcmask 122880  }
  0x63   : > { %252 = vadd.xlane.f32.xlu0 %v251_v6  ;;  %261 = vmax.xlane.f32.xlu1 %v260_v7  ;;  %v230_v21 = vld [vmem:[%s4219_s1] sm:$0xf]  ;;  %v232_v26 = vld [vmem:[%s4220_s2 + $0x8] sm:$0xff]  ;;  %s2580_s7 = smov 51   ;;  %s2581_s10 = smov 35   ;;  %vm1924_vm10 = vcmask 254080  }
  0x64   : > { %v231_v22 = vld [vmem:[%s4220_s2] sm:$0xff]  ;;  %v2818_v3 = vsub.s32 %v563_v61, %v2815_v62  ;;  %s2582_s11 = smov 19   ;;  %240 = vst.msk [vmem:[#allocation2 + $0x10] sm:$0x3f] %vm239_vm7, %v2570_v9  ;;  %s2885_s26 = sld [smem:[#allocation8 + $0x85]]  ;;  %vm1930_vm11 = vcmask 385280  }
  0x65   : > { %2329 = vmatprep.mubr.msk.f32.mxu1 %vm342_vm3, %v231_v22  ;;  %s2887_s29 = sld [smem:[#allocation8 + $0x86]]  ;;  %s2889_s9 = sld [smem:[#allocation8 + $0x89]]  ;;  %vm1937_vm12 = vcmask 516480   ;;  %vm1950_vm13 = vcmask 647680   ;;  %vm1957_vm14 = vcmask 778880   ;;  %vm1963_vm15 = vcmask 910080  }
  0x66   : > { %s2891_s20 = sld [smem:[#allocation8 + $0x87]]  ;;  %s2893_s25 = sld [smem:[#allocation8 + $0x8a]]  ;;  %vm1970_vm0 = vcmask 1041280  }
  0x67   : > { %s2895_s30 = sld [smem:[#allocation8 + $0x8d]]  ;;  %s2919_s1 = sld [smem:[#allocation8 + $0x1]] }
  0x68   : > { %s2917_s0 = sld [smem:[#allocation8 + $0x5]]  ;;  %s2921_s2 = sld [smem:[#allocation8 + $0x2]] }
  0x69   : > { %s2923_s3 = sld [smem:[#allocation8 + $0x4]]  ;;  %s2925_s24 = sld [smem:[#allocation8 + $0x3]] }
  0x6a   : > { %s2927_s17 = sld [smem:[#allocation8]]  ;;  %s2929_s16 = sld [smem:[#allocation8 + $0x6]] }
  0x6b   : > { %4225 = sst [smem:[#allocation25_spill]] %s2887_s29  ;;  %s2932_s21 = sld [smem:[#allocation8 + $0x8]] }
  0x6c   : > { %4226 = sst [smem:[#allocation26_spill]] %s2889_s9  ;;  %s2946_s28 = sld [smem:[#allocation8 + $0x9]] }
  0x6d   : > { %4227 = sst [smem:[#allocation27_spill]] %s2891_s20  ;;  %s2940_s18 = sld [smem:[#allocation8 + $0xc]]  ;;  %v941_v61 = vstv %s2919_s1 }
  0x6e   : > { %4235 = sst [smem:[#allocation35_spill]] %s2921_s2  ;;  %s2952_s15 = sld [smem:[#allocation8 + $0x98]] }
  0x6f   : > { %4236 = sst [smem:[#allocation36_spill]] %s2923_s3  ;;  %s2960_s4 = sld [smem:[#allocation8 + $0xa0]] }
  0x70   : > { %4237 = sst [smem:[#allocation37_spill]] %s2925_s24  ;;  %s2962_s27 = sld [smem:[#allocation8 + $0xa4]] }
  0x71   : > { %4238 = sst [smem:[#allocation38_spill]] %s2927_s17  ;;  %s2980_s19 = sld [smem:[#allocation8 + $0x14]] }
  0x72   : > { %4239 = sst [smem:[#allocation39_spill]] %s2929_s16  ;;  %s2971_s6 = sld [smem:[#allocation8 + $0xa8]] }
  0x73   : > { %4240 = sst [smem:[#allocation40_spill]] %s2932_s21 }
  0x74   : > { %4241 = sst [smem:[#allocation41_spill]] %s2940_s18 }
  0x75   : > { %4242 = sst [smem:[#allocation42_spill]] %s2946_s28 }
  0x76   : > { %4243 = sst [smem:[#allocation43_spill]] %s2962_s27 }
  0x78   : > { %4244 = sst [smem:[#allocation44_spill]] %s2971_s6 }
  0xec   : > { %v250_v11 = vpop.xlane.xlu0 %249  ;;  %v259_v12 = vpop.xlane.xlu1 %258 }
  0xed   : > { %v255_v14 = vmul.f32 0.00390625, %v250_v11 }
  0xef   : > { %v265_v18 = vsel %vm235_vm1, %v255_v14, %v259_v12 }
  0xf0   : > { %v253_v15 = vpop.xlane.xlu0 %252  ;;  %v262_v16 = vpop.xlane.xlu1 %261 }
  0xf1   : > { %v256_v17 = vmul.f32 0.00390625, %v253_v15 }
  0xf3   : > { %v266_v19 = vsel %vm235_vm1, %v256_v17, %v262_v16 }
  0xf4   : > { %v2333_v20 = vpack.c.bf16 %v266_v19, %v265_v18 }
  0xf6   : > { %2334 = vmatpush3.bf16.msra.mxu0 %v2333_v20 }
  0xf9   : > { %2325 = vmatmul.mubr.msk.f32.vlgmr.msra.gmra.mrb[0].mxu0 %vm267_vm2, %v230_v21 }
 0x1cc   : > { %v337_v23 = vpop.f32.mrb[0].mxu0 }
 0x1cd   : > { %v341_v24 = vmax.f32 %v337_v23, 0.0  ;;  %v2326_v25 = vpop.f32.mrb[1].mxu0 }
 0x1cf   : > { %2327 = vmatprep.subr.msk.mxu1 %vm349_vm4, %v341_v24 }
 0x1d0   : > { %2328 = vmatpush3.msk.msra.mxu1 %vm349_vm4, %v341_v24 }
 0x1d1   : > { %2330 = vmatmul.mubr.msk.f32.vlgmr.msra.gmra.mrb[0].mxu1 %vm342_vm3, %v232_v26 }
 0x1d2   : > { %535 = vmatprep.mubr.f32.mxu1 %v2570_v9 }
 0x2a4   : > { %v2331_v27 = vpop.f32.mrb[0].mxu1 }
 0x2a5   : > { %432 = vrot.lane.b32.xlu1 %v2331_v27, %s4075_s12  ;;  %v419_v28 = vpop.f32.mrb[1].mxu1 }
 0x2a6   : > { %430 = vrot.lane.b32.xlu0 %v419_v28, %s4075_s12  ;;  %s2914_s12 = sld [smem:[#allocation8 + $0x80]] }
 0x317   : > { %v433_v30 = vpop.permute.xlu1 %432 }
 0x318   : > { %v437_v31 = vadd.f32 %v2331_v27, %v433_v30  ;;  %v431_v32 = vpop.permute.xlu0 %430 }
 0x319   : > { %v436_v33 = vadd.f32 %v431_v32, %v419_v28 }
 0x31a   : > { %v2166_v34 = vmul.f32 -1.442695, %v437_v31 }
 0x31b   : > { %v2165_v35 = vmul.f32 -1.442695, %v436_v33 }
 0x31c   : > { %2431 = vpow2.f32 %v2166_v34 }
 0x31d   : > { %2433 = vpow2.f32 %v2165_v35 }
 0x326   : > { %v2432_v36 = vpop.eup %2431 }
 0x327   : > { %v2434_v37 = vpop.eup %2433  ;;  %v445_v39 = vadd.f32 1.0, %v2432_v36 }
 0x328   : > { %v444_v38 = vadd.f32 1.0, %v2434_v37 }
 0x32a   : > { %2435 = vrcp.f32 %v444_v38 }
 0x32b   : > { %2437 = vrcp.f32 %v445_v39 }
 0x334   : > { %v2436_v40 = vpop.eup %2435 }
 0x335   : > { %452 = vperm.xlu1 %2429, %v2436_v40   ;;  %v2438_v41 = vpop.eup %2437 }
 0x339   : > { %457 = vperm.xlu1 %2429, %v2438_v41  }
 0x3b4   : > { %v453_v42 = vpop.permute.xlu1 %452 }
 0x3b5   : > { %v460_v43 = vmul.f32 %v453_v42, %v2766_v0  ;;  %v461_v44 = vmul.f32 %v453_v42, %v2768_v1 }
 0x3b7   : > { %464 = vst [vmem:[%s2805_s8] sm:$0xff] %v460_v43  ;;  %465 = vst [vmem:[%s2805_s8 + $0x8] sm:$0xff] %v461_v44 }
 0x3b8   : > { %v458_v45 = vpop.permute.xlu1 %457 }
 0x3b9   : > { %v462_v46 = vmul.f32 %v458_v45, %v2770_v2  ;;  %v463_v47 = vmul.f32 %v458_v45, %v2776_v5  ;;  %v4139_v45 = vstv %s2889_s9  ;;  %s3112_s9 = sld [smem:[#allocation8 + $0x28]] }
 0x3bb   : > { %466 = vst [vmem:[%s2805_s8 + $0x10] sm:$0xff] %v462_v46  ;;  %467 = vst [vmem:[%s2805_s8 + $0x18] sm:$0xff] %v463_v47  ;;  %v544_v48 = vmax.f32 %v460_v43, %v462_v46  ;;  %v551_v49 = vmax.f32 %v461_v44, %v463_v47  ;;  %v2335_v50 = vpack.c.bf16 %v463_v47, %v461_v44  ;;  %v1020_v44 = vstv %s2887_s29  ;;  %s2978_s8 = sld [smem:[#allocation8 + $0x10]]  ;;  %s3063_s29 = sld [smem:[#allocation8 + $0x1e]] }
 0x3bc   : > { %v2337_v51 = vpack.c.bf16 %v462_v46, %v460_v43  ;;  %v1000_v43 = vstv %s2885_s26  ;;  %v4113_v46 = vstv %s2891_s20  ;;  %v4114_v47 = vstv %s2893_s25  ;;  %s3136_s20 = sld [smem:[#allocation8 + $0x8b]]  ;;  %s4165_s26 = smov 2  }
 0x3bd   : > { %v545_v52 = vrot.slane %v544_v48, 4  ;;  %v552_v53 = vrot.slane %v551_v49, 4  ;;  %2336 = vmatprep.subr.bf16.mxu1 %v2335_v50 }
 0x3be   : > { %2338 = vmatpush1.bf16.msra.mxu1 %v2337_v51 }
 0x3bf   : > { %v546_v56 = vmax.f32 %v544_v48, %v545_v52  ;;  %v553_v57 = vmax.f32 %v551_v49, %v552_v53  ;;  %v1164_v48 = vstv %s2895_s30  ;;  %4259 = sst [smem:[#allocation58_spill]] %s3112_s9 }
 0x3c1   : > { %v547_v58 = vrot.slane %v546_v56, 2  ;;  %v554_v59 = vrot.slane %v553_v57, 2  ;;  %2167 = vmatmul.mubr.msk.f32.vlgmr.msra.gmra.mrb[2].mxu1 %vm267_vm2, %v2574_v60  ;;  %v997_v60 = vstv %s2917_s0  ;;  %4254 = sst [smem:[#allocation54_spill]] %s3063_s29 }
 0x3c3   : > { %v548_v63 = vmax.f32 %v546_v56, %v547_v58  ;;  %v555_v0 = vmax.f32 %v553_v57, %v554_v59  ;;  %v932_v59 = vstv %s2914_s12  ;;  %s4174_s12 = smov 1  }
 0x3c5   : > { %v549_v1 = vrot.slane %v548_v63, 1  ;;  %v556_v2 = vrot.slane %v555_v0, 1 }
 0x3c7   : > { %v550_v4 = vmax.f32 %v548_v63, %v549_v1  ;;  %v557_v5 = vmax.f32 %v555_v0, %v556_v2  ;;  %v953_v0 = vstv %s2921_s2  ;;  %v977_v2 = vstv %s2923_s3  ;;  %s3024_s2 = sld [smem:[#allocation8 + $0x18]] }
 0x3c8   : > { %s3045_s3 = sld [smem:[#allocation8 + $0x20]] }
 0x3c9   : > { %v583_v6 = vcombine.low %v550_v4, %v557_v5  ;;  %v929_v4 = vstv %s2927_s17  ;;  %s4101_s17 = smov 124  }
 0x3cb   : > { %v590_v7 = vrot.slane %v583_v6, %v2818_v3 }
 0x3cd   : > { %v597_v11 = vrot.slane %v590_v7, %v2818_v3  ;;  %v1017_v7 = vstv %s2929_s16  ;;  %4249 = sst [smem:[#allocation49_spill]] %s3024_s2  ;;  %s3031_s16 = sld [smem:[#allocation8 + $0xa]] }
 0x3ce   : > { %4252 = sst [smem:[#allocation52_spill]] %s3045_s3 }
 0x3cf   : > { %600 = vst.msk [vmem:[#allocation3 + $0x1] ss:$2 sm:$0x3] %vm2822_vm6, %v597_v11 }
 0x3d6   : > { %v2169_v12 = vld [vmem:[#allocation3 + $0x1] ss:$0 sm:$0xff]  ;;  %v2185_v10 = vld [vmem:[#allocation3 + $0x3] ss:$0 sm:$0xff] }
 0x3d7   : > { %618 = vrot.lane.b32.xlu1 %v2169_v12, %s4073_s13 }
 0x3db   : > { %639 = vrot.lane.b32.xlu1 %v2169_v12, %s2576_s14 }
 0x3df   : > { %659 = vrot.lane.b32.xlu1 %v2169_v12, %s2577_s22 }
 0x3e3   : > { %679 = vrot.lane.b32.xlu1 %v2169_v12, %s2578_s23 }
 0x3e7   : > { %699 = vrot.lane.b32.xlu1 %v2169_v12, %s2579_s5 }
 0x3eb   : > { %719 = vrot.lane.b32.xlu1 %v2169_v12, %s2580_s7 }
 0x3ef   : > { %739 = vrot.lane.b32.xlu1 %v2169_v12, %s2581_s10 }
 0x3f3   : > { %759 = vrot.lane.b32.xlu1 %v2169_v12, %s2582_s11 }
 0x3f7   : > { %779 = vrot.lane.b32.xlu1 %v2185_v10, %s4073_s13 }
 0x3fb   : > { %799 = vrot.lane.b32.xlu1 %v2185_v10, %s2576_s14 }
 0x3ff   : > { %819 = vrot.lane.b32.xlu1 %v2185_v10, %s2577_s22 }
 0x403   : > { %839 = vrot.lane.b32.xlu1 %v2185_v10, %s2578_s23 }
 0x407   : > { %859 = vrot.lane.b32.xlu1 %v2185_v10, %s2579_s5 }
 0x40b   : > { %879 = vrot.lane.b32.xlu1 %v2185_v10, %s2580_s7 }
 0x40f   : > { %899 = vrot.lane.b32.xlu1 %v2185_v10, %s2581_s10 }
 0x413   : > { %919 = vrot.lane.b32.xlu1 %v2185_v10, %s2582_s11 }
 0x449   : > { %v619_v13 = vpop.permute.xlu1 %618 }
 0x44a   : > { %622 = vst.msk [vmem:[#allocation2 + $0x1b] sm:$0x1] %vm610_vm8, %v619_v13 }
 0x44d   : > { %v640_v14 = vpop.permute.xlu1 %639 }
 0x44e   : > { %642 = vst.msk [vmem:[#allocation2 + $0x1c] sm:$0x1] %vm610_vm8, %v640_v14 }
 0x451   : > { %v660_v9 = vpop.permute.xlu1 %659 }
 0x452   : > { %662 = vst.msk [vmem:[#allocation2 + $0x1d] sm:$0x1] %vm610_vm8, %v660_v9  ;;  %v1061_v9 = vstv %s2932_s21  ;;  %s3091_s21 = sld [smem:[#allocation8 + $0x24]] }
 0x455   : > { %v680_v15 = vpop.permute.xlu1 %679 }
 0x456   : > { %682 = vst.msk [vmem:[#allocation2 + $0x1e] sm:$0x1] %vm610_vm8, %v680_v15 }
 0x458   : > { %4258 = sst [smem:[#allocation57_spill]] %s3091_s21 }
 0x459   : > { %v700_v16 = vpop.permute.xlu1 %699 }
 0x45a   : > { %702 = vst.msk [vmem:[#allocation2 + $0x1f] sm:$0x1] %vm610_vm8, %v700_v16 }
 0x45d   : > { %v720_v17 = vpop.permute.xlu1 %719 }
 0x45e   : > { %722 = vst.msk [vmem:[#allocation2 + $0x20] sm:$0x1] %vm610_vm8, %v720_v17  ;;  %v1141_v17 = vstv %s2940_s18  ;;  %s3072_s18 = sld [smem:[#allocation8 + $0x1f]] }
 0x461   : > { %v740_v18 = vpop.permute.xlu1 %739  ;;  %v2934_v42 = vld [vmem:[#allocation2 + $0x18] sm:$0xff] }
 0x462   : > { %742 = vst.msk [vmem:[#allocation2 + $0x21] sm:$0x1] %vm610_vm8, %v740_v18  ;;  %v1001_v56 = vmul.f32 %v1000_v43, %v2934_v42  ;;  %v933_v12 = vmul.f32 %v932_v59, %v2934_v42 }
 0x464   : > { %4255 = sst [smem:[#allocation55_spill]] %s3072_s18 }
 0x465   : > { %v760_v19 = vpop.permute.xlu1 %759 }
 0x466   : > { %762 = vst.msk [vmem:[#allocation2 + $0x22] sm:$0x1] %vm610_vm8, %v760_v19 }
 0x469   : > { %v780_v20 = vpop.permute.xlu1 %779 }
 0x46a   : > { %782 = vst.msk [vmem:[#allocation2 + $0x23] sm:$0x1] %vm610_vm8, %v780_v20 }
 0x46d   : > { %v800_v21 = vpop.permute.xlu1 %799 }
 0x46e   : > { %802 = vst.msk [vmem:[#allocation2 + $0x24] sm:$0x1] %vm610_vm8, %v800_v21  ;;  %v3018_v21 = vld [vmem:[#allocation2 + $0x19] sm:$0xff] }
 0x471   : > { %v820_v22 = vpop.permute.xlu1 %819 }
 0x472   : > { %822 = vst.msk [vmem:[#allocation2 + $0x25] sm:$0x1] %vm610_vm8, %v820_v22 }
 0x475   : > { %v840_v23 = vpop.permute.xlu1 %839 }
 0x476   : > { %842 = vst.msk [vmem:[#allocation2 + $0x26] sm:$0x1] %vm610_vm8, %v840_v23 }
 0x479   : > { %v860_v24 = vpop.permute.xlu1 %859 }
 0x47a   : > { %862 = vst.msk [vmem:[#allocation2 + $0x27] sm:$0x1] %vm610_vm8, %v860_v24 }
 0x47d   : > { %v880_v25 = vpop.permute.xlu1 %879 }
 0x47e   : > { %882 = vst.msk [vmem:[#allocation2 + $0x28] sm:$0x1] %vm610_vm8, %v880_v25 }
 0x481   : > { %v900_v26 = vpop.permute.xlu1 %899 }
 0x482   : > { %902 = vst.msk [vmem:[#allocation2 + $0x29] sm:$0x1] %vm610_vm8, %v900_v26  ;;  %v1081_v26 = vstv %s2946_s28  ;;  %s4257_s28 = smov 124  }
 0x485   : > { %v920_v27 = vpop.permute.xlu1 %919 }
 0x486   : > { %922 = vst.msk [vmem:[#allocation2 + $0x2a] sm:$0x1] %vm610_vm8, %v920_v27 }
 0x494   : > { %v537_v28 = vpop.f32.mrb[2].mxu1 }
 0x495   : > { %v542_v29 = vmul.f32 0.0625, %v537_v28  ;;  %v539_v30 = vpop.f32.mrb[3].mxu1 }
 0x496   : > { %v543_v31 = vmul.f32 0.0625, %v539_v30  ;;  %v1021_v30 = vmul.f32 %v1020_v44, %v2934_v42 }
 0x498   : > { %v560_v32 = vcombine.low %v542_v29, %v543_v31  ;;  %v4115_v31 = vstv %s2952_s15 }
 0x49a   : > { %v567_v33 = vrot.slane %v560_v32, %v2818_v3  ;;  %v4117_v32 = vstv %s2960_s4 }
 0x49c   : > { %v574_v34 = vrot.slane %v567_v33, %v2818_v3  ;;  %v965_v3 = vstv %s2925_s24  ;;  %s3026_s24 = sld [smem:[#allocation8 + $0x9c]]  ;;  %v1608_v33 = vstv %s2962_s27  ;;  %s4288_s27 = smov 2  }
 0x49e   : > { %580 = vst.msk [vmem:[#allocation3] ss:$2 sm:$0x3] %vm2822_vm6, %v574_v34 }
 0x4a2   : > { %4250 = sst [smem:[#allocation50_spill]] %s3026_s24 }
 0x4a5   : > { %v2168_v35 = vld [vmem:[#allocation3] ss:$0 sm:$0xff]  ;;  %v2184_v36 = vld [vmem:[#allocation3 + $0x2] ss:$0 sm:$0xff] }
 0x4a6   : > { %607 = vrot.lane.b32.xlu0 %v2168_v35, %s4073_s13 }
 0x4aa   : > { %629 = vrot.lane.b32.xlu0 %v2168_v35, %s2576_s14 }
 0x4ae   : > { %649 = vrot.lane.b32.xlu0 %v2168_v35, %s2577_s22 }
 0x4b2   : > { %669 = vrot.lane.b32.xlu0 %v2168_v35, %s2578_s23 }
 0x4b6   : > { %689 = vrot.lane.b32.xlu0 %v2168_v35, %s2579_s5 }
 0x4ba   : > { %709 = vrot.lane.b32.xlu0 %v2168_v35, %s2580_s7 }
 0x4be   : > { %729 = vrot.lane.b32.xlu0 %v2168_v35, %s2581_s10 }
 0x4c2   : > { %749 = vrot.lane.b32.xlu0 %v2168_v35, %s2582_s11 }
 0x4c6   : > { %769 = vrot.lane.b32.xlu0 %v2184_v36, %s4073_s13  ;;  %s2912_s13 = sld [smem:[#allocation8 + $0x94]] }
 0x4ca   : > { %789 = vrot.lane.b32.xlu0 %v2184_v36, %s2576_s14  ;;  %s2897_s14 = sld [smem:[#allocation8 + $0x81]] }
 0x4cc   : > { %4234 = sst [smem:[#allocation34_spill]] %s2912_s13  ;;  %v4118_v58 = vstv %s2912_s13  ;;  %s3123_s13 = sld [smem:[#allocation8 + $0xb]] }
 0x4cd   : > { %s4286_s0 = sld [smem:[#allocation34_spill]] }
 0x4ce   : > { %809 = vrot.lane.b32.xlu0 %v2184_v36, %s2577_s22  ;;  %s2900_s22 = sld [smem:[#allocation8 + $0x82]] }
 0x4d0   : > { %4228 = sst [smem:[#allocation28_spill]] %s2897_s14  ;;  %v944_v49 = vstv %s2897_s14  ;;  %s2992_s14 = sld [smem:[#allocation8 + $0x9d]] }
 0x4d1   : > { %v945_v63 = vmul.f32 %v944_v49, %v2934_v42 }
 0x4d2   : > { %829 = vrot.lane.b32.xlu0 %v2184_v36, %s2578_s23  ;;  %s2902_s23 = sld [smem:[#allocation8 + $0x84]] }
 0x4d3   : > { %4260 = sst [smem:[#allocation59_spill]] %s3123_s13 }
 0x4d4   : > { %4229 = sst [smem:[#allocation29_spill]] %s2900_s22  ;;  %v956_v50 = vstv %s2900_s22  ;;  %s4306_s30 = sld [smem:[#allocation59_spill]] }
 0x4d5   : > { %v957_v1 = vmul.f32 %v956_v50, %v2934_v42  ;;  %s2984_s22 = sld [smem:[#allocation8 + $0x7]] }
 0x4d6   : > { %849 = vrot.lane.b32.xlu0 %v2184_v36, %s2579_s5  ;;  %s2904_s5 = sld [smem:[#allocation8 + $0x88]] }
 0x4d7   : > { %4246 = sst [smem:[#allocation46_spill]] %s2992_s14 }
 0x4d8   : > { %4230 = sst [smem:[#allocation30_spill]] %s2902_s23  ;;  %v980_v52 = vstv %s2902_s23  ;;  %s3005_s23 = sld [smem:[#allocation8 + $0x9e]] }
 0x4d9   : > { %v981_v8 = vmul.f32 %v980_v52, %v2934_v42 }
 0x4da   : > { %869 = vrot.lane.b32.xlu0 %v2184_v36, %s2580_s7  ;;  %s2906_s7 = sld [smem:[#allocation8 + $0x83]] }
 0x4db   : > { %4245 = sst [smem:[#allocation45_spill]] %s2984_s22 }
 0x4dc   : > { %4231 = sst [smem:[#allocation31_spill]] %s2904_s5  ;;  %v1064_v53 = vstv %s2904_s5  ;;  %s3077_s5 = sld [smem:[#allocation8 + $0xd]] }
 0x4dd   : > { %v1065_v35 = vmul.f32 %v1064_v53, %v3018_v21  ;;  %s4287_s1 = sld [smem:[#allocation45_spill]] }
 0x4de   : > { %889 = vrot.lane.b32.xlu0 %v2184_v36, %s2581_s10  ;;  %s2908_s10 = sld [smem:[#allocation8 + $0x8c]]  ;;  %4247 = sst [smem:[#allocation47_spill]] %s3005_s23 }
 0x4e0   : > { %4232 = sst [smem:[#allocation32_spill]] %s2906_s7  ;;  %v968_v54 = vstv %s2906_s7  ;;  %s3007_s7 = sld [smem:[#allocation8 + $0x9f]] }
 0x4e1   : > { %v969_v11 = vmul.f32 %v968_v54, %v2934_v42  ;;  %v4122_v42 = vstv %s2980_s19 }
 0x4e2   : > { %909 = vrot.lane.b32.xlu0 %v2184_v36, %s2582_s11  ;;  %s2910_s11 = sld [smem:[#allocation8 + $0x90]] }
 0x4e4   : > { %4233 = sst [smem:[#allocation33_spill]] %s2908_s10  ;;  %v1144_v55 = vstv %s2908_s10  ;;  %s3074_s10 = sld [smem:[#allocation8 + $0x1c]] }
 0x4e6   : > { %4248 = sst [smem:[#allocation48_spill]] %s3007_s7 }
 0x4e8   : > { %v4125_v57 = vstv %s2910_s11 }
 0x4ea   : > { %4256 = sst [smem:[#allocation56_spill]] %s3074_s10 }
 0x518   : > { %v608_v37 = vpop.permute.xlu0 %607 }
 0x519   : > { %611 = vst.msk [vmem:[#allocation2 + $0x3] sm:$0x1] %vm610_vm8, %v608_v37  ;;  %v1145_v37 = vmul.f32 %v1144_v55, %v3018_v21 }
 0x51c   : > { %v630_v38 = vpop.permute.xlu0 %629 }
 0x51d   : > { %632 = vst.msk [vmem:[#allocation2 + $0x4] sm:$0x1] %vm610_vm8, %v630_v38 }
 0x520   : > { %v650_v39 = vpop.permute.xlu0 %649 }
 0x521   : > { %652 = vst.msk [vmem:[#allocation2 + $0x5] sm:$0x1] %vm610_vm8, %v650_v39 }
 0x524   : > { %v670_v40 = vpop.permute.xlu0 %669 }
 0x525   : > { %672 = vst.msk [vmem:[#allocation2 + $0x6] sm:$0x1] %vm610_vm8, %v670_v40  ;;  %v3068_v40 = vld [vmem:[#allocation2 + $0x1a] sm:$0xff] }
 0x528   : > { %v690_v41 = vpop.permute.xlu0 %689 }
 0x529   : > { %692 = vst.msk [vmem:[#allocation2 + $0x7] sm:$0x1] %vm610_vm8, %v690_v41  ;;  %v4126_v41 = vstv %s2978_s8 }
 0x52c   : > { %v710_v51 = vpop.permute.xlu0 %709 }
 0x52d   : > { %712 = vst.msk [vmem:[#allocation2 + $0x8] sm:$0x1] %vm610_vm8, %v710_v51 }
 0x530   : > { %v730_v5 = vpop.permute.xlu0 %729  ;;  %v925_v6 = vld [vmem:[#allocation2] sm:$0xff] }
 0x531   : > { %732 = vst.msk [vmem:[#allocation2 + $0x9] sm:$0x1] %vm610_vm8, %v730_v5  ;;  %v998_v10 = vmul.f32 %v997_v60, %v925_v6  ;;  %v942_v13 = vmul.f32 %v941_v61, %v925_v6  ;;  %v954_v14 = vmul.f32 %v953_v0, %v925_v6  ;;  %v978_v15 = vmul.f32 %v977_v2, %v925_v6 }
 0x532   : > { %v966_v16 = vmul.f32 %v965_v3, %v925_v6  ;;  %v930_v18 = vmul.f32 %v929_v4, %v925_v6  ;;  %v1018_v20 = vmul.f32 %v1017_v7, %v925_v6  ;;  %v4163_v6 = vstv %s2971_s6  ;;  %s4291_s6 = sld [smem:[#allocation27_spill]] }
 0x533   : > { %v1003_v19 = vadd.f32 %v1001_v56, %v998_v10  ;;  %v3020_v22 = vadd.f32 %v945_v63, %v942_v13  ;;  %v3022_v23 = vadd.f32 %v957_v1, %v954_v14  ;;  %v3033_v27 = vadd.f32 %v981_v8, %v978_v15  ;;  %v3096_v13 = vld [vmem:[#allocation2 + $0x1b] sm:$0xff] }
 0x534   : > { %v750_v24 = vpop.permute.xlu0 %749  ;;  %v3028_v25 = vld [vmem:[#allocation2 + $0x1] sm:$0xff]  ;;  %v3035_v28 = vadd.f32 %v969_v11, %v966_v16  ;;  %v3037_v29 = vadd.f32 %v933_v12, %v930_v18  ;;  %v1023_v38 = vadd.f32 %v1021_v30, %v1018_v20  ;;  %v4116_v56 = vstv %s2984_s22  ;;  %s4261_s22 = smov 127  }
 0x535   : > { %752 = vst.msk [vmem:[#allocation2 + $0xa] sm:$0x1] %vm610_vm8, %v750_v24  ;;  %1007 = vrot.lane.b32.xlu0 %v1003_v19, %s4101_s17  ;;  %v1062_v34 = vmul.f32 %v1061_v9, %v3028_v25  ;;  %v1142_v36 = vmul.f32 %v1141_v17, %v3028_v25  ;;  %s3061_s17 = sld [smem:[#allocation8 + $0x1d]]  ;;  %v1082_v39 = vmul.f32 %v1081_v26, %v3028_v25  ;;  %v4119_v11 = vstv %s2992_s14  ;;  %v3098_v14 = vld [vmem:[#allocation2 + $0x1c] sm:$0xff]  ;;  %s4263_s14 = smov 3  }
 0x536   : > { %4251 = vst [vmem:[#allocation51_spill] sm:$0xff] %v3037_v29  ;;  %v1085_v8 = vmul.f32 %v4139_v45, %v3018_v21  ;;  %v4133_v12 = vstv %s3005_s23  ;;  %v4128_v10 = vstv %s3007_s7  ;;  %v1229_v16 = vmul.f32 %v4125_v57, %v3068_v40  ;;  %s3183_s23 = sld [smem:[#allocation8 + $0x8e]] }
 0x537   : > { %v3081_v1 = vadd.f32 %v1065_v35, %v1062_v34  ;;  %v3083_v5 = vadd.f32 %v1145_v37, %v1142_v36  ;;  %v1309_v19 = vmul.f32 %v4118_v58, %v3068_v40  ;;  %v1042_v24 = vmul.f32 %v4116_v56, %v3028_v25  ;;  %s3338_s7 = sld [smem:[#allocation8 + $0x96]] }
 0x538   : > { %v770_v51 = vpop.permute.xlu0 %769  ;;  %v3079_v63 = vld [vmem:[#allocation2 + $0x2] sm:$0xff]  ;;  %v1087_v20 = vadd.f32 %v1085_v8, %v1082_v39  ;;  %v4121_v30 = vstv %s3024_s2  ;;  %v4132_v34 = vstv %s3026_s24  ;;  %v1045_v36 = vmul.f32 %v4113_v46, %v3018_v21  ;;  %s3159_s2 = sld [smem:[#allocation8 + $0xe]]  ;;  %s3198_s24 = sld [smem:[#allocation8 + $0x11]] }
 0x539   : > { %772 = vst.msk [vmem:[#allocation2 + $0xb] sm:$0x1] %vm610_vm8, %v770_v51  ;;  %1027 = vrot.lane.b32.xlu0 %v1023_v38, %s4257_s28  ;;  %v1226_v15 = vmul.f32 %v4126_v41, %v3079_v63  ;;  %v1306_v18 = vmul.f32 %v4122_v42, %v3079_v63  ;;  %v4124_v37 = vstv %s3031_s16  ;;  %v1105_v8 = vmul.f32 %v4114_v47, %v3018_v21 }
 0x53a   : > { %v1393_v46 = vmul.f32 %v4115_v31, %v3096_v13  ;;  %v1047_v47 = vadd.f32 %v1045_v36, %v1042_v24  ;;  %v1102_v31 = vmul.f32 %v4124_v37, %v3028_v25  ;;  %v4135_v56 = vstv %s3072_s18  ;;  %s3223_s18 = sld [smem:[#allocation8 + $0x8f]] }
 0x53b   : > { %4253 = sst [smem:[#allocation53_spill]] %s3061_s17  ;;  %v3127_v39 = vadd.f32 %v1229_v16, %v1226_v15  ;;  %v3129_v51 = vadd.f32 %v1309_v19, %v1306_v18  ;;  %v1525_v15 = vmul.f32 %v4117_v32, %v3098_v14  ;;  %v1489_v16 = vmul.f32 %v4119_v11, %v3098_v14 }
 0x53c   : > { %v790_v35 = vpop.permute.xlu0 %789  ;;  %v3125_v38 = vld [vmem:[#allocation2 + $0x3] sm:$0xff]  ;;  %v4129_v19 = vstv %s3045_s3  ;;  %v4136_v32 = vstv %s3074_s10  ;;  %v4138_v11 = vstv %s3077_s5  ;;  %v1501_v24 = vmul.f32 %v4133_v12, %v3098_v14  ;;  %4264 = sst [smem:[#allocation61_spill]] %s3183_s23  ;;  %s3207_s10 = sld [smem:[#allocation8 + $0x91]] }
 0x53d   : > { %792 = vst.msk [vmem:[#allocation2 + $0xc] sm:$0x1] %vm610_vm8, %v790_v35  ;;  %1091 = vrot.lane.b32.xlu0 %v1087_v20, %s4261_s22  ;;  %v1390_v18 = vmul.f32 %v4121_v30, %v3125_v38  ;;  %v4130_v20 = vstv %s3061_s17  ;;  %v4134_v35 = vstv %s3063_s29  ;;  %v1513_v36 = vmul.f32 %v4128_v10, %v3098_v14  ;;  %s3225_s29 = sld [smem:[#allocation8 + $0xf]]  ;;  %s4146_s17 = smov 123  }
 0x53e   : > { %4262 = sst [smem:[#allocation60_spill]] %s3159_s2  ;;  %v4155_v57 = vstv %s3091_s21  ;;  %s3258_s3 = sld [smem:[#allocation8 + $0x12]] }
 0x53f   : > { %v3163_v42 = vadd.f32 %v1393_v46, %v1390_v18  ;;  %v1477_v46 = vmul.f32 %v4132_v34, %v3098_v14  ;;  %v4152_v18 = vstv %s3112_s9  ;;  %4265 = sst [smem:[#allocation62_spill]] %s3198_s24  ;;  %v3200_v34 = vld [vmem:[#allocation2 + $0x1d] sm:$0xff]  ;;  %s3296_s21 = sld [smem:[#allocation8 + $0x95]] }
 0x540   : > { %v810_v58 = vpop.permute.xlu0 %809  ;;  %v3161_v30 = vld [vmem:[#allocation2 + $0x4] sm:$0xff]  ;;  %s4301_s9 = sld [smem:[#allocation44_spill]] }
 0x541   : > { %812 = vst.msk [vmem:[#allocation2 + $0xd] sm:$0x1] %vm610_vm8, %v810_v58  ;;  %1051 = vrot.lane.b32.xlu0 %v1047_v47, %s4263_s14  ;;  %v1522_v37 = vmul.f32 %v4129_v19, %v3161_v30  ;;  %v1486_v41 = vmul.f32 %v4130_v20, %v3161_v30  ;;  %v1498_v10 = vmul.f32 %v4134_v35, %v3161_v30 }
 0x542   : > { %v1510_v47 = vmul.f32 %v4135_v56, %v3161_v30  ;;  %v1474_v58 = vmul.f32 %v4136_v32, %v3161_v30  ;;  %v1107_v19 = vadd.f32 %v1105_v8, %v1102_v31  ;;  %v1162_v20 = vmul.f32 %v4138_v11, %v3028_v25  ;;  %4266 = sst [smem:[#allocation63_spill]] %s3207_s10 }
 0x543   : > { %v3202_v12 = vadd.f32 %v1525_v15, %v1522_v37  ;;  %v3204_v35 = vadd.f32 %v1489_v16, %v1486_v41  ;;  %v4162_v32 = vstv %s3123_s13  ;;  %v3211_v8 = vadd.f32 %v1501_v24, %v1498_v10  ;;  %s4167_s13 = smov 126  }
 0x544   : > { %v830_v56 = vpop.permute.xlu0 %829  ;;  %v3209_v31 = vld [vmem:[#allocation2 + $0x5] sm:$0xff]  ;;  %v3213_v11 = vadd.f32 %v1513_v36, %v1510_v47  ;;  %v3215_v45 = vadd.f32 %v1477_v46, %v1474_v58  ;;  %v1165_v41 = vmul.f32 %v1164_v48, %v3018_v21  ;;  %v1124_v37 = vstv %s3136_s20  ;;  %s4307_s20 = sld [smem:[#allocation49_spill]] }
 0x545   : > { %832 = vst.msk [vmem:[#allocation2 + $0xe] sm:$0x1] %vm610_vm8, %v830_v56  ;;  %1111 = vrot.lane.b32.xlu0 %v1107_v19, %s4261_s22  ;;  %v1606_v10 = vmul.f32 %v4155_v57, %v3209_v31  ;;  %v1609_v15 = vmul.f32 %v1608_v33, %v3200_v34  ;;  %v1686_v56 = vmul.f32 %v4152_v18, %v3209_v31  ;;  %v4150_v46 = vstv %s3159_s2  ;;  %s3265_s2 = sld [smem:[#allocation8 + $0x92]] }
 0x546   : > { %4267 = vst [vmem:[#allocation64_spill] sm:$0xff] %v3215_v45  ;;  %v1689_v16 = vmul.f32 %v4163_v6, %v3200_v34  ;;  %v1167_v19 = vadd.f32 %v1165_v41, %v1162_v20  ;;  %v1122_v24 = vmul.f32 %v4162_v32, %v3028_v25  ;;  %v1125_v20 = vmul.f32 %v1124_v37, %v3018_v21  ;;  %v3310_v6 = vld [vmem:[#allocation2 + $0x21] sm:$0xff] }
 0x547   : > { %v3243_v47 = vadd.f32 %v1609_v15, %v1606_v10  ;;  %v4153_v41 = vstv %s3183_s23  ;;  %v1186_v10 = vmul.f32 %v4150_v46, %v3079_v63  ;;  %v4159_v15 = vstv %s3198_s24  ;;  %s3279_s24 = sld [smem:[#allocation8 + $0x15]]  ;;  %s3336_s23 = sld [smem:[#allocation8 + $0x93]] }
 0x548   : > { %v850_v36 = vpop.permute.xlu0 %849  ;;  %v3245_v58 = vadd.f32 %v1689_v16, %v1686_v56  ;;  %v1127_v25 = vadd.f32 %v1125_v20, %v1122_v24  ;;  %v4161_v16 = vstv %s3207_s10  ;;  %v1189_v21 = vmul.f32 %v4153_v41, %v3068_v40  ;;  %s3340_s10 = sld [smem:[#allocation8 + $0x16]] }
 0x549   : > { %852 = vst.msk [vmem:[#allocation2 + $0xf] sm:$0x1] %vm610_vm8, %v850_v36  ;;  %1171 = vrot.lane.b32.xlu0 %v1167_v19, %s4146_s17  ;;  %v928_v36 = vld [vmem:[#allocation2 + $0x20] sm:$0xff]  ;;  %v1246_v19 = vmul.f32 %v4159_v15, %v3079_v63  ;;  %v4164_v24 = vstv %s3225_s29  ;;  %v4182_v20 = vstv %s3223_s18  ;;  %s3319_s17 = sld [smem:[#allocation8 + $0x13]] }
 0x54a   : > { %v1191_v46 = vadd.f32 %v1189_v21, %v1186_v10  ;;  %v946_v18 = vmul.f32 %v944_v49, %v928_v36  ;;  %v958_v15 = vmul.f32 %v956_v50, %v928_v36  ;;  %v982_v10 = vmul.f32 %v980_v52, %v928_v36 }
 0x54b   : > { %v970_v21 = vmul.f32 %v968_v54, %v928_v36  ;;  %v1206_v49 = vmul.f32 %v4164_v24, %v3079_v63 }
 0x54c   : > { %v870_v56 = vpop.permute.xlu0 %869 }
 0x54d   : > { %872 = vst.msk [vmem:[#allocation2 + $0x10] sm:$0x1] %vm610_vm8, %v870_v56  ;;  %1131 = vrot.lane.b32.xlu0 %v1127_v25, %s4261_s22  ;;  %v1249_v56 = vmul.f32 %v4161_v16, %v3068_v40  ;;  %v1002_v25 = vmul.f32 %v1000_v43, %v928_v36  ;;  %v934_v16 = vmul.f32 %v932_v59, %v928_v36 }
 0x54f   : > { %v1251_v54 = vadd.f32 %v1249_v56, %v1246_v19  ;;  %v4181_v19 = vstv %s3258_s3 }
 0x550   : > { %v890_v41 = vpop.permute.xlu0 %889  ;;  %v926_v57 = vld [vmem:[#allocation2 + $0x8] sm:$0xff] }
 0x551   : > { %892 = vst.msk [vmem:[#allocation2 + $0x11] sm:$0x1] %vm610_vm8, %v890_v41  ;;  %1195 = vrot.lane.b32.xlu0 %v1191_v46, %s4165_s26  ;;  %v999_v43 = vmul.f32 %v997_v60, %v926_v57  ;;  %v943_v50 = vmul.f32 %v941_v61, %v926_v57  ;;  %v955_v52 = vmul.f32 %v953_v0, %v926_v57  ;;  %s3342_s26 = sld [smem:[#allocation8 + $0x99]] }
 0x552   : > { %v979_v59 = vmul.f32 %v977_v2, %v926_v57  ;;  %v967_v41 = vmul.f32 %v965_v3, %v926_v57  ;;  %v931_v32 = vmul.f32 %v929_v4, %v926_v57  ;;  %v1019_v60 = vmul.f32 %v1017_v7, %v926_v57 }
 0x553   : > { %v1004_v46 = vadd.f32 %v1002_v25, %v999_v43  ;;  %v3312_v24 = vadd.f32 %v946_v18, %v943_v50  ;;  %v3314_v61 = vadd.f32 %v958_v15, %v955_v52  ;;  %v1209_v4 = vmul.f32 %v4182_v20, %v3068_v40 }
 0x554   : > { %v910_v0 = vpop.permute.xlu0 %909  ;;  %v3317_v56 = vld [vmem:[#allocation2 + $0x9] sm:$0xff]  ;;  %v3321_v2 = vadd.f32 %v982_v10, %v979_v59  ;;  %v3323_v57 = vadd.f32 %v970_v21, %v967_v41  ;;  %v3325_v3 = vadd.f32 %v934_v16, %v931_v32  ;;  %v1022_v7 = vmul.f32 %v1020_v44, %v928_v36 }
 0x555   : > { %912 = vst.msk [vmem:[#allocation2 + $0x12] sm:$0x1] %vm610_vm8, %v910_v0  ;;  %1255 = vrot.lane.b32.xlu0 %v1251_v54, %s4167_s13  ;;  %1009 = vrot.lane.b32.xlu1 %v1004_v46, %s4257_s28  ;;  %v4180_v18 = vstv %s3265_s2  ;;  %v1063_v32 = vmul.f32 %v1061_v9, %v3317_v56  ;;  %s4285_s13 = sld [smem:[#allocation26_spill]]  ;;  %v1066_v15 = vmul.f32 %v1064_v53, %v3310_v6  ;;  %v3362_v53 = vld [vmem:[#allocation2 + $0x22] sm:$0xff]  ;;  %v4179_v21 = vstv %s3279_s24 }
 0x556   : > { %4282 = vst [vmem:[#allocation65_spill] sm:$0xff] %v3325_v3  ;;  %v1143_v44 = vmul.f32 %v1141_v17, %v3317_v56  ;;  %v1146_v16 = vmul.f32 %v1144_v55, %v3310_v6  ;;  %v1211_v36 = vadd.f32 %v1209_v4, %v1206_v49  ;;  %v1024_v25 = vadd.f32 %v1022_v7, %v1019_v60 }
 0x557   : > { %4284 = sst [smem:[#allocation28_spill]] %s3342_s26  ;;  %v1266_v9 = vmul.f32 %v4181_v19, %v3079_v63  ;;  %v1083_v10 = vmul.f32 %v1081_v26, %v3317_v56  ;;  %v3367_v43 = vadd.f32 %v1066_v15, %v1063_v32  ;;  %v1269_v49 = vmul.f32 %v4180_v18, %v3068_v40 }
 0x558   : > { %v3365_v17 = vld [vmem:[#allocation2 + $0xa] sm:$0xff]  ;;  %v3369_v55 = vadd.f32 %v1146_v16, %v1143_v44  ;;  %v4178_v52 = vstv %s3296_s21  ;;  %v4290_v54 = vstv %s2978_s8  ;;  %v4292_v41 = vstv %s2910_s11  ;;  %s3398_s8 = sld [smem:[#allocation8 + $0x19]]  ;;  %s3413_s11 = sld [smem:[#allocation8 + $0x17]] }
 0x559   : > { %1215 = vrot.lane.b32.xlu0 %v1211_v36, %s4288_s27  ;;  %1029 = vrot.lane.b32.xlu1 %v1024_v25, %s4257_s28  ;;  %v1227_v59 = vmul.f32 %v4290_v54, %v3365_v17  ;;  %v1230_v46 = vmul.f32 %v4292_v41, %v3362_v53  ;;  %v4293_v60 = vstv %s2980_s19  ;;  %v4294_v4 = vstv %s4286_s0  ;;  %s4296_s19 = smov 126   ;;  %s4303_s0 = sld [smem:[#allocation47_spill]] }
 0x55a   : > { %v1307_v0 = vmul.f32 %v4293_v60, %v3365_v17  ;;  %v1310_v7 = vmul.f32 %v4294_v4, %v3362_v53  ;;  %v1271_v32 = vadd.f32 %v1269_v49, %v1266_v9  ;;  %v1330_v44 = vmul.f32 %v4179_v21, %v3125_v38 }
 0x55b   : > { %v4289_v26 = vstv %s4285_s13  ;;  %v4295_v16 = vstv %s4287_s1  ;;  %v4171_v25 = vstv %s3319_s17  ;;  %v1333_v9 = vmul.f32 %v4178_v52, %v3096_v13  ;;  %s3436_s13 = sld [smem:[#allocation8 + $0x97]]  ;;  %s4305_s1 = sld [smem:[#allocation48_spill]] }
 0x55c   : > { %v1086_v50 = vmul.f32 %v4289_v26, %v3310_v6  ;;  %v1043_v36 = vmul.f32 %v4295_v16, %v3317_v56  ;;  %v3401_v26 = vadd.f32 %v1230_v46, %v1227_v59  ;;  %v3403_v54 = vadd.f32 %v1310_v7, %v1307_v0 }
 0x55d   : > { %1275 = vrot.lane.b32.xlu0 %v1271_v32, %s4296_s19  ;;  %v4172_v59 = vstv %s3340_s10  ;;  %v4169_v41 = vstv %s3338_s7  ;;  %v4173_v46 = vstv %s3342_s26  ;;  %v1335_v60 = vadd.f32 %v1333_v9, %v1330_v44  ;;  %v3440_v9 = vld [vmem:[#allocation2 + $0x24] sm:$0xff]  ;;  %s4314_s26 = sld [smem:[#allocation53_spill]] }
 0x55e   : > { %v1088_v15 = vadd.f32 %v1086_v50, %v1083_v10  ;;  %v4297_v10 = vstv %s4291_s6  ;;  %v4170_v50 = vstv %s3336_s23  ;;  %v1286_v4 = vmul.f32 %v4171_v25, %v3079_v63  ;;  %v3438_v63 = vld [vmem:[#allocation2 + $0x23] sm:$0xff]  ;;  %s3462_s6 = sld [smem:[#allocation8 + $0x1a]] }
 0x55f   : > { %v1046_v49 = vmul.f32 %v4297_v10, %v3310_v6  ;;  %v4298_v7 = vstv %s3031_s16  ;;  %v4299_v44 = vstv %s2893_s25  ;;  %v3442_v10 = vld [vmem:[#allocation2 + $0x25] sm:$0xff]  ;;  %s4302_s25 = sld [smem:[#allocation46_spill]]  ;;  %v4185_v25 = vstv %s3398_s8  ;;  %s3498_s16 = sld [smem:[#allocation8 + $0x9a]] }
 0x560   : > { %1093 = vrot.lane.b32.xlu1 %v1088_v15, %s4261_s22  ;;  %v1103_v32 = vmul.f32 %v4298_v7, %v3317_v56  ;;  %v1289_v15 = vmul.f32 %v4170_v50, %v3068_v40  ;;  %v1106_v16 = vmul.f32 %v4299_v44, %v3310_v6  ;;  %v1350_v40 = vmul.f32 %v4172_v59, %v3125_v38  ;;  %v3460_v59 = vld [vmem:[#allocation2 + $0xb] sm:$0xff] }
 0x561   : > { %v1048_v0 = vadd.f32 %v1046_v49, %v1043_v36  ;;  %1339 = vrot.lane.b32.xlu0 %v1335_v60, %s4174_s12  ;;  %v1353_v36 = vmul.f32 %v4169_v41, %v3096_v13  ;;  %v1166_v49 = vmul.f32 %v1164_v48, %v3310_v6  ;;  %v1413_v60 = vmul.f32 %v4173_v46, %v3096_v13  ;;  %v3464_v48 = vld [vmem:[#allocation2 + $0xc] sm:$0xff]  ;;  %s4311_s12 = sld [smem:[#allocation57_spill]] }
 0x562   : > { %v1291_v7 = vadd.f32 %v1289_v15, %v1286_v4  ;;  %v1108_v44 = vadd.f32 %v1106_v16, %v1103_v32  ;;  %v4304_v41 = vstv %s3077_s5  ;;  %v3466_v46 = vld [vmem:[#allocation2 + $0xd] sm:$0xff]  ;;  %v4309_v4 = vstv %s2960_s4  ;;  %s4310_s5 = sld [smem:[#allocation52_spill]]  ;;  %s4318_s4 = sld [smem:[#allocation50_spill]] }
 0x563   : > { %v1163_v50 = vmul.f32 %v4304_v41, %v3317_v56  ;;  %v1526_v32 = vmul.f32 %v4309_v4, %v3440_v9  ;;  %v1610_v41 = vmul.f32 %v1608_v33, %v3442_v10  ;;  %v4312_v15 = vstv %s4301_s9  ;;  %s3512_s9 = sld [smem:[#allocation8 + $0x1b]] }
 0x564   : > { %1053 = vrot.lane.b32.xlu1 %v1048_v0, %s4263_s14  ;;  %v1126_v0 = vmul.f32 %v1124_v37, %v3310_v6  ;;  %v4308_v6 = vstv %s2952_s15  ;;  %s4313_s14 = sld [smem:[#allocation58_spill]]  ;;  %v1690_v16 = vmul.f32 %v4312_v15, %v3442_v10  ;;  %s4316_s15 = sld [smem:[#allocation54_spill]]  ;;  %v4317_v4 = vstv %s4303_s0 }
 0x565   : > { %v1394_v37 = vmul.f32 %v4308_v6, %v3438_v63  ;;  %1295 = vrot.lane.b32.xlu0 %v1291_v7, %s4296_s19  ;;  %v4315_v6 = vstv %s4302_s25  ;;  %v1502_v18 = vmul.f32 %v4317_v4, %v3440_v9  ;;  %v4319_v33 = vstv %s4305_s1  ;;  %s4326_s25 = sld [smem:[#allocation60_spill]]  ;;  %s4328_s0 = sld [smem:[#allocation55_spill]] }
 0x566   : > { %v1490_v21 = vmul.f32 %v4315_v6, %v3440_v9  ;;  %v1514_v19 = vmul.f32 %v4319_v33, %v3440_v9  ;;  %v1355_v20 = vadd.f32 %v1353_v36, %v1350_v40  ;;  %v1410_v7 = vmul.f32 %v4185_v25, %v3125_v38  ;;  %s4330_s1 = sld [smem:[#allocation56_spill]] }
 0x567   : > { %v4321_v52 = vstv %s4307_s20  ;;  %v1168_v62 = vadd.f32 %v1166_v49, %v1163_v50  ;;  %v4323_v33 = vstv %s4311_s12  ;;  %s4331_s12 = smov 1   ;;  %s4338_s20 = sld [smem:[#allocation62_spill]] }
 0x568   : > { %1113 = vrot.lane.b32.xlu1 %v1108_v44, %s4261_s22  ;;  %v4320_v44 = vstv %s4306_s30  ;;  %v1391_v6 = vmul.f32 %v4321_v52, %v3460_v59  ;;  %v4322_v3 = vstv %s4310_s5  ;;  %v1607_v36 = vmul.f32 %v4323_v33, %v3466_v46  ;;  %s3537_s30 = sld [smem:[#allocation8 + $0x9b]]  ;;  %s3556_s5 = sld [smem:[#allocation8 + $0x21]] }
 0x569   : > { %v1123_v15 = vmul.f32 %v4320_v44, %v3317_v56  ;;  %v1523_v4 = vmul.f32 %v4322_v3, %v3464_v48  ;;  %v4325_v56 = vstv %s4314_s26  ;;  %v4329_v3 = vstv %s4318_s4  ;;  %1359 = vrot.lane.b32.xlu0 %v1355_v20, %s4331_s12  ;;  %s4333_s26 = sld [smem:[#allocation61_spill]]  ;;  %s4339_s4 = sld [smem:[#allocation63_spill]] }
 0x56a   : > { %v4324_v40 = vstv %s4313_s14  ;;  %v3514_v25 = vadd.f32 %v1394_v37, %v1391_v6  ;;  %v1487_v44 = vmul.f32 %v4325_v56, %v3464_v48  ;;  %v4327_v52 = vstv %s4316_s15  ;;  %s4332_s14 = smov 123   ;;  %s4189_s15 = smov 125  }
 0x56b   : > { %v1687_v45 = vmul.f32 %v4324_v40, %v3466_v46  ;;  %v1499_v50 = vmul.f32 %v4327_v52, %v3464_v48  ;;  %v1478_v49 = vmul.f32 %v4329_v3, %v3440_v9  ;;  %v1372_v37 = vstv %s3436_s13  ;;  %s3752_s13 = sld [smem:[#allocation8 + $0xab]] }
 0x56c   : > { %1173 = vrot.lane.b32.xlu1 %v1168_v62, %s4332_s14  ;;  %v3528_v6 = vadd.f32 %v1526_v32, %v1523_v4  ;;  %v3530_v33 = vadd.f32 %v1610_v41, %v1607_v36  ;;  %v1415_v56 = vadd.f32 %v1413_v60, %v1410_v7  ;;  %v4334_v52 = vstv %s3413_s11 }
 0x56d   : > { %v3532_v40 = vadd.f32 %v1690_v16, %v1687_v45  ;;  %v1370_v29 = vmul.f32 %v4334_v52, %v3125_v38  ;;  %v3539_v3 = vadd.f32 %v1490_v21, %v1487_v44  ;;  %v3541_v20 = vadd.f32 %v1502_v18, %v1499_v50 }
 0x56e   : > { %v1128_v62 = vadd.f32 %v1126_v0, %v1123_v15  ;;  %v4335_v32 = vstv %s4326_s25  ;;  %v4336_v41 = vstv %s4328_s0  ;;  %v4337_v60 = vstv %s4330_s1  ;;  %1419 = vrot.lane.b32.xlu0 %v1415_v56, %s4189_s15  ;;  %s3568_s25 = sld [smem:[#allocation8 + $0xa1]]  ;;  %s3577_s0 = sld [smem:[#allocation8 + $0x22]] }
 0x56f   : > { %v1187_v4 = vmul.f32 %v4335_v32, %v3365_v17  ;;  %v1511_v45 = vmul.f32 %v4336_v41, %v3464_v48  ;;  %v1475_v16 = vmul.f32 %v4337_v60, %v3464_v48  ;;  %v1373_v7 = vmul.f32 %v1372_v37, %v3096_v13  ;;  %s3588_s1 = sld [smem:[#allocation8 + $0xa2]] }
 0x570   : > { %v1429_v21 = vstv %s3462_s6  ;;  %1133 = vrot.lane.b32.xlu1 %v1128_v62, %s4261_s22  ;;  %v4340_v18 = vstv %s4333_s26  ;;  %v1432_v44 = vstv %s3498_s16  ;;  %s3597_s26 = sld [smem:[#allocation8 + $0x25]]  ;;  %s3761_s6 = sld [smem:[#allocation8 + $0x2e]] }
 0x571   : > { %v1190_v0 = vmul.f32 %v4340_v18, %v3362_v53  ;;  %v3563_v15 = vadd.f32 %v1514_v19, %v1511_v45  ;;  %v3565_v36 = vadd.f32 %v1478_v49, %v1475_v16  ;;  %v1375_v50 = vadd.f32 %v1373_v7, %v1370_v29  ;;  %s3772_s16 = sld [smem:[#allocation8 + $0xae]] }
 0x572   : > { %v1430_v56 = vmul.f32 %v1429_v21, %v3125_v38  ;;  %v4341_v62 = vstv %s4338_s20  ;;  %v1449_v41 = vstv %s3512_s9  ;;  %v1433_v29 = vmul.f32 %v1432_v44, %v3096_v13  ;;  %s3617_s20 = sld [smem:[#allocation8 + $0x23]]  ;;  %s3781_s9 = sld [smem:[#allocation8 + $0x2f]] }
 0x573   : > { %v1192_v52 = vadd.f32 %v1190_v0, %v1187_v4  ;;  %v1247_v32 = vmul.f32 %v4341_v62, %v3365_v17  ;;  %1379 = vrot.lane.b32.xlu0 %v1375_v50, %s4331_s12  ;;  %v4342_v19 = vstv %s4339_s4  ;;  %v1452_v4 = vstv %s3537_s30  ;;  %s3697_s4 = sld [smem:[#allocation8 + $0x2a]]  ;;  %s4362_s30 = smov 3  }
 0x574   : > { %v1250_v49 = vmul.f32 %v4342_v19, %v3362_v53  ;;  %v1435_v45 = vadd.f32 %v1433_v29, %v1430_v56  ;;  %v1450_v16 = vmul.f32 %v1449_v41, %v3125_v38  ;;  %v4343_v7 = vstv %s3225_s29  ;;  %s3608_s29 = sld [smem:[#allocation8 + $0xa5]] }
 0x575   : > { %1197 = vrot.lane.b32.xlu1 %v1192_v52, %s4288_s27  ;;  %v1207_v18 = vmul.f32 %v4343_v7, %v3365_v17  ;;  %v1541_v0 = vstv %s3556_s5  ;;  %v1453_v50 = vmul.f32 %v1452_v4, %v3096_v13  ;;  %v4344_v52 = vstv %s3223_s18  ;;  %s3637_s18 = sld [smem:[#allocation8 + $0x26]]  ;;  %s2589_s5 = smov 122  }
 0x576   : > { %v1252_v60 = vadd.f32 %v1250_v49, %v1247_v32  ;;  %v1210_v56 = vmul.f32 %v4344_v52, %v3362_v53  ;;  %v1544_v38 = vstv %s3568_s25  ;;  %v1542_v29 = vmul.f32 %v1541_v0, %v3161_v30  ;;  %s3911_s25 = sld [smem:[#allocation8 + $0xac]] }
 0x577   : > { %1439 = vrot.lane.b32.xlu0 %v1435_v45, %s4189_s15  ;;  %v1455_v62 = vadd.f32 %v1453_v50, %v1450_v16  ;;  %v4345_v19 = vstv %s3258_s3  ;;  %v1561_v45 = vstv %s3577_s0  ;;  %v1545_v13 = vmul.f32 %v1544_v38, %v3098_v14  ;;  %s3628_s3 = sld [smem:[#allocation8 + $0xa3]]  ;;  %s3916_s0 = sld [smem:[#allocation8 + $0x30]] }
 0x578   : > { %v1212_v32 = vadd.f32 %v1210_v56, %v1207_v18  ;;  %v1267_v49 = vmul.f32 %v4345_v19, %v3365_v17  ;;  %v1564_v7 = vstv %s3588_s1  ;;  %v1562_v52 = vmul.f32 %v1561_v45, %v3161_v30  ;;  %s2595_s1 = smov 80  }
 0x579   : > { %1257 = vrot.lane.b32.xlu1 %v1252_v60, %s4296_s19  ;;  %v4346_v60 = vstv %s3265_s2  ;;  %v1547_v18 = vadd.f32 %v1545_v13, %v1542_v29  ;;  %v4347_v56 = vstv %s3279_s24  ;;  %v1565_v29 = vmul.f32 %v1564_v7, %v3098_v14  ;;  %s3648_s2 = sld [smem:[#allocation8 + $0xa6]]  ;;  %s3657_s24 = sld [smem:[#allocation8 + $0x29]] }
 0x57a   : > { %v1270_v16 = vmul.f32 %v4346_v60, %v3362_v53  ;;  %v4348_v19 = vstv %s3296_s21  ;;  %v1628_v30 = vstv %s3608_s29  ;;  %s3668_s21 = sld [smem:[#allocation8 + $0xa9]]  ;;  %s2597_s29 = smov 112  }
 0x57b   : > { %1459 = vrot.lane.b32.xlu0 %v1455_v62, %s4189_s15  ;;  %v1331_v62 = vmul.f32 %v4347_v56, %v3460_v59  ;;  %v1567_v13 = vadd.f32 %v1565_v29, %v1562_v52  ;;  %v4186_v56 = vstv %s3617_s20  ;;  %v1629_v14 = vmul.f32 %v1628_v30, %v3200_v34  ;;  %s3717_s15 = sld [smem:[#allocation8 + $0x2d]] }
 0x57c   : > { %v1272_v50 = vadd.f32 %v1270_v16, %v1267_v49  ;;  %v1334_v49 = vmul.f32 %v4348_v19, %v3438_v63  ;;  %v4350_v52 = vstv %s3336_s23  ;;  %s4352_s23 = sld [smem:[#allocation28_spill]] }
 0x57d   : > { %1217 = vrot.lane.b32.xlu1 %v1212_v32, %s4288_s27  ;;  %v1625_v32 = vstv %s3597_s26  ;;  %v4188_v29 = vstv %s3628_s3  ;;  %s2596_s26 = smov 96  }
 0x57e   : > { %v1336_v60 = vadd.f32 %v1334_v49, %v1331_v62  ;;  %v1626_v16 = vmul.f32 %v1625_v32, %v3209_v31  ;;  %v1290_v62 = vmul.f32 %v4350_v52, %v3362_v53  ;;  %v1586_v49 = vmul.f32 %v4186_v56, %v3209_v31 }
 0x57f   : > { %1551 = vrot.lane.b32.xlu0 %v1547_v18, %s4257_s28  ;;  %v4349_v18 = vstv %s3319_s17  ;;  %s3677_s17 = sld [smem:[#allocation8 + $0x27]]  ;;  %v1589_v53 = vmul.f32 %v4188_v29, %v3200_v34  ;;  %v1705_v56 = vstv %s3657_s24  ;;  %s4370_s24 = sld [smem:[#allocation22_spill]] }
 0x581   : > { %1277 = vrot.lane.b32.xlu1 %v1272_v50, %s4296_s19  ;;  %v1287_v50 = vmul.f32 %v4349_v18, %v3365_v17  ;;  %v1631_v17 = vadd.f32 %v1629_v14, %v1626_v16  ;;  %v4187_v18 = vstv %s3637_s18  ;;  %v4353_v16 = vstv %s3338_s7  ;;  %s4355_s7 = smov 3  }
 0x582   : > { %v1648_v14 = vstv %s3648_s2  ;;  %v1591_v52 = vadd.f32 %v1589_v53, %v1586_v49 }
 0x583   : > { %1571 = vrot.lane.b32.xlu0 %v1567_v13, %s4257_s28  ;;  %v1292_v19 = vadd.f32 %v1290_v62, %v1287_v50  ;;  %v4351_v13 = vstv %s3340_s10  ;;  %v1354_v50 = vmul.f32 %v4353_v16, %v3438_v63  ;;  %s3688_s10 = sld [smem:[#allocation8 + $0xa7]]  ;;  %v1649_v49 = vmul.f32 %v1648_v14, %v3200_v34 }
 0x584   : > { %v4191_v16 = vstv %s3668_s21 }
 0x585   : > { %1341 = vrot.lane.b32.xlu1 %v1336_v60, %s4331_s12  ;;  %v1351_v60 = vmul.f32 %v4351_v13, %v3460_v59  ;;  %v4354_v13 = vstv %s3398_s8  ;;  %s3708_s8 = sld [smem:[#allocation8 + $0xaa]]  ;;  %v1665_v29 = vstv %s3677_s17 }
 0x587   : > { %1635 = vrot.lane.b32.xlu0 %v1631_v17, %s4261_s22  ;;  %v1356_v62 = vadd.f32 %v1354_v50, %v1351_v60  ;;  %v1646_v17 = vmul.f32 %v4187_v18, %v3209_v31  ;;  %v4356_v60 = vstv %s4352_s23  ;;  %v4357_v18 = vstv %s3413_s11  ;;  %s4358_s23 = smov 125   ;;  %s3739_s11 = sld [smem:[#allocation8 + $0x2b]] }
 0x588   : > { %v1414_v53 = vmul.f32 %v4356_v60, %v3438_v63 }
 0x589   : > { %1297 = vrot.lane.b32.xlu1 %v1292_v19, %s4296_s19  ;;  %v1411_v19 = vmul.f32 %v4354_v13, %v3460_v59  ;;  %v1651_v50 = vadd.f32 %v1649_v49, %v1646_v17  ;;  %v1709_v17 = vmul.f32 %v4191_v16, %v3200_v34  ;;  %v1668_v49 = vstv %s3688_s10 }
 0x58a   : > { %v1729_v16 = vstv %s3697_s4  ;;  %s4372_s4 = sld [smem:[#allocation70_spill]] }
 0x58b   : > { %1595 = vrot.lane.b32.xlu0 %v1591_v52, %s4355_s7  ;;  %v1416_v13 = vadd.f32 %v1414_v53, %v1411_v19  ;;  %v1706_v52 = vmul.f32 %v1705_v56, %v3209_v31  ;;  %v1374_v19 = vmul.f32 %v1372_v37, %v3438_v63  ;;  %s3728_s7 = sld [smem:[#allocation8 + $0xad]]  ;;  %v1666_v53 = vmul.f32 %v1665_v29, %v3209_v31 }
 0x58c   : > { %v1669_v37 = vmul.f32 %v1668_v49, %v3200_v34  ;;  %v1434_v31 = vmul.f32 %v1432_v44, %v3438_v63  ;;  %v1789_v34 = vstv %s3717_s15  ;;  %s3903_s15 = sld [smem:[#allocation8 + $0x2c]] }
 0x58d   : > { %1361 = vrot.lane.b32.xlu1 %v1356_v62, %s4331_s12  ;;  %v1371_v62 = vmul.f32 %v4357_v18, %v3460_v59  ;;  %v1711_v18 = vadd.f32 %v1709_v17, %v1706_v52  ;;  %v3749_v52 = vld [vmem:[#allocation2 + $0x1e] sm:$0xff] }
 0x58f   : > { %1655 = vrot.lane.b32.xlu0 %v1651_v50, %s4261_s22  ;;  %v1376_v60 = vadd.f32 %v1374_v19, %v1371_v62  ;;  %v1431_v50 = vmul.f32 %v1429_v21, %v3460_v59  ;;  %v1732_v21 = vstv %s3708_s8  ;;  %v1671_v62 = vadd.f32 %v1669_v37, %v1666_v53  ;;  %s2052_s8 = scalar_lea.sflag [#allocation6], %s4370_s24 }
 0x590   : > { %v1733_v44 = vmul.f32 %v1732_v21, %v3749_v52  ;;  %v1543_v37 = vmul.f32 %v1541_v0, %v3464_v48 }
 0x591   : > { %1421 = vrot.lane.b32.xlu1 %v1416_v13, %s4358_s23  ;;  %v3736_v13 = vld [vmem:[#allocation2 + $0x6] sm:$0xff]  ;;  %v1436_v17 = vadd.f32 %v1434_v31, %v1431_v50  ;;  %v1792_v53 = vstv %s3728_s7  ;;  %v1749_v31 = vstv %s3739_s11  ;;  %s2598_s11 = smov [#allocation9]  }
 0x592   : > { %v1730_v19 = vmul.f32 %v1729_v16, %v3736_v13  ;;  %v1790_v50 = vmul.f32 %v1789_v34, %v3736_v13 }
 0x593   : > { %1715 = vrot.lane.b32.xlu0 %v1711_v18, %s4332_s14  ;;  %v1451_v18 = vmul.f32 %v1449_v41, %v3460_v59 }
 0x594   : > { %v1735_v59 = vadd.f32 %v1733_v44, %v1730_v19  ;;  %v1750_v19 = vmul.f32 %v1749_v31, %v3736_v13  ;;  %v1809_v44 = vstv %s3761_s6 }
 0x595   : > { %1381 = vrot.lane.b32.xlu1 %v1376_v60, %s4331_s12  ;;  %v1454_v60 = vmul.f32 %v1452_v4, %v3438_v63  ;;  %v1793_v63 = vmul.f32 %v1792_v53, %v3749_v52  ;;  %v1546_v4 = vmul.f32 %v1544_v38, %v3440_v9  ;;  %s3792_s12 = sld [smem:[#allocation8 + $0xaf]] }
 0x597   : > { %1675 = vrot.lane.b32.xlu0 %v1671_v62, %s4261_s22  ;;  %v1456_v41 = vadd.f32 %v1454_v60, %v1451_v18  ;;  %v1752_v62 = vstv %s3752_s13  ;;  %v1795_v0 = vadd.f32 %v1793_v63, %v1790_v50  ;;  %v1563_v18 = vmul.f32 %v1561_v45, %v3464_v48  ;;  %s2496_s13 = sshll.u32 %s2598_s11, 4  ;;  %s2497_s13 = int_to_ptr.vmem [resolvable:$false] %s2496_s13 }
 0x598   : > { %v1753_v38 = vmul.f32 %v1752_v62, %v3749_v52  ;;  %v1566_v60 = vmul.f32 %v1564_v7, %v3440_v9  ;;  %v1810_v48 = vmul.f32 %v1809_v44, %v3736_v13  ;;  %v1627_v45 = vmul.f32 %v1625_v32, %v3466_v46  ;;  %s2498_s6 = scalar_lea.vmem %s2497_s13, 1024 }
 0x599   : > { %1441 = vrot.lane.b32.xlu1 %v1436_v17, %s4358_s23  ;;  %v1548_v17 = vadd.f32 %v1546_v4, %v1543_v37  ;;  %v1829_v37 = vstv %s3781_s9  ;;  %v1630_v7 = vmul.f32 %v1628_v30, %v3442_v10  ;;  %v4360_v30 = vstv %s3628_s3  ;;  %s4369_s3 = sld [smem:[#allocation23_spill]] }
 0x59a   : > { %v1568_v50 = vadd.f32 %v1566_v60, %v1563_v18  ;;  %v1830_v32 = vmul.f32 %v1829_v37, %v3736_v13 }
 0x59b   : > { %1739 = vrot.lane.b32.xlu0 %v1735_v59, %s4288_s27  ;;  %v1812_v59 = vstv %s3772_s16  ;;  %v1832_v63 = vstv %s3792_s12 }
 0x59c   : > { %v1813_v9 = vmul.f32 %v1812_v59, %v3749_v52  ;;  %v1833_v18 = vmul.f32 %v1832_v63, %v3749_v52 }
 0x59d   : > { %1461 = vrot.lane.b32.xlu1 %v1456_v41, %s4358_s23  ;;  %v1755_v41 = vadd.f32 %v1753_v38, %v1750_v19  ;;  %v1590_v38 = vmul.f32 %v4360_v30, %v3442_v10 }
 0x59e   : > { %v1815_v4 = vadd.f32 %v1813_v9, %v1810_v48  ;;  %v4361_v48 = vstv %s3637_s18  ;;  %v1650_v9 = vmul.f32 %v1648_v14, %v3442_v10  ;;  %v1667_v14 = vmul.f32 %v1665_v29, %v3466_v46 }
 0x59f   : > { %1799 = vrot.lane.b32.xlu0 %v1795_v0, %s4296_s19  ;;  %v1632_v0 = vadd.f32 %v1630_v7, %v1627_v45  ;;  %v1647_v45 = vmul.f32 %v4361_v48, %v3466_v46  ;;  %s2065_s2 = sshll.u32 %s4369_s3, 4  ;;  %s4016_s2 = int_to_ptr.vmem [resolvable:$true] %s2065_s2 }
 0x5a0   : > { %p2499_p10 = scmp.lt.s32.totalorder %s4016_s2, %s2497_s13 }
 0x5a1   : > { %1553 = vrot.lane.b32.xlu1 %v1548_v17, %s4257_s28  ;;  %v4359_v17 = vstv %s3617_s20  ;;  %s4368_s20 = sld [smem:[#allocation17_spill]] }
 0x5a2   : > { %v1587_v19 = vmul.f32 %v4359_v17, %v3466_v46 }
 0x5a3   : > { %1759 = vrot.lane.b32.xlu0 %v1755_v41, %s4288_s27  ;;  %v1835_v41 = vadd.f32 %v1833_v18, %v1830_v32  ;;  %v4363_v32 = vstv %s3668_s21  ;;  %s4371_s21 = sld [smem:[#allocation20_spill]] }
 0x5a4   : > { %v1710_v17 = vmul.f32 %v4363_v32, %v3442_v10  ;;  %v1769_v32 = vstv %s3903_s15 }
 0x5a5   : > { %1573 = vrot.lane.b32.xlu1 %v1568_v50, %s4257_s28  ;;  %v1592_v50 = vadd.f32 %v1590_v38, %v1587_v19  ;;  %v3861_v38 = vld [vmem:[#allocation2 + $0xe] sm:$0xff] }
 0x5a6   : > { %v1791_v48 = vmul.f32 %v1789_v34, %v3861_v38  ;;  %v1811_v34 = vmul.f32 %v1809_v44, %v3861_v38 }
 0x5a7   : > { %1819 = vrot.lane.b32.xlu0 %v1815_v4, %s4296_s19  ;;  %v1008_v60 = vpop.permute.xlu0 %1007  ;;  %v1652_v4 = vadd.f32 %v1650_v9, %v1647_v45  ;;  %s2313_s18 = sshll.u32 %s4368_s20, 9 }
 0x5a8   : > { %v1013_v19 = vadd.f32 %v1008_v60, %v3020_v22  ;;  %v3869_v22 = vld [vmem:[#allocation2 + $0x26] sm:$0xff]  ;;  %s4014_s7 = scalar_lea.hbm %s4372_s4, %s2313_s18 }
 0x5a9   : > { %1637 = vrot.lane.b32.xlu1 %v1632_v0, %s4261_s22  ;;  %v1707_v0 = vmul.f32 %v1705_v56, %v3466_v46  ;;  %v1731_v46 = vmul.f32 %v1729_v16, %v3861_v38  ;;  %p4373_p12 = scmp.ne.s32.totalorder %s4371_s21, 0 }
 0x5ab   : > { %1839 = vrot.lane.b32.xlu0 %v1835_v41, %s4296_s19  ;;  %v1028_v7 = vpop.permute.xlu0 %1027  ;;  %v1712_v30 = vadd.f32 %v1710_v17, %v1707_v0  ;;  %v1772_v17 = vstv %s3911_s25 }
 0x5ad   : > { %1597 = vrot.lane.b32.xlu1 %v1592_v50, %s4362_s30 }
 0x5af   : > { %987 = vrot.lane.b32.xlu0 %v3033_v27, %s4257_s28  ;;  %v1092_v18 = vpop.permute.xlu0 %1091  ;;  %v1670_v27 = vmul.f32 %v1668_v49, %v3442_v10  ;;  %v1033_v10 = vadd.f32 %v1028_v7, %v3022_v23  ;;  %v1751_v23 = vmul.f32 %v1749_v31, %v3861_v38  ;;  %v1814_v31 = vmul.f32 %v1812_v59, %v3869_v22 }
 0x5b0   : > { %v1097_v56 = vadd.f32 %v1092_v18, %v1013_v19  ;;  %v1834_v59 = vmul.f32 %v1832_v63, %v3869_v22  ;;  %v1770_v18 = vmul.f32 %v1769_v32, %v3736_v13 }
 0x5b1   : > { %1657 = vrot.lane.b32.xlu1 %v1652_v4, %s4261_s22  ;;  %v1672_v41 = vadd.f32 %v1670_v27, %v1667_v14  ;;  %v1816_v44 = vadd.f32 %v1814_v31, %v1811_v34  ;;  %v1773_v14 = vmul.f32 %v1772_v17, %v3749_v52 }
 0x5b3   : > { %1071 = vrot.lane.b32.xlu0 %v3081_v1, %s4261_s22  ;;  %v1052_v60 = vpop.permute.xlu0 %1051  ;;  %v1734_v1 = vmul.f32 %v1732_v21, %v3869_v22 }
 0x5b4   : > { %v1057_v29 = vadd.f32 %v1052_v60, %v3035_v28  ;;  %v1794_v28 = vmul.f32 %v1792_v53, %v3869_v22 }
 0x5b5   : > { %1717 = vrot.lane.b32.xlu1 %v1712_v30, %s4332_s14  ;;  %v1736_v50 = vadd.f32 %v1734_v1, %v1731_v46  ;;  %v1849_v30 = vstv %s3916_s0 }
 0x5b6   : > { %v1796_v21 = vadd.f32 %v1794_v28, %v1791_v48  ;;  %v1850_v46 = vmul.f32 %v1849_v30, %v3736_v13 }
 0x5b7   : > { %1151 = vrot.lane.b32.xlu0 %v3083_v5, %s4332_s14  ;;  %v1112_v49 = vpop.permute.xlu0 %1111 }
 0x5b8   : > { %v1117_v16 = vadd.f32 %v1112_v49, %v1033_v10 }
 0x5b9   : > { %1677 = vrot.lane.b32.xlu1 %v1672_v41, %s4261_s22  ;;  %v1775_v41 = vadd.f32 %v1773_v14, %v1770_v18 }
 0x5bb   : > { %1235 = vrot.lane.b32.xlu0 %v3127_v39, %s4296_s19  ;;  %v1172_v5 = vpop.permute.xlu0 %1171  ;;  %v1754_v39 = vmul.f32 %v1752_v62, %v3869_v22 }
 0x5bc   : > { %v1177_v45 = vadd.f32 %v1172_v5, %v1097_v56 }
 0x5bd   : > { %1741 = vrot.lane.b32.xlu1 %v1736_v50, %s4288_s27  ;;  %v1756_v9 = vadd.f32 %v1754_v39, %v1751_v23 }
 0x5bf   : > { %1315 = vrot.lane.b32.xlu0 %v3129_v51, %s2589_s5  ;;  %v1132_v53 = vpop.permute.xlu0 %1131  ;;  %v1831_v51 = vmul.f32 %v1829_v37, %v3861_v38 }
 0x5c0   : > { %v1137_v7 = vadd.f32 %v1132_v53, %v1057_v29 }
 0x5c1   : > { %1801 = vrot.lane.b32.xlu1 %v1796_v21, %s4296_s19  ;;  %v1836_v37 = vadd.f32 %v1834_v59, %v1831_v51 }
 0x5c3   : > { %1399 = vrot.lane.b32.xlu0 %v3163_v42, %s4358_s23  ;;  %v1196_v62 = vpop.permute.xlu0 %1195 }
 0x5c4   : > { %v1201_v4 = vadd.f32 %v1196_v62, %v1117_v16 }
 0x5c5   : > { %1761 = vrot.lane.b32.xlu1 %v1756_v9, %s4288_s27  ;;  %s3924_s27 = sld [smem:[#allocation8 + $0xb0]] }
 0x5c7   : > { %1531 = vrot.lane.b32.xlu0 %v3202_v12, %s4257_s28  ;;  %v1010_v42 = vpop.permute.xlu1 %1009  ;;  %v1256_v0 = vpop.permute.xlu0 %1255 }
 0x5c8   : > { %v1014_v56 = vadd.f32 %v1010_v42, %v3312_v24  ;;  %v1261_v16 = vadd.f32 %v1256_v0, %v1177_v45 }
 0x5c9   : > { %1821 = vrot.lane.b32.xlu1 %v1816_v44, %s4296_s19  ;;  %v1771_v44 = vmul.f32 %v1769_v32, %v3861_v38 }
 0x5cb   : > { %1615 = vrot.lane.b32.xlu0 %v3243_v47, %s4261_s22  ;;  %v1030_v19 = vpop.permute.xlu1 %1029  ;;  %v1216_v63 = vpop.permute.xlu0 %1215  ;;  %v1852_v47 = vstv %s3924_s27 }
 0x5cc   : > { %v1221_v12 = vadd.f32 %v1216_v63, %v1137_v7  ;;  %v1034_v24 = vadd.f32 %v1030_v19, %v3314_v61 }
 0x5cd   : > { %1841 = vrot.lane.b32.xlu1 %v1836_v37, %s4296_s19 }
 0x5cf   : > { %1695 = vrot.lane.b32.xlu0 %v3245_v58, %s4332_s14  ;;  %v1276_v60 = vpop.permute.xlu0 %1275  ;;  %v1853_v58 = vmul.f32 %v1852_v47, %v3749_v52 }
 0x5d1   : > { %989 = vrot.lane.b32.xlu1 %v3321_v2, %s4257_s28  ;;  %v1855_v10 = vadd.f32 %v1853_v58, %v1850_v46 }
 0x5d2   : > { %v1094_v27 = vpop.permute.xlu1 %1093 }
 0x5d3   : > { %v1098_v29 = vadd.f32 %v1094_v27, %v1014_v56  ;;  %1779 = vrot.lane.b32.xlu0 %v1775_v41, %s4296_s19  ;;  %v1340_v2 = vpop.permute.xlu0 %1339 }
 0x5d5   : > { %1073 = vrot.lane.b32.xlu1 %v3367_v43, %s4261_s22 }
 0x5d6   : > { %v1054_v1 = vpop.permute.xlu1 %1053 }
 0x5d7   : > { %v1058_v49 = vadd.f32 %v1054_v1, %v3323_v57  ;;  %1859 = vrot.lane.b32.xlu0 %v1855_v10, %s2589_s5  ;;  %v1296_v50 = vpop.permute.xlu0 %1295  ;;  %v1345_v57 = vadd.f32 %v1340_v2, %v1261_v16 }
 0x5d8   : > { %v1301_v7 = vadd.f32 %v1296_v50, %v1221_v12 }
 0x5d9   : > { %1153 = vrot.lane.b32.xlu1 %v3369_v55, %s4332_s14 }
 0x5da   : > { %v1114_v13 = vpop.permute.xlu1 %1113 }
 0x5db   : > { %v1118_v48 = vadd.f32 %v1114_v13, %v1034_v24  ;;  %v1360_v52 = vpop.permute.xlu0 %1359 }
 0x5dd   : > { %1237 = vrot.lane.b32.xlu1 %v3401_v26, %s4296_s19  ;;  %v1281_v26 = vadd.f32 %v1276_v60, %v1201_v4 }
 0x5de   : > { %v1174_v43 = vpop.permute.xlu1 %1173 }
 0x5df   : > { %v1178_v28 = vadd.f32 %v1174_v43, %v1098_v29  ;;  %v1365_v45 = vadd.f32 %v1360_v52, %v1281_v26 }
 0x5e0   : > { %v1420_v21 = vpop.permute.xlu0 %1419 }
 0x5e1   : > { %1317 = vrot.lane.b32.xlu1 %v3403_v54, %s2589_s5  ;;  %v1425_v55 = vadd.f32 %v1420_v21, %v1345_v57 }
 0x5e2   : > { %v1134_v5 = vpop.permute.xlu1 %1133 }
 0x5e3   : > { %v1138_v23 = vadd.f32 %v1134_v5, %v1058_v49  ;;  %v1493_v61 = vadd.f32 %v3204_v35, %v1425_v55 }
 0x5e5   : > { %1401 = vrot.lane.b32.xlu1 %v3514_v25, %s4358_s23  ;;  %v1380_v34 = vpop.permute.xlu0 %1379 }
 0x5e6   : > { %v1385_v51 = vadd.f32 %v1380_v34, %v1301_v7 }
 0x5e7   : > { %v1198_v39 = vpop.permute.xlu1 %1197 }
 0x5e8   : > { %v1202_v53 = vadd.f32 %v1198_v39, %v1118_v48 }
 0x5e9   : > { %1533 = vrot.lane.b32.xlu1 %v3528_v6, %s4257_s28  ;;  %v1440_v54 = vpop.permute.xlu0 %1439  ;;  %v1774_v6 = vmul.f32 %v1772_v17, %v3869_v22  ;;  %s2591_s28 = smov 16  }
 0x5ea   : > { %v1445_v31 = vadd.f32 %v1440_v54, %v1365_v45 }
 0x5eb   : > { %v1258_v9 = vpop.permute.xlu1 %1257  ;;  %v1776_v19 = vadd.f32 %v1774_v6, %v1771_v44 }
 0x5ec   : > { %v1505_v25 = vadd.f32 %v3211_v8, %v1445_v31  ;;  %v1854_v8 = vmul.f32 %v1852_v47, %v3869_v22  ;;  %v1262_v56 = vadd.f32 %v1258_v9, %v1178_v28 }
 0x5ed   : > { %1617 = vrot.lane.b32.xlu1 %v3530_v33, %s4261_s22  ;;  %v1460_v35 = vpop.permute.xlu0 %1459  ;;  %v1851_v33 = vmul.f32 %v1849_v30, %v3861_v38 }
 0x5ee   : > { %v1465_v59 = vadd.f32 %v1460_v35, %v1385_v51 }
 0x5ef   : > { %v1218_v62 = vpop.permute.xlu1 %1217  ;;  %v1856_v18 = vadd.f32 %v1854_v8, %v1851_v33 }
 0x5f0   : > { %v1222_v4 = vadd.f32 %v1218_v62, %v1138_v23  ;;  %v1517_v42 = vadd.f32 %v3213_v11, %v1465_v59 }
 0x5f1   : > { %1697 = vrot.lane.b32.xlu1 %v3532_v40, %s4332_s14  ;;  %v1552_v37 = vpop.permute.xlu0 %1551  ;;  %s2594_s14 = smov 48  }
 0x5f2   : > { %v1557_v10 = vadd.f32 %v1552_v37, %v1493_v61 }
 0x5f3   : > { %v1278_v0 = vpop.permute.xlu1 %1277 }
 0x5f4   : > { %v1282_v29 = vadd.f32 %v1278_v0, %v1202_v53 }
 0x5f5   : > { %1781 = vrot.lane.b32.xlu1 %v1776_v19, %s4296_s19  ;;  %v1572_v32 = vpop.permute.xlu0 %1571 }
 0x5f6   : > { %v1577_v5 = vadd.f32 %v1572_v32, %v1505_v25 }
 0x5f7   : > { %v1342_v63 = vpop.permute.xlu1 %1341 }
 0x5f8   : > { %v1346_v11 = vadd.f32 %v1342_v63, %v1262_v56 }
 0x5f9   : > { %1861 = vrot.lane.b32.xlu1 %v1856_v18, %s2589_s5  ;;  %v1636_v40 = vpop.permute.xlu0 %1635 }
 0x5fa   : > { %v1641_v48 = vadd.f32 %v1636_v40, %v1557_v10 }
 0x5fb   : > { %v1298_v12 = vpop.permute.xlu1 %1297 }
 0x5fc   : > { %v1302_v1 = vadd.f32 %v1298_v12, %v1222_v4  ;;  %v4364_v4 = vld [vmem:[#allocation51_spill] sm:$0xff] }
 0x5fd   : > { %v1596_v17 = vpop.permute.xlu0 %1595 }
 0x5fe   : > { %v1601_v61 = vadd.f32 %v1596_v17, %v1517_v42 }
 0x5ff   : > { %v1362_v14 = vpop.permute.xlu1 %1361 }
 0x600   : > { %v1366_v22 = vadd.f32 %v1362_v14, %v1282_v29 }
 0x601   : > { %v1656_v60 = vpop.permute.xlu0 %1655 }
 0x602   : > { %v1661_v55 = vadd.f32 %v1656_v60, %v1577_v5 }
 0x603   : > { %v1422_v27 = vpop.permute.xlu1 %1421 }
 0x604   : > { %v1426_v41 = vadd.f32 %v1422_v27, %v1346_v11 }
 0x605   : > { %v1716_v46 = vpop.permute.xlu0 %1715 }
 0x606   : > { %v1494_v38 = vadd.f32 %v3539_v3, %v1426_v41  ;;  %v1721_v52 = vadd.f32 %v1716_v46, %v1641_v48  ;;  %v4365_v41 = vld [vmem:[#allocation64_spill] sm:$0xff] }
 0x607   : > { %v1382_v30 = vpop.permute.xlu1 %1381 }
 0x608   : > { %v1386_v49 = vadd.f32 %v1382_v30, %v1302_v1 }
 0x609   : > { %v1676_v58 = vpop.permute.xlu0 %1675 }
 0x60a   : > { %v1681_v26 = vadd.f32 %v1676_v58, %v1601_v61 }
 0x60b   : > { %v1442_v47 = vpop.permute.xlu1 %1441 }
 0x60c   : > { %v1446_v2 = vadd.f32 %v1442_v47, %v1366_v22 }
 0x60d   : > { %v1740_v50 = vpop.permute.xlu0 %1739 }
 0x60e   : > { %v1506_v24 = vadd.f32 %v3541_v20, %v1446_v2  ;;  %v1745_v39 = vadd.f32 %v1740_v50, %v1661_v55 }
 0x60f   : > { %v1462_v13 = vpop.permute.xlu1 %1461 }
 0x610   : > { %v1466_v43 = vadd.f32 %v1462_v13, %v1386_v49  ;;  %v4366_v49 = vld [vmem:[#allocation65_spill] sm:$0xff] }
 0x611   : > { %v1800_v28 = vpop.permute.xlu0 %1799 }
 0x612   : > { %v1518_v16 = vadd.f32 %v3563_v15, %v1466_v43  ;;  %v1805_v57 = vadd.f32 %v1800_v28, %v1721_v52 }
 0x613   : > { %v1554_v3 = vpop.permute.xlu1 %1553 }
 0x614   : > { %1869 = vrot.lane.b32.xlu0 %v1805_v57, %s4261_s22  ;;  %v1558_v44 = vadd.f32 %v1554_v3, %v1494_v38 }
 0x615   : > { %v1760_v23 = vpop.permute.xlu0 %1759 }
 0x616   : > { %v1765_v45 = vadd.f32 %v1760_v23, %v1681_v26 }
 0x617   : > { %v1574_v21 = vpop.permute.xlu1 %1573 }
 0x618   : > { %v1578_v12 = vadd.f32 %v1574_v21, %v1506_v24 }
 0x619   : > { %v1820_v20 = vpop.permute.xlu0 %1819 }
 0x61a   : > { %v1825_v53 = vadd.f32 %v1820_v20, %v1745_v39 }
 0x61b   : > { %v1638_v34 = vpop.permute.xlu1 %1637 }
 0x61c   : > { %1879 = vrot.lane.b32.xlu0 %v1825_v53, %s4296_s19  ;;  %v1642_v0 = vadd.f32 %v1638_v34, %v1558_v44 }
 0x61d   : > { %v1840_v15 = vpop.permute.xlu0 %1839 }
 0x61e   : > { %v1845_v54 = vadd.f32 %v1840_v15, %v1765_v45 }
 0x61f   : > { %v1598_v9 = vpop.permute.xlu1 %1597 }
 0x620   : > { %1889 = vrot.lane.b32.xlu0 %v1845_v54, %s4358_s23  ;;  %v1602_v27 = vadd.f32 %v1598_v9, %v1518_v16 }
 0x621   : > { %v988_v31 = vpop.permute.xlu0 %987 }
 0x622   : > { %v993_v59 = vadd.f32 %v988_v31, %v4364_v4 }
 0x623   : > { %v1658_v7 = vpop.permute.xlu1 %1657 }
 0x624   : > { %v1662_v56 = vadd.f32 %v1658_v7, %v1578_v12 }
 0x625   : > { %v1072_v25 = vpop.permute.xlu0 %1071 }
 0x626   : > { %v1077_v37 = vadd.f32 %v1072_v25, %v993_v59  ;;  %v2590_v59 = vmov 1983009808  }
 0x627   : > { %v1718_v51 = vpop.permute.xlu1 %1717 }
 0x628   : > { %v1722_v19 = vadd.f32 %v1718_v51, %v1642_v0 }
 0x629   : > { %v1152_v35 = vpop.permute.xlu0 %1151 }
 0x62a   : > { %v1157_v33 = vadd.f32 %v1152_v35, %v1077_v37 }
 0x62b   : > { %v1678_v62 = vpop.permute.xlu1 %1677 }
 0x62c   : > { %v1682_v46 = vadd.f32 %v1678_v62, %v1602_v27 }
 0x62d   : > { %v1236_v42 = vpop.permute.xlu0 %1235 }
 0x62e   : > { %v1241_v32 = vadd.f32 %v1236_v42, %v1157_v33 }
 0x62f   : > { %v1742_v6 = vpop.permute.xlu1 %1741 }
 0x630   : > { %v1746_v60 = vadd.f32 %v1742_v6, %v1662_v56  ;;  %v1913_v6 = vunpack.c.l.s4 %v2590_v59 }
 0x631   : > { %v1316_v63 = vpop.permute.xlu0 %1315 }
 0x632   : > { %v1321_v40 = vadd.f32 %v1316_v63, %v1241_v32  ;;  %v4367_v32 = vld [vmem:[#allocation24_spill] sm:$0xff] }
 0x633   : > { %v1802_v8 = vpop.permute.xlu1 %1801 }
 0x634   : > { %v1806_v18 = vadd.f32 %v1802_v8, %v1722_v19  ;;  %v1914_v19 = vunpack.c.0.s8 %v1913_v6 }
 0x635   : > { %v1400_v17 = vpop.permute.xlu0 %1399 }
 0x636   : > { %1871 = vrot.lane.b32.xlu1 %v1806_v18, %s4261_s22  ;;  %v1405_v11 = vadd.f32 %v1400_v17, %v1321_v40  ;;  %v1917_v18 = vsub.s32 %v1914_v19, %v4367_v32  ;;  %s2592_s22 = smov 32  }
 0x637   : > { %v1762_v14 = vpop.permute.xlu1 %1761 }
 0x638   : > { %v1481_v38 = vadd.f32 %v4365_v41, %v1405_v11  ;;  %v1766_v22 = vadd.f32 %v1762_v14, %v1682_v46 }
 0x639   : > { %v1532_v5 = vpop.permute.xlu0 %1531 }
 0x63a   : > { %v1537_v61 = vadd.f32 %v1532_v5, %v1481_v38 }
 0x63b   : > { %v1822_v30 = vpop.permute.xlu1 %1821 }
 0x63c   : > { %v1826_v29 = vadd.f32 %v1822_v30, %v1746_v60 }
 0x63d   : > { %v1616_v21 = vpop.permute.xlu0 %1615 }
 0x63e   : > { %1881 = vrot.lane.b32.xlu1 %v1826_v29, %s4296_s19  ;;  %v1621_v34 = vadd.f32 %v1616_v21, %v1537_v61  ;;  %s2593_s19 = smov 64  }
 0x63f   : > { %v1842_v47 = vpop.permute.xlu1 %1841 }
 0x640   : > { %v1846_v58 = vadd.f32 %v1842_v47, %v1766_v22 }
 0x641   : > { %v1696_v23 = vpop.permute.xlu0 %1695 }
 0x642   : > { %1891 = vrot.lane.b32.xlu1 %v1846_v58, %s4358_s23  ;;  %v1701_v20 = vadd.f32 %v1696_v23, %v1621_v34  ;;  %s2492_s23 = scalar_lea.vmem %s4016_s2, 512 }
 0x643   : > { %v990_v1 = vpop.permute.xlu1 %989  ;;  %p2493_p5 = scmp.ne.s32.totalorder %s4016_s2, %s2492_s23  ;;  %p2500_p1 = scmp.lt.s32.totalorder %s2498_s6, %s2492_s23 }
 0x644   : > { %v994_v24 = vadd.f32 %v990_v1, %v4366_v49 }
 0x645   : > { %v1780_v55 = vpop.permute.xlu0 %1779  ;;  %p2494_p8 = pnand %p2493_p5, %p4373_p12  ;;  %p2501_p4 = por %p2500_p1, %p2499_p10 }
 0x646   : > { %v1785_v53 = vadd.f32 %v1780_v55, %v1701_v20 }
 0x647   : > { %v1074_v2 = vpop.permute.xlu1 %1073  ;;  %p2495_p9 = pneg %p2494_p8 }
 0x648   : > { %v1078_v50 = vadd.f32 %v1074_v2, %v994_v24 }
 0x649   : > { %v1860_v39 = vpop.permute.xlu0 %1859  ;;  %p2502_p11 = pnand %p2501_p4, %p2495_p9 }
 0x64a   : > { %v1865_v45 = vadd.f32 %v1860_v39, %v1785_v53 }
 0x64b   : > { %v1154_v10 = vpop.permute.xlu1 %1153 }
 0x64c   : > { %v1158_v48 = vadd.f32 %v1154_v10, %v1078_v50 }
 0x64f   : > { %v1238_v13 = vpop.permute.xlu1 %1237 }
 0x650   : > { %v1242_v52 = vadd.f32 %v1238_v13, %v1158_v48 }
 0x653   : > { %v1318_v43 = vpop.permute.xlu1 %1317 }
 0x654   : > { %v1322_v16 = vadd.f32 %v1318_v43, %v1242_v52 }
 0x657   : > { %v1402_v3 = vpop.permute.xlu1 %1401 }
 0x658   : > { %v1406_v28 = vadd.f32 %v1402_v3, %v1322_v16 }
 0x65a   : > { %v1482_v57 = vadd.f32 %v3565_v36, %v1406_v28 }
 0x65b   : > { %v1534_v9 = vpop.permute.xlu1 %1533 }
 0x65c   : > { %v1538_v42 = vadd.f32 %v1534_v9, %v1482_v57 }
 0x65f   : > { %v1618_v25 = vpop.permute.xlu1 %1617 }
 0x660   : > { %v1622_v37 = vadd.f32 %v1618_v25, %v1538_v42 }
 0x663   : > { %v1698_v36 = vpop.permute.xlu1 %1697 }
 0x664   : > { %v1702_v33 = vadd.f32 %v1698_v36, %v1622_v37  ;;  %v2029_v36 = vld [vmem:[%s4369_s3 + $0x8] sm:$0xff] }
 0x667   : > { %v1782_v35 = vpop.permute.xlu1 %1781 }
 0x668   : > { %v1786_v63 = vadd.f32 %v1782_v35, %v1702_v33  ;;  %v2030_v35 = vld [vmem:[%s4369_s3 + $0x10] sm:$0xff] }
 0x66b   : > { %v1862_v0 = vpop.permute.xlu1 %1861 }
 0x66c   : > { %v1866_v12 = vadd.f32 %v1862_v0, %v1786_v63 }
 0x686   : > { %v1870_v26 = vpop.permute.xlu0 %1869 }
 0x687   : > { %v1875_v54 = vadd.f32 %v1870_v26, %v1865_v45 }
 0x68e   : > { %v1880_v15 = vpop.permute.xlu0 %1879 }
 0x68f   : > { %v1885_v7 = vadd.f32 %v1880_v15, %v1875_v54  ;;  %v2035_v54 = vsub.s32 0, %v4367_v32 }
 0x692   : > { %v1890_v31 = vpop.permute.xlu0 %1889 }
 0x693   : > { %v1895_v51 = vadd.f32 %v1890_v31, %v1885_v7  ;;  %v2039_v7 = vsub.s32 1, %v4367_v32 }
 0x695   : > { %v2297_v62 = vmul.f32 -1.442695, %v1895_v51  ;;  %v2028_v51 = vld [vmem:[%s4369_s3] sm:$0xff] }
 0x697   : > { %2439 = vpow2.f32 %v2297_v62 }
 0x6a1   : > { %v2440_v44 = vpop.eup %2439 }
 0x6a2   : > { %v1903_v4 = vadd.f32 1.0, %v2440_v44  ;;  %v2031_v44 = vld [vmem:[%s4369_s3 + $0x18] sm:$0xff] }
 0x6a4   : > { %2441 = vrcp.f32 %v1903_v4 }
 0x6a8   : > { %v1872_v8 = vpop.permute.xlu1 %1871 }
 0x6a9   : > { %v1876_v17 = vadd.f32 %v1872_v8, %v1866_v12 }
 0x6ae   : > { %v2442_v40 = vpop.eup %2441 }
 0x6af   : > { %v1918_v56 = vrot.slane %v2442_v40, %v1917_v18  ;;  %1910 = vst.msk [vmem:[#allocation3] sm:$0x1] %vm1909_vm9, %v2442_v40  ;;  %v1939_v46 = vcombine.high %v2442_v40, %v2442_v40 }
 0x6b0   : > { %v1882_v14 = vpop.permute.xlu1 %1881 }
 0x6b1   : > { %v1886_v11 = vadd.f32 %v1882_v14, %v1876_v17  ;;  %v2299_v27 = vrot.slane %v1918_v56, 9  ;;  %v1926_v30 = vcombine.high %v1918_v56, %v1918_v56  ;;  %v1946_v29 = vrot.slane %v1939_v46, %v1917_v18 }
 0x6b3   : > { %1921 = vrot.lane.b32.xlu0 %v2299_v27, %s2591_s28  ;;  %v2300_v22 = vrot.slane %v1926_v30, 9  ;;  %v2301_v58 = vrot.slane %v1946_v29, 9  ;;  %v1959_v2 = vcombine.high %v1946_v29, %v1946_v29 }
 0x6b4   : > { %v1892_v60 = vpop.permute.xlu1 %1891 }
 0x6b5   : > { %v1896_v41 = vadd.f32 %v1892_v60, %v1886_v11  ;;  %v2302_v10 = vrot.slane %v1959_v2, 9 }
 0x6b7   : > { %v2298_v38 = vmul.f32 -1.442695, %v1896_v41  ;;  %1927 = vrot.lane.b32.xlu0 %v1926_v30, %s2592_s22 }
 0x6b9   : > { %2443 = vpow2.f32 %v2298_v38 }
 0x6bb   : > { %1947 = vrot.lane.b32.xlu0 %v1946_v29, %s2593_s19 }
 0x6bf   : > { %1934 = vrot.lane.b32.xlu0 %v2300_v22, %s2594_s14 }
 0x6c3   : > { %v2444_v47 = vpop.eup %2443  ;;  %1954 = vrot.lane.b32.xlu0 %v2301_v58, %s2595_s1 }
 0x6c4   : > { %v1904_v1 = vadd.f32 1.0, %v2444_v47 }
 0x6c6   : > { %2445 = vrcp.f32 %v1904_v1 }
 0x6c7   : > { %1960 = vrot.lane.b32.xlu0 %v1959_v2, %s2596_s26 }
 0x6cb   : > { %1967 = vrot.lane.b32.xlu0 %v2302_v10, %s2597_s29 }
 0x6d0   : > { %v2446_v49 = vpop.eup %2445 }
 0x6d1   : > { %v1980_v24 = vrot.slane %v2446_v49, %v1917_v18  ;;  %1972 = vst.msk [vmem:[#allocation3 + $0x2] sm:$0x1] %vm1909_vm9, %v2446_v49  ;;  %v1998_v48 = vcombine.high %v2446_v49, %v2446_v49 }
 0x6d3   : > { %v2303_v13 = vrot.slane %v1980_v24, 9  ;;  %v1987_v50 = vcombine.high %v1980_v24, %v1980_v24  ;;  %v2005_v43 = vrot.slane %v1998_v48, %v1917_v18 }
 0x6d5   : > { %1983 = vrot.lane.b32.xlu1 %v2303_v13, %s2591_s28  ;;  %v2304_v52 = vrot.slane %v1987_v50, 9  ;;  %v2305_v16 = vrot.slane %v2005_v43, 9  ;;  %v2016_v3 = vcombine.high %v2005_v43, %v2005_v43 }
 0x6d7   : > { %v2306_v28 = vrot.slane %v2016_v3, 9 }
 0x6d9   : > { %1988 = vrot.lane.b32.xlu1 %v1987_v50, %s2592_s22 }
 0x6dd   : > { %2006 = vrot.lane.b32.xlu1 %v2005_v43, %s2593_s19 }
 0x6e1   : > { %1994 = vrot.lane.b32.xlu1 %v2304_v52, %s2594_s14 }
 0x6e5   : > { %2012 = vrot.lane.b32.xlu1 %v2305_v16, %s2595_s1 }
 0x6e9   : > { %2017 = vrot.lane.b32.xlu1 %v2016_v3, %s2596_s26 }
 0x6ed   : > { %2023 = vrot.lane.b32.xlu1 %v2306_v28, %s2597_s29 }
 0x725   : > { %v1922_v57 = vpop.permute.xlu0 %1921 }
 0x726   : > { %1925 = vst.msk [vmem:[#allocation3] sm:$0x1] %vm1924_vm10, %v1922_v57 }
 0x729   : > { %v1928_v5 = vpop.permute.xlu0 %1927 }
 0x72a   : > { %1931 = vst.msk [vmem:[#allocation3] sm:$0x1] %vm1930_vm11, %v1928_v5 }
 0x72d   : > { %v1948_v21 = vpop.permute.xlu0 %1947 }
 0x731   : > { %v1935_v23 = vpop.permute.xlu0 %1934 }
 0x732   : > { %1938 = vst.msk [vmem:[#allocation3] sm:$0x1] %vm1937_vm12, %v1935_v23 }
 0x733   : > { %1951 = vst.msk [vmem:[#allocation3] sm:$0x1] %vm1950_vm13, %v1948_v21 }
 0x735   : > { %v1955_v55 = vpop.permute.xlu0 %1954 }
 0x736   : > { %1958 = vst.msk [vmem:[#allocation3] sm:$0x1] %vm1957_vm14, %v1955_v55 }
 0x739   : > { %v1961_v61 = vpop.permute.xlu0 %1960 }
 0x73a   : > { %1964 = vst.msk [vmem:[#allocation3] sm:$0x1] %vm1963_vm15, %v1961_v61 }
 0x73d   : > { %v1968_v39 = vpop.permute.xlu0 %1967 }
 0x73e   : > { %1971 = vst.msk [vmem:[#allocation3] sm:$0x1] %vm1970_vm0, %v1968_v39 }
 0x747   : > { %v1984_v34 = vpop.permute.xlu1 %1983 }
 0x748   : > { %1986 = vst.msk [vmem:[#allocation3 + $0x2] sm:$0x1] %vm1924_vm10, %v1984_v34 }
 0x74b   : > { %v1989_v20 = vpop.permute.xlu1 %1988 }
 0x74c   : > { %1991 = vst.msk [vmem:[#allocation3 + $0x2] sm:$0x1] %vm1930_vm11, %v1989_v20 }
 0x74f   : > { %v2007_v26 = vpop.permute.xlu1 %2006 }
 0x753   : > { %v1995_v53 = vpop.permute.xlu1 %1994 }
 0x754   : > { %1997 = vst.msk [vmem:[#allocation3 + $0x2] sm:$0x1] %vm1937_vm12, %v1995_v53 }
 0x755   : > { %2009 = vst.msk [vmem:[#allocation3 + $0x2] sm:$0x1] %vm1950_vm13, %v2007_v26 }
 0x757   : > { %v2013_v45 = vpop.permute.xlu1 %2012 }
 0x758   : > { %2015 = vst.msk [vmem:[#allocation3 + $0x2] sm:$0x1] %vm1957_vm14, %v2013_v45 }
 0x75b   : > { %v2018_v9 = vpop.permute.xlu1 %2017 }
 0x75c   : > { %2020 = vst.msk [vmem:[#allocation3 + $0x2] sm:$0x1] %vm1963_vm15, %v2018_v9 }
 0x75f   : > { %v2024_v15 = vpop.permute.xlu1 %2023 }
 0x760   : > { %2026 = vst.msk [vmem:[#allocation3 + $0x2] sm:$0x1] %vm1970_vm0, %v2024_v15 }
 0x767   : > { %v2027_v31 = vld [vmem:[#allocation3] ss:$2 sm:$0x3] }
 0x768   : > { %v2036_v25 = vrot.slane %v2027_v31, %v2035_v54  ;;  %v2040_v62 = vrot.slane %v2027_v31, %v2039_v7 }
 0x76a   : > { %v2043_v4 = vmul.f32 %v2036_v25, %v2028_v51  ;;  %v2044_v59 = vmul.f32 %v2040_v62, %v2029_v36  ;;  %v2045_v6 = vmul.f32 %v2036_v25, %v2030_v35  ;;  %v2046_v42 = vmul.f32 %v2040_v62, %v2031_v44 }
 0x76c   : > { %2047 = vst [vmem:[%s4369_s3] sm:$0xff] %v2043_v4  ;;  %2048 = vst [vmem:[%s4369_s3 + $0x8] sm:$0xff] %v2044_v59 }
 0x76d   : > { %2049 = vst [vmem:[%s4369_s3 + $0x10] sm:$0xff] %v2045_v6  ;;  %2050 = vst [vmem:[%s4369_s3 + $0x18] sm:$0xff] %v2046_v42 }
 0x76e   : > { %2505 = shalt.err (!%p2502_p11)
}
 0x76f   : > { %s2506_s16 = scalar_lea.hbm %s4014_s7, 512  ;;  %s2510_s30 = scalar_lea.hbm %s4372_s4, 1024 }
 0x770   : > { %p2507_p0 = scmp.ne.s32.totalorder %s4014_s7, %s2506_s16  ;;  %p2511_p6 = scmp.lt.u32.totalorder %s4014_s7, %s4372_s4 }
 0x771   : > { %p2512_p3 = scmp.lt.u32.totalorder %s2510_s30, %s2506_s16  ;;  %p2514_p5 = scmp.lt.u32.totalorder %s2506_s16, %s4014_s7 }
 0x772   : > { %p2508_p2 = pnand %p2507_p0, %p4373_p12 }
 0x773   : > { %p2513_p13 = por %p2512_p3, %p2511_p6 }
 0x774   : > { %p2509_p7 = pneg %p2508_p2 }
 0x775   : > { %p2515_p8 = por %p2514_p5, %p2513_p13 }
 0x777   : > { %p2516_p9 = pnand %p2515_p8, %p2509_p7 }
 0x779   : > { %2519 = shalt.err (!%p2516_p9)
}
 0x77a   : > { %s2599_s25 = smov 256  }
 0x77b   : > { %2345 = dma.vmem_to_hbm [thread:$0]  (%p4373_p12), %s4016_s2, 512, %s4014_s7, %s2052_s8, %s2599_s25, %s2599_s25, %s2591_s28  }
 0x77c PF: > { %s4374_s0 = sld [smem:[#allocation13_spill]]  ;;  %s4375_s27 = sld [smem:[#allocation21_spill]] }
 0x77d   : > { %s4376_s22 = sld [smem:[#allocation16_spill]] }
 0x782   : > { %s2080_s19 = sand.u32 1, %s4374_s0   ;;  %p4377_p10 = scmp.ne.s32.totalorder %s4375_s27, 0 }
 0x783   : > { %p4378_p1 = scmp.ge.s32.totalorder %s4376_s22, 2  ;;  %s2081_s14 = scalar_lea.sflag [#allocation6], %s2080_s19 }
 0x785   : > { %p2356_p4 = pnand %p4378_p1, %p4377_p10 }
 0x787   : > { %2545 = dma.done.wait (!%p2356_p4), %s2081_s14, 512  }
 0x788   : > { %2547 = vsyncadd (!%p2356_p4), %s2081_s14, 4294966784  ;;  %s4379_s18 = sld [smem:[#allocation18_spill]]  ;;  %s4380_s15 = sld [smem:[#allocation14_spill]] }
 0x789   : > { %s4381_s16 = sld [smem:[#allocation15_spill]]  ;;  %s4382_s17 = sld [smem:[#allocation19_spill]] }
 0x78e   : > { %p18_p11 = scmp.ge.s32.totalorder %s4379_s18, 4  }
 0x790   :  { %20 = sbr.rel (!%p18_p11) target bundleno = 12 (0xc), region = 88 }
 0x797   :  { %2086 = vsyncpa [#allocation5], 1 }
 0x798   :  { %2088 = vsyncpa [#allocation5 + $0x1], 1 }
 0x799   :  { %2089 = vsyncpa [#allocation6], 1 }
 0x79a   :  { %2091 = vsyncpa [#allocation6 + $0x1], 1 }
 0x79b   :  { %2092 = vsyncpa [#allocation7], 1 }
 0x79c   :  { %2094 = vsyncpa [#allocation7 + $0x1], 1 }

</bundles_post_ra>
